<compile_context>
chip_gen: v6e
topology: v6e:2x2x1
jax: 0.10.0
libtpu: 0.0.40
codegen_flags: <defaults>
</compile_context>

<pallas_src>
import functools

import jax
import jax.numpy as jnp
from jax.experimental import pallas as pl
from jax.experimental.pallas import tpu as pltpu

EPS = 1e-5          # nn.GroupNorm default eps
NEG_SLOPE = 0.01    # F.leaky_relu default negative_slope


# --------------------------------------------------------------------------- #
# small helpers
# --------------------------------------------------------------------------- #
def _leaky(y):
    return jnp.where(y > 0, y, NEG_SLOPE * y)


def _round_up(x, m):
    return ((x + m - 1) // m) * m


def _pick_tile(n_padded, target):
    """Largest multiple-of-128 divisor of n_padded (itself a 128-multiple) <= target."""
    t = (max(128, min(target, n_padded)) // 128) * 128
    while t > 128:
        if n_padded % t == 0:
            return t
        t -= 128
    return 128


def _vmem_capacity_bytes():
    """Physical VMEM per TensorCore (used to size caches / fast-path thresholds)."""
    try:
        cap = int(getattr(pltpu.get_tpu_info(), "vmem_capacity_bytes", 0))
        if cap > 0:
            return cap
    except Exception:
        pass
    try:
        kind = jax.devices()[0].device_kind.lower()
    except Exception:
        kind = ""
    if "v7" in kind or "7x" in kind:
        return 64 * 1024 * 1024            # v7x: 64 MiB per TC
    if "v2" in kind or "v3" in kind:
        return 16 * 1024 * 1024
    return 128 * 1024 * 1024               # v4 / v5e / v5p / v6e


def _per_point_kernel_bytes(cin, h0, h1, cout):
    """Conservative per-point VMEM working set of the fused per-tile compute:
    x block (bf16, double-buffered) + out block (f32, double-buffered) +
    f32/bf16 intermediates (y0, h0, h0_bf16, y1, h1, h1_bf16)."""
    return 4 * cin + 8 * cout + 10 * (h0 + h1)


def _const_spec(a):
    """Weight arrays: resident in VMEM, constant block index on any grid rank."""
    zeros = (0,) * a.ndim
    return pl.BlockSpec(a.shape, lambda *idx: zeros)


# --------------------------------------------------------------------------- #
# GroupNorm scale/shift from accumulated per-channel (sum, sumsq)
# --------------------------------------------------------------------------- #
def _gn_scale_shift(sum_c, sq_c, gm, gmt, gamma, beta, count):
    """sum_c/sq_c: [H,1] per-channel sums; gm: [H,G] one-hot membership, gmt: [G,H].
    Returns per-channel (scale, shift) so that  gn(y) = y * scale + shift."""
    inv = 1.0 / count
    gsum = jnp.dot(gmt, sum_c, preferred_element_type=jnp.float32)    # [G, 1]
    gsq = jnp.dot(gmt, sq_c, preferred_element_type=jnp.float32)      # [G, 1]
    mean_g = gsum * inv
    var_g = jnp.maximum(gsq * inv - mean_g * mean_g, 0.0)             # clamp >= 0
    rstd_g = jax.lax.rsqrt(var_g + EPS)
    mean_c = jnp.dot(gm, mean_g, preferred_element_type=jnp.float32)  # [H, 1]
    rstd_c = jnp.dot(gm, rstd_g, preferred_element_type=jnp.float32)  # [H, 1]
    scale = gamma * rstd_c
    shift = beta - mean_c * scale
    return scale, shift


def _finalize_gn(stat_ref, gm_ref, gmt_ref, aux_ref, count):
    """Overwrite accumulated [sum, sumsq] in stat_ref with [scale, shift]."""
    scale, shift = _gn_scale_shift(stat_ref[:, 0:1], stat_ref[:, 1:2],
                                   gm_ref[...], gmt_ref[...],
                                   aux_ref[:, 1:2], aux_ref[:, 2:3], count)
    stat_ref[...] = jnp.concatenate([scale, shift], axis=1)           # single store


# --------------------------------------------------------------------------- #
# Path 1: single-pass kernel (whole sample resident in VMEM), grid = (B,)
# --------------------------------------------------------------------------- #
def _single_pass_kernel(x_ref, w0t, aux0, gm0, gm0t, w1at, w1bt, aux1, gm1, gm1t,
                        w2t, b2, o_ref, *, n_actual, needs_mask):
    x = x_ref[0]                                          # [Cin, Np] bf16
    np_ = x.shape[1]
    h0n, g0n = gm0.shape
    h1n, g1n = gm1.shape
    cnt0 = float(n_actual * (h0n // g0n))
    cnt1 = float(n_actual * (h1n // g1n))

    if needs_mask:
        valid = jax.lax.broadcasted_iota(jnp.int32, (1, np_), 1) < n_actual
    else:
        valid = None

    def stats(y):
        ym = jnp.where(valid, y, 0.0) if needs_mask else y
        return (jnp.sum(ym, axis=1, keepdims=True),
                jnp.sum(ym * ym, axis=1, keepdims=True))

    # ---- layer 0: 1x1 conv (channel matmul) + GroupNorm + LeakyReLU ----
    y0 = jnp.dot(w0t[...], x, preferred_element_type=jnp.float32) + aux0[:, 0:1]
    s0, q0 = stats(y0)
    sc0, sh0 = _gn_scale_shift(s0, q0, gm0[...], gm0t[...],
                               aux0[:, 1:2], aux0[:, 2:3], cnt0)
    h0 = _leaky(y0 * sc0 + sh0)

    # ---- layer 1 (res layer): concat([h0, x]) @ w1  ==  w1a^T@h0 + w1b^T@x ----
    y1 = (jnp.dot(w1at[...], h0.astype(jnp.bfloat16),
                  preferred_element_type=jnp.float32)
          + jnp.dot(w1bt[...], x, preferred_element_type=jnp.float32)
          + aux1[:, 0:1])
    s1, q1 = stats(y1)
    sc1, sh1 = _gn_scale_shift(s1, q1, gm1[...], gm1t[...],
                               aux1[:, 1:2], aux1[:, 2:3], cnt1)
    h1 = _leaky(y1 * sc1 + sh1)

    # ---- output layer ----
    out = (jnp.dot(w2t[...], h1.astype(jnp.bfloat16),
                   preferred_element_type=jnp.float32) + b2[...])
    o_ref[0] = out.astype(o_ref.dtype)                    # lane-dense [Cout, Np]


# --------------------------------------------------------------------------- #
# Path 2: phased kernel (large N), grid = (B, 3, n_tiles), VMEM cache of x / y1
# --------------------------------------------------------------------------- #
def _phased_kernel(x_hbm, w0t, aux0, gm0, gm0t, w1at, w1bt, aux1, gm1, gm1t,
                   w2t, b2, o_ref, x_cache, y1_cache, stat0, stat1, *,
                   n_actual, tn, needs_mask, cached):
    phase = pl.program_id(1)
    nt = pl.program_id(2)
    last_nt = pl.num_programs(2) - 1
    off = pl.multiple_of(nt * tn, tn)                     # tn is a multiple of 128

    h0n, g0n = gm0.shape
    h1n, g1n = gm1.shape
    cnt0 = float(n_actual * (h0n // g0n))
    cnt1 = float(n_actual * (h1n // g1n))

    if needs_mask:
        gidx = off + jax.lax.broadcasted_iota(jnp.int32, (1, tn), 1)
        valid = gidx < n_actual
    else:
        valid = None

    def stats(y):
        ym = jnp.where(valid, y, 0.0) if needs_mask else y
        return jnp.concatenate(
            [jnp.sum(ym, axis=1, keepdims=True),
             jnp.sum(ym * ym, axis=1, keepdims=True)], axis=1)        # one [H,2] update

    def y0_of(x):
        return jnp.dot(w0t[...], x, preferred_element_type=jnp.float32) + aux0[:, 0:1]

    def y1_of(x, h0):
        return (jnp.dot(w1at[...], h0.astype(jnp.bfloat16),
                        preferred_element_type=jnp.float32)
                + jnp.dot(w1bt[...], x, preferred_element_type=jnp.float32)
                + aux1[:, 0:1])

    # ---- phase 0: read x tile from HBM (only phase that does), cache it,
    #      accumulate layer-0 GroupNorm statistics ----
    @pl.when(phase == 0)
    def _():
        x = x_hbm[0]                                      # [Cin, tn] bf16
        if cached:
            x_cache[:, pl.ds(off, tn)] = x
        y0 = y0_of(x)

        @pl.when(nt == 0)
        def _():
            stat0[...] = jnp.zeros_like(stat0)

        stat0[...] += stats(y0)

        @pl.when(nt == last_nt)
        def _():
            _finalize_gn(stat0, gm0, gm0t, aux0, cnt0)

    # ---- phase 1: recompute y0 from cached x, normalize, layer-1 pre-activation,
    #      cache y1, accumulate layer-1 statistics ----
    @pl.when(phase == 1)
    def _():
        x = x_cache[:, pl.ds(off, tn)] if cached else x_hbm[0]
        h0 = _leaky(y0_of(x) * stat0[:, 0:1] + stat0[:, 1:2])
        y1 = y1_of(x, h0)
        if cached:
            y1_cache[:, pl.ds(off, tn)] = y1

        @pl.when(nt == 0)
        def _():
            stat1[...] = jnp.zeros_like(stat1)

        stat1[...] += stats(y1)

        @pl.when(nt == last_nt)
        def _():
            _finalize_gn(stat1, gm1, gm1t, aux1, cnt1)

    # ---- phase 2: normalize cached y1 (or recompute it if uncached) and emit
    #      the output tile ----
    @pl.when(phase == 2)
    def _():
        if cached:
            y1 = y1_cache[:, pl.ds(off, tn)]
        else:
            x = x_hbm[0]
            h0 = _leaky(y0_of(x) * stat0[:, 0:1] + stat0[:, 1:2])
            y1 = y1_of(x, h0)
        h1 = _leaky(y1 * stat1[:, 0:1] + stat1[:, 1:2])
        out = (jnp.dot(w2t[...], h1.astype(jnp.bfloat16),
                       preferred_element_type=jnp.float32) + b2[...])
        o_ref[0] = out.astype(o_ref.dtype)                # lane-dense [Cout, tn]


# --------------------------------------------------------------------------- #
# wrapper
# --------------------------------------------------------------------------- #
def generator_forward(noise, params, *, tile_n=8192, force_path=None,
                      vmem_budget_bytes=None):
    """noise: [B, C_in, N] (NCW, like PyTorch Conv1d).  Returns [B, C_out, N] f32."""
    B, Cin, N = noise.shape
    (w0, b0, g0w, g0b, gm0, w1, b1, g1w, g1b, gm1, w2, b2) = params
    H0 = w0.shape[1]
    H1 = w1.shape[1]
    Cout = w2.shape[1]
    bf16 = jnp.bfloat16

    # pad N to a multiple of 128 (lane-dense tiles / stores); mask stats in-kernel
    Np = _round_up(N, 128)
    needs_mask = Np != N
    x = noise.astype(bf16)
    if needs_mask:
        x = jnp.pad(x, ((0, 0), (0, 0), (0, Np - N)))

    # --- repack the (tiny) parameters into channel-major, kernel-friendly form ---
    w0t = jnp.transpose(w0).astype(bf16)                      # [H0, Cin]
    w1at = jnp.transpose(w1[:H0]).astype(bf16)                # [H1, H0]  (res: hidden)
    w1bt = jnp.transpose(w1[H0:]).astype(bf16)                # [H1, Cin] (res: input)
    w2t = jnp.transpose(w2).astype(bf16)                      # [Cout, H1]
    aux0 = jnp.concatenate([b0.T, g0w.T, g0b.T], axis=1).astype(jnp.float32)  # [H0,3]
    aux1 = jnp.concatenate([b1.T, g1w.T, g1b.T], axis=1).astype(jnp.float32)  # [H1,3]
    gm0f = gm0.astype(jnp.float32)                            # [H0, G]
    gm1f = gm1.astype(jnp.float32)                            # [H1, G]
    gm0t = jnp.transpose(gm0f)                                # [G, H0]
    gm1t = jnp.transpose(gm1f)                                # [G, H1]
    b2t = jnp.transpose(b2).astype(jnp.float32)               # [Cout, 1]
    weights = (w0t, aux0, gm0f, gm0t, w1at, w1bt, aux1, gm1f, gm1t, w2t, b2t)

    # --- per-generation VMEM budget (v7x: 64 MiB physical, v5e/v6e: 128 MiB) ---
    cap = _vmem_capacity_bytes()
    vmem_limit = int(cap * 0.85)
    budget = int(vmem_budget_bytes) if vmem_budget_bytes is not None else int(cap * 0.65)

    per_pt = _per_point_kernel_bytes(Cin, H0, H1, Cout)
    single_bytes = Np * per_pt
    use_single = (force_path == "single"
                  or (force_path is None and single_bytes <= budget))

    # ------------------------------------------------------------------ #
    # Path 1: single pass, one grid step per sample
    # ------------------------------------------------------------------ #
    if use_single:
        grid_spec = pltpu.PrefetchScalarGridSpec(
            num_scalar_prefetch=0,
            grid=(B,),
            in_specs=[pl.BlockSpec((1, Cin, Np), lambda b: (b, 0, 0))]
                     + [_const_spec(a) for a in weights],
            out_specs=pl.BlockSpec((1, Cout, Np), lambda b: (b, 0, 0)),
        )
        out = pl.pallas_call(
            functools.partial(_single_pass_kernel, n_actual=N, needs_mask=needs_mask),
            out_shape=jax.ShapeDtypeStruct((B, Cout, Np), jnp.float32),
            grid_spec=grid_spec,
            compiler_params=pltpu.CompilerParams(
                dimension_semantics=("parallel",),
                vmem_limit_bytes=vmem_limit),
        )(x, *weights)

    # ------------------------------------------------------------------ #
    # Path 2: 3-phase, per-sample VMEM cache of x (bf16) and y1 (f32)
    # ------------------------------------------------------------------ #
    else:
        cache_bytes = Np * (2 * Cin + 4 * H1)
        cached = (cache_bytes + 128 * per_pt) <= budget
        fixed = cache_bytes if cached else 0

        tn = _pick_tile(Np, tile_n)
        while tn > 128 and fixed + tn * per_pt > budget:
            tn = _pick_tile(Np, tn - 128)
        n_tiles = Np // tn

        if cached:
            # x only read from HBM during phase 0; collapse to block 0 afterwards
            x_map = lambda b, p, n: (b, 0, n * ((2 - p) // 2))
        else:
            x_map = lambda b, p, n: (b, 0, n)

        grid_spec = pltpu.PrefetchScalarGridSpec(
            num_scalar_prefetch=0,
            grid=(B, 3, n_tiles),                          # b, phase, n-tile
            in_specs=[pl.BlockSpec((1, Cin, tn), x_map)]
                     + [_const_spec(a) for a in weights],
            # Output tiles only exist in phase 2; the index collapses to block 0
            # during the statistics phases.  The resident (b,0,0) block is never
            # flushed until phase 2 writes it (block index unchanged => no
            # writeback), so every HBM writeback carries valid phase-2 data.
            out_specs=pl.BlockSpec((1, Cout, tn),
                                   lambda b, p, n: (b, 0, n * (p // 2))),
            scratch_shapes=[
                pltpu.VMEM((Cin, Np if cached else 128), bf16),        # x cache
                pltpu.VMEM((H1, Np if cached else 128), jnp.float32),  # y1 cache
                pltpu.VMEM((H0, 2), jnp.float32),   # layer-0 stats -> scale/shift
                pltpu.VMEM((H1, 2), jnp.float32),   # layer-1 stats -> scale/shift
            ],
        )
        out = pl.pallas_call(
            functools.partial(_phased_kernel, n_actual=N, tn=tn,
                              needs_mask=needs_mask, cached=cached),
            out_shape=jax.ShapeDtypeStruct((B, Cout, Np), jnp.float32),
            grid_spec=grid_spec,
            compiler_params=pltpu.CompilerParams(
                # N-tile axis is a reduction (GroupNorm stats) -> must stay arbitrary
                dimension_semantics=("parallel", "arbitrary", "arbitrary"),
                vmem_limit_bytes=vmem_limit),
        )(x, *weights)

    if needs_mask:
        out = out[..., :N]
    return out


# --------------------------------------------------------------------------- #
# parameter init + pure-JAX reference
# --------------------------------------------------------------------------- #
def _group_matrix(C, G):
    cg = C // G
    return (jnp.arange(C)[:, None] // cg == jnp.arange(G)[None, :]).astype(jnp.float32)


def init_params(key, input_dim, hidden, output_dim, groups=32):
    H0, H1 = hidden
    ks = jax.random.split(key, 10)
    nrm = lambda k, shape, s=0.1: s * jax.random.normal(k, shape, jnp.float32)
    w0 = nrm(ks[0], (input_dim, H0))
    b0 = nrm(ks[1], (1, H0))
    g0w = 1.0 + nrm(ks[2], (1, H0))
    g0b = nrm(ks[3], (1, H0))
    gm0 = _group_matrix(H0, groups)
    w1 = nrm(ks[4], (H0 + input_dim, H1))    # res_layers=[1] -> concat input channels
    b1 = nrm(ks[5], (1, H1))
    g1w = 1.0 + nrm(ks[6], (1, H1))
    g1b = nrm(ks[7], (1, H1))
    gm1 = _group_matrix(H1, groups)
    w2 = nrm(ks[8], (H1, output_dim))
    b2 = nrm(ks[9], (1, output_dim))
    return (w0, b0, g0w, g0b, gm0, w1, b1, g1w, g1b, gm1, w2, b2)


def reference_forward(noise, params):
    """Pure-JAX reference mirroring the PyTorch MLP semantics (matmuls in bf16 with
    f32 accumulation, same as the kernel's MXU path; GN / LeakyReLU in f32)."""
    w0, b0, g0w, g0b, gm0, w1, b1, g1w, g1b, gm1, w2, b2 = params
    x = jnp.transpose(noise, (0, 2, 1)).astype(jnp.float32)   # [B, N, Cin]

    def bdot(a, b):
        return jnp.dot(a.astype(jnp.bfloat16), b.astype(jnp.bfloat16),
                       preferred_element_type=jnp.float32)

    def gn(y, gamma, beta, G):
        Bb, N, C = y.shape
        cg = C // G
        yg = y.reshape(Bb, N, G, cg)
        mean = yg.mean(axis=(1, 3), keepdims=True)
        var = yg.var(axis=(1, 3), keepdims=True)
        yg = (yg - mean) / jnp.sqrt(var + EPS)
        return yg.reshape(Bb, N, C) * gamma + beta

    y = bdot(x, w0) + b0
    y = _leaky(gn(y, g0w, g0b, gm0.shape[1]))
    y = jnp.concatenate([y, x], axis=-1)                      # res layer
    y = bdot(y, w1) + b1
    y = _leaky(gn(y, g1w, g1b, gm1.shape[1]))
    y = bdot(y, w2) + b2
    return jnp.transpose(y, (0, 2, 1))


if __name__ == "__main__":
    # Generator(input_dim=32, output_dim=3, hidden_channels=[64, 64],
    #           merge_layer=0, res_layers=[1], norm='group')
    B, INPUT_DIM = 2, 32
    HIDDEN = (64, 64)
    OUTPUT_DIM = 3

    key = jax.random.PRNGKey(0)
    k_noise, k_param = jax.random.split(key)
    params = init_params(k_param, INPUT_DIM, HIDDEN, OUTPUT_DIM, groups=32)

    def check(n, **kw):
        noise = jax.random.normal(jax.random.fold_in(k_noise, n),
                                  (B, INPUT_DIM, n), jnp.float32)
        fwd = jax.jit(functools.partial(generator_forward, **kw))
        out = jax.block_until_ready(fwd(noise, params))
        ref = reference_forward(noise, params)
        assert out.shape == (B, OUTPUT_DIM, n), (out.shape, kw)
        max_err = float(jnp.max(jnp.abs(out - ref)))
        assert jnp.allclose(out, ref, rtol=1e-2, atol=1e-2), (n, kw, max_err)

    # 1) single-pass fast path (auto-selected at this size)
    check(1024)
    # 2) large-N 3-phase path with VMEM x/y1 caching (forced, multi-tile, B>1)
    check(1024, force_path="phased", tile_n=256)
    # 3) non-multiple-of-128 N -> padded + masked statistics (single-pass)
    check(1000)
    # 4) non-multiple-of-128 N on the phased/cached path
    check(1000, force_path="phased", tile_n=256)
    # 5) phased path with the cache disabled by a tiny budget (uncached fallback)
    check(1024, force_path="phased", tile_n=256, vmem_budget_bytes=256 * 1024)

    print("KERNEL_OK")
</pallas_src>

<mosaic_0001>
module attributes {stable_mosaic.version = 11 : i64} {
  func.func @_single_pass_kernel(%arg0: i32, %arg1: memref<1x32x1024xbf16, #tpu.memory_space<vmem>>, %arg2: memref<64x32xbf16, #tpu.memory_space<vmem>>, %arg3: memref<64x3xf32, #tpu.memory_space<vmem>>, %arg4: memref<64x32xf32, #tpu.memory_space<vmem>>, %arg5: memref<32x64xf32, #tpu.memory_space<vmem>>, %arg6: memref<64x64xbf16, #tpu.memory_space<vmem>>, %arg7: memref<64x32xbf16, #tpu.memory_space<vmem>>, %arg8: memref<64x3xf32, #tpu.memory_space<vmem>>, %arg9: memref<64x32xf32, #tpu.memory_space<vmem>>, %arg10: memref<32x64xf32, #tpu.memory_space<vmem>>, %arg11: memref<3x64xbf16, #tpu.memory_space<vmem>>, %arg12: memref<3x1xf32, #tpu.memory_space<vmem>>, %arg13: memref<1x3x1024xf32, #tpu.memory_space<vmem>>) attributes {dimension_semantics = [#tpu.dimension_semantics<parallel>], iteration_bounds = array<i64: 2>, scalar_prefetch = 0 : i64, scratch_operands = 0 : i64, tpu.core_type = #tpu.core_type<tc>, window_params = [{transform_indices = @transform_0, window_bounds = array<i64: 1, 32, 1024>}, {pipeline_mode = #tpu.pipeline_mode<synchronous>, transform_indices = @transform_1, window_bounds = array<i64: 64, 32>}, {pipeline_mode = #tpu.pipeline_mode<synchronous>, transform_indices = @transform_2, window_bounds = array<i64: 64, 3>}, {pipeline_mode = #tpu.pipeline_mode<synchronous>, transform_indices = @transform_3, window_bounds = array<i64: 64, 32>}, {pipeline_mode = #tpu.pipeline_mode<synchronous>, transform_indices = @transform_4, window_bounds = array<i64: 32, 64>}, {pipeline_mode = #tpu.pipeline_mode<synchronous>, transform_indices = @transform_5, window_bounds = array<i64: 64, 64>}, {pipeline_mode = #tpu.pipeline_mode<synchronous>, transform_indices = @transform_6, window_bounds = array<i64: 64, 32>}, {pipeline_mode = #tpu.pipeline_mode<synchronous>, transform_indices = @transform_7, window_bounds = array<i64: 64, 3>}, {pipeline_mode = #tpu.pipeline_mode<synchronous>, transform_indices = @transform_8, window_bounds = array<i64: 64, 32>}, {pipeline_mode = #tpu.pipeline_mode<synchronous>, transform_indices = @transform_9, window_bounds = array<i64: 32, 64>}, {pipeline_mode = #tpu.pipeline_mode<synchronous>, transform_indices = @transform_10, window_bounds = array<i64: 3, 64>}, {pipeline_mode = #tpu.pipeline_mode<synchronous>, transform_indices = @transform_11, window_bounds = array<i64: 3, 1>}, {transform_indices = @transform_12, window_bounds = array<i64: 1, 3, 1024>}]} {
    %c0 = arith.constant 0 : index
    %c0_0 = arith.constant 0 : index
    %c0_1 = arith.constant 0 : index
    %0 = vector.load %arg1[%c0, %c0_0, %c0_1] : memref<1x32x1024xbf16, #tpu.memory_space<vmem>>, vector<1x32x1024xbf16>
    %1 = vector.shape_cast %0 : vector<1x32x1024xbf16> to vector<32x1024xbf16>
    %c0_2 = arith.constant 0 : index
    %c0_3 = arith.constant 0 : index
    %2 = vector.load %arg2[%c0_2, %c0_3] : memref<64x32xbf16, #tpu.memory_space<vmem>>, vector<64x32xbf16>
    %cst = arith.constant dense<0.000000e+00> : vector<64x1024xf32>
    %3 = tpu.matmul %2, %1, %cst {dimension_numbers = #tpu.dot_dimension_numbers<[1], [0], [0], [1], [0, 0, 1, 1], [], []>} : vector<64x32xbf16>, vector<32x1024xbf16>, vector<64x1024xf32> -> vector<64x1024xf32>
    %c0_4 = arith.constant 0 : index
    %c0_5 = arith.constant 0 : index
    %4 = vector.load %arg3[%c0_4, %c0_5] : memref<64x3xf32, #tpu.memory_space<vmem>>, vector<64x1xf32>
    %5 = vector.broadcast %4 : vector<64x1xf32> to vector<64x1024xf32>
    %6 = arith.addf %3, %5 : vector<64x1024xf32>
    %cst_6 = arith.constant dense<0.000000e+00> : vector<64xf32>
    %7 = vector.multi_reduction <add>, %6, %cst_6 [1] : vector<64x1024xf32> to vector<64xf32>
    %8 = vector.shape_cast %7 : vector<64xf32> to vector<64x1xf32>
    %9 = arith.mulf %6, %6 : vector<64x1024xf32>
    %cst_7 = arith.constant dense<0.000000e+00> : vector<64xf32>
    %10 = vector.multi_reduction <add>, %9, %cst_7 [1] : vector<64x1024xf32> to vector<64xf32>
    %11 = vector.shape_cast %10 : vector<64xf32> to vector<64x1xf32>
    %c0_8 = arith.constant 0 : index
    %c0_9 = arith.constant 0 : index
    %12 = vector.load %arg4[%c0_8, %c0_9] : memref<64x32xf32, #tpu.memory_space<vmem>>, vector<64x32xf32>
    %c0_10 = arith.constant 0 : index
    %c0_11 = arith.constant 0 : index
    %13 = vector.load %arg5[%c0_10, %c0_11] : memref<32x64xf32, #tpu.memory_space<vmem>>, vector<32x64xf32>
    %c0_12 = arith.constant 0 : index
    %c1 = arith.constant 1 : index
    %14 = vector.load %arg3[%c0_12, %c1] : memref<64x3xf32, #tpu.memory_space<vmem>>, vector<64x1xf32>
    %c0_13 = arith.constant 0 : index
    %c2 = arith.constant 2 : index
    %15 = vector.load %arg3[%c0_13, %c2] : memref<64x3xf32, #tpu.memory_space<vmem>>, vector<64x1xf32>
    %cst_14 = arith.constant dense<0.000000e+00> : vector<32x1xf32>
    %16 = tpu.matmul %13, %8, %cst_14 {dimension_numbers = #tpu.dot_dimension_numbers<[1], [0], [0], [1], [0, 0, 1, 1], [], []>} : vector<32x64xf32>, vector<64x1xf32>, vector<32x1xf32> -> vector<32x1xf32>
    %cst_15 = arith.constant dense<0.000000e+00> : vector<32x1xf32>
    %17 = tpu.matmul %13, %11, %cst_15 {dimension_numbers = #tpu.dot_dimension_numbers<[1], [0], [0], [1], [0, 0, 1, 1], [], []>} : vector<32x64xf32>, vector<64x1xf32>, vector<32x1xf32> -> vector<32x1xf32>
    %cst_16 = arith.constant 4.8828125E-4 : f32
    %18 = vector.broadcast %cst_16 : f32 to vector<32x1xf32>
    %19 = arith.mulf %16, %18 : vector<32x1xf32>
    %cst_17 = arith.constant 4.8828125E-4 : f32
    %20 = vector.broadcast %cst_17 : f32 to vector<32x1xf32>
    %21 = arith.mulf %17, %20 : vector<32x1xf32>
    %22 = arith.mulf %19, %19 : vector<32x1xf32>
    %23 = arith.subf %21, %22 : vector<32x1xf32>
    %cst_18 = arith.constant 0.000000e+00 : f32
    %24 = vector.broadcast %cst_18 : f32 to vector<32x1xf32>
    %25 = arith.maximumf %23, %24 : vector<32x1xf32>
    %cst_19 = arith.constant 9.99999974E-6 : f32
    %26 = vector.broadcast %cst_19 : f32 to vector<32x1xf32>
    %27 = arith.addf %25, %26 : vector<32x1xf32>
    %28 = math.rsqrt %27 : vector<32x1xf32>
    %cst_20 = arith.constant dense<0.000000e+00> : vector<64x1xf32>
    %29 = tpu.matmul %12, %19, %cst_20 {dimension_numbers = #tpu.dot_dimension_numbers<[1], [0], [0], [1], [0, 0, 1, 1], [], []>} : vector<64x32xf32>, vector<32x1xf32>, vector<64x1xf32> -> vector<64x1xf32>
    %cst_21 = arith.constant dense<0.000000e+00> : vector<64x1xf32>
    %30 = tpu.matmul %12, %28, %cst_21 {dimension_numbers = #tpu.dot_dimension_numbers<[1], [0], [0], [1], [0, 0, 1, 1], [], []>} : vector<64x32xf32>, vector<32x1xf32>, vector<64x1xf32> -> vector<64x1xf32>
    %31 = arith.mulf %14, %30 : vector<64x1xf32>
    %32 = arith.mulf %29, %31 : vector<64x1xf32>
    %33 = arith.subf %15, %32 : vector<64x1xf32>
    %34 = vector.broadcast %31 : vector<64x1xf32> to vector<64x1024xf32>
    %35 = arith.mulf %6, %34 : vector<64x1024xf32>
    %36 = vector.broadcast %33 : vector<64x1xf32> to vector<64x1024xf32>
    %37 = arith.addf %35, %36 : vector<64x1024xf32>
    %cst_22 = arith.constant 0.000000e+00 : f32
    %38 = vector.broadcast %cst_22 : f32 to vector<64x1024xf32>
    %39 = arith.cmpf ogt, %37, %38 : vector<64x1024xf32>
    %cst_23 = arith.constant 0.00999999977 : f32
    %40 = vector.broadcast %cst_23 : f32 to vector<64x1024xf32>
    %41 = arith.mulf %40, %37 : vector<64x1024xf32>
    %42 = arith.select %39, %37, %41 : vector<64x1024xi1>, vector<64x1024xf32>
    %c0_24 = arith.constant 0 : index
    %c0_25 = arith.constant 0 : index
    %43 = vector.load %arg6[%c0_24, %c0_25] : memref<64x64xbf16, #tpu.memory_space<vmem>>, vector<64x64xbf16>
    %44 = arith.truncf %42 : vector<64x1024xf32> to vector<64x1024xbf16>
    %cst_26 = arith.constant dense<0.000000e+00> : vector<64x1024xf32>
    %45 = tpu.matmul %43, %44, %cst_26 {dimension_numbers = #tpu.dot_dimension_numbers<[1], [0], [0], [1], [0, 0, 1, 1], [], []>} : vector<64x64xbf16>, vector<64x1024xbf16>, vector<64x1024xf32> -> vector<64x1024xf32>
    %c0_27 = arith.constant 0 : index
    %c0_28 = arith.constant 0 : index
    %46 = vector.load %arg7[%c0_27, %c0_28] : memref<64x32xbf16, #tpu.memory_space<vmem>>, vector<64x32xbf16>
    %cst_29 = arith.constant dense<0.000000e+00> : vector<64x1024xf32>
    %47 = tpu.matmul %46, %1, %cst_29 {dimension_numbers = #tpu.dot_dimension_numbers<[1], [0], [0], [1], [0, 0, 1, 1], [], []>} : vector<64x32xbf16>, vector<32x1024xbf16>, vector<64x1024xf32> -> vector<64x1024xf32>
    %48 = arith.addf %45, %47 : vector<64x1024xf32>
    %c0_30 = arith.constant 0 : index
    %c0_31 = arith.constant 0 : index
    %49 = vector.load %arg8[%c0_30, %c0_31] : memref<64x3xf32, #tpu.memory_space<vmem>>, vector<64x1xf32>
    %50 = vector.broadcast %49 : vector<64x1xf32> to vector<64x1024xf32>
    %51 = arith.addf %48, %50 : vector<64x1024xf32>
    %cst_32 = arith.constant dense<0.000000e+00> : vector<64xf32>
    %52 = vector.multi_reduction <add>, %51, %cst_32 [1] : vector<64x1024xf32> to vector<64xf32>
    %53 = vector.shape_cast %52 : vector<64xf32> to vector<64x1xf32>
    %54 = arith.mulf %51, %51 : vector<64x1024xf32>
    %cst_33 = arith.constant dense<0.000000e+00> : vector<64xf32>
    %55 = vector.multi_reduction <add>, %54, %cst_33 [1] : vector<64x1024xf32> to vector<64xf32>
    %56 = vector.shape_cast %55 : vector<64xf32> to vector<64x1xf32>
    %c0_34 = arith.constant 0 : index
    %c0_35 = arith.constant 0 : index
    %57 = vector.load %arg9[%c0_34, %c0_35] : memref<64x32xf32, #tpu.memory_space<vmem>>, vector<64x32xf32>
    %c0_36 = arith.constant 0 : index
    %c0_37 = arith.constant 0 : index
    %58 = vector.load %arg10[%c0_36, %c0_37] : memref<32x64xf32, #tpu.memory_space<vmem>>, vector<32x64xf32>
    %c0_38 = arith.constant 0 : index
    %c1_39 = arith.constant 1 : index
    %59 = vector.load %arg8[%c0_38, %c1_39] : memref<64x3xf32, #tpu.memory_space<vmem>>, vector<64x1xf32>
    %c0_40 = arith.constant 0 : index
    %c2_41 = arith.constant 2 : index
    %60 = vector.load %arg8[%c0_40, %c2_41] : memref<64x3xf32, #tpu.memory_space<vmem>>, vector<64x1xf32>
    %cst_42 = arith.constant dense<0.000000e+00> : vector<32x1xf32>
    %61 = tpu.matmul %58, %53, %cst_42 {dimension_numbers = #tpu.dot_dimension_numbers<[1], [0], [0], [1], [0, 0, 1, 1], [], []>} : vector<32x64xf32>, vector<64x1xf32>, vector<32x1xf32> -> vector<32x1xf32>
    %cst_43 = arith.constant dense<0.000000e+00> : vector<32x1xf32>
    %62 = tpu.matmul %58, %56, %cst_43 {dimension_numbers = #tpu.dot_dimension_numbers<[1], [0], [0], [1], [0, 0, 1, 1], [], []>} : vector<32x64xf32>, vector<64x1xf32>, vector<32x1xf32> -> vector<32x1xf32>
    %cst_44 = arith.constant 4.8828125E-4 : f32
    %63 = vector.broadcast %cst_44 : f32 to vector<32x1xf32>
    %64 = arith.mulf %61, %63 : vector<32x1xf32>
    %cst_45 = arith.constant 4.8828125E-4 : f32
    %65 = vector.broadcast %cst_45 : f32 to vector<32x1xf32>
    %66 = arith.mulf %62, %65 : vector<32x1xf32>
    %67 = arith.mulf %64, %64 : vector<32x1xf32>
    %68 = arith.subf %66, %67 : vector<32x1xf32>
    %cst_46 = arith.constant 0.000000e+00 : f32
    %69 = vector.broadcast %cst_46 : f32 to vector<32x1xf32>
    %70 = arith.maximumf %68, %69 : vector<32x1xf32>
    %cst_47 = arith.constant 9.99999974E-6 : f32
    %71 = vector.broadcast %cst_47 : f32 to vector<32x1xf32>
    %72 = arith.addf %70, %71 : vector<32x1xf32>
    %73 = math.rsqrt %72 : vector<32x1xf32>
    %cst_48 = arith.constant dense<0.000000e+00> : vector<64x1xf32>
    %74 = tpu.matmul %57, %64, %cst_48 {dimension_numbers = #tpu.dot_dimension_numbers<[1], [0], [0], [1], [0, 0, 1, 1], [], []>} : vector<64x32xf32>, vector<32x1xf32>, vector<64x1xf32> -> vector<64x1xf32>
    %cst_49 = arith.constant dense<0.000000e+00> : vector<64x1xf32>
    %75 = tpu.matmul %57, %73, %cst_49 {dimension_numbers = #tpu.dot_dimension_numbers<[1], [0], [0], [1], [0, 0, 1, 1], [], []>} : vector<64x32xf32>, vector<32x1xf32>, vector<64x1xf32> -> vector<64x1xf32>
    %76 = arith.mulf %59, %75 : vector<64x1xf32>
    %77 = arith.mulf %74, %76 : vector<64x1xf32>
    %78 = arith.subf %60, %77 : vector<64x1xf32>
    %79 = vector.broadcast %76 : vector<64x1xf32> to vector<64x1024xf32>
    %80 = arith.mulf %51, %79 : vector<64x1024xf32>
    %81 = vector.broadcast %78 : vector<64x1xf32> to vector<64x1024xf32>
    %82 = arith.addf %80, %81 : vector<64x1024xf32>
    %cst_50 = arith.constant 0.000000e+00 : f32
    %83 = vector.broadcast %cst_50 : f32 to vector<64x1024xf32>
    %84 = arith.cmpf ogt, %82, %83 : vector<64x1024xf32>
    %cst_51 = arith.constant 0.00999999977 : f32
    %85 = vector.broadcast %cst_51 : f32 to vector<64x1024xf32>
    %86 = arith.mulf %85, %82 : vector<64x1024xf32>
    %87 = arith.select %84, %82, %86 : vector<64x1024xi1>, vector<64x1024xf32>
    %c0_52 = arith.constant 0 : index
    %c0_53 = arith.constant 0 : index
    %88 = vector.load %arg11[%c0_52, %c0_53] : memref<3x64xbf16, #tpu.memory_space<vmem>>, vector<3x64xbf16>
    %89 = arith.truncf %87 : vector<64x1024xf32> to vector<64x1024xbf16>
    %cst_54 = arith.constant dense<0.000000e+00> : vector<3x1024xf32>
    %90 = tpu.matmul %88, %89, %cst_54 {dimension_numbers = #tpu.dot_dimension_numbers<[1], [0], [0], [1], [0, 0, 1, 1], [], []>} : vector<3x64xbf16>, vector<64x1024xbf16>, vector<3x1024xf32> -> vector<3x1024xf32>
    %c0_55 = arith.constant 0 : index
    %c0_56 = arith.constant 0 : index
    %91 = vector.load %arg12[%c0_55, %c0_56] : memref<3x1xf32, #tpu.memory_space<vmem>>, vector<3x1xf32>
    %92 = vector.broadcast %91 : vector<3x1xf32> to vector<3x1024xf32>
    %93 = arith.addf %90, %92 : vector<3x1024xf32>
    %c0_57 = arith.constant 0 : index
    %c0_58 = arith.constant 0 : index
    %c0_59 = arith.constant 0 : index
    %94 = vector.load %arg13[%c0_57, %c0_58, %c0_59] : memref<1x3x1024xf32, #tpu.memory_space<vmem>>, vector<1x3x1024xf32>
    %95 = vector.shape_cast %94 : vector<1x3x1024xf32> to vector<3x1024xf32>
    %96 = vector.shape_cast %93 : vector<3x1024xf32> to vector<1x3x1024xf32>
    tpu.vector_store %arg13[%c0_57, %c0_58, %c0_59], %96 {strides = array<i32>} : memref<1x3x1024xf32, #tpu.memory_space<vmem>>, vector<1x3x1024xf32>,
    return
  }
  func.func @transform_0(%arg0: i32) -> (i32, i32, i32) {
    %c0_i32 = arith.constant 0 : i32
    %c0_i32_0 = arith.constant 0 : i32
    %c0_i32_1 = arith.constant 0 : i32
    return %arg0, %c0_i32, %c0_i32_0 : i32, i32, i32
  }
  func.func @transform_1(%arg0: i32) -> (i32, i32) {
    %c0_i32 = arith.constant 0 : i32
    %c0_i32_0 = arith.constant 0 : i32
    %c0_i32_1 = arith.constant 0 : i32
    return %c0_i32, %c0_i32_0 : i32, i32
  }
  func.func @transform_2(%arg0: i32) -> (i32, i32) {
    %c0_i32 = arith.constant 0 : i32
    %c0_i32_0 = arith.constant 0 : i32
    %c0_i32_1 = arith.constant 0 : i32
    return %c0_i32, %c0_i32_0 : i32, i32
  }
  func.func @transform_3(%arg0: i32) -> (i32, i32) {
    %c0_i32 = arith.constant 0 : i32
    %c0_i32_0 = arith.constant 0 : i32
    %c0_i32_1 = arith.constant 0 : i32
    return %c0_i32, %c0_i32_0 : i32, i32
  }
  func.func @transform_4(%arg0: i32) -> (i32, i32) {
    %c0_i32 = arith.constant 0 : i32
    %c0_i32_0 = arith.constant 0 : i32
    %c0_i32_1 = arith.constant 0 : i32
    return %c0_i32, %c0_i32_0 : i32, i32
  }
  func.func @transform_5(%arg0: i32) -> (i32, i32) {
    %c0_i32 = arith.constant 0 : i32
    %c0_i32_0 = arith.constant 0 : i32
    %c0_i32_1 = arith.constant 0 : i32
    return %c0_i32, %c0_i32_0 : i32, i32
  }
  func.func @transform_6(%arg0: i32) -> (i32, i32) {
    %c0_i32 = arith.constant 0 : i32
    %c0_i32_0 = arith.constant 0 : i32
    %c0_i32_1 = arith.constant 0 : i32
    return %c0_i32, %c0_i32_0 : i32, i32
  }
  func.func @transform_7(%arg0: i32) -> (i32, i32) {
    %c0_i32 = arith.constant 0 : i32
    %c0_i32_0 = arith.constant 0 : i32
    %c0_i32_1 = arith.constant 0 : i32
    return %c0_i32, %c0_i32_0 : i32, i32
  }
  func.func @transform_8(%arg0: i32) -> (i32, i32) {
    %c0_i32 = arith.constant 0 : i32
    %c0_i32_0 = arith.constant 0 : i32
    %c0_i32_1 = arith.constant 0 : i32
    return %c0_i32, %c0_i32_0 : i32, i32
  }
  func.func @transform_9(%arg0: i32) -> (i32, i32) {
    %c0_i32 = arith.constant 0 : i32
    %c0_i32_0 = arith.constant 0 : i32
    %c0_i32_1 = arith.constant 0 : i32
    return %c0_i32, %c0_i32_0 : i32, i32
  }
  func.func @transform_10(%arg0: i32) -> (i32, i32) {
    %c0_i32 = arith.constant 0 : i32
    %c0_i32_0 = arith.constant 0 : i32
    %c0_i32_1 = arith.constant 0 : i32
    return %c0_i32, %c0_i32_0 : i32, i32
  }
  func.func @transform_11(%arg0: i32) -> (i32, i32) {
    %c0_i32 = arith.constant 0 : i32
    %c0_i32_0 = arith.constant 0 : i32
    %c0_i32_1 = arith.constant 0 : i32
    return %c0_i32, %c0_i32_0 : i32, i32
  }
  func.func @transform_12(%arg0: i32) -> (i32, i32, i32) {
    %c0_i32 = arith.constant 0 : i32
    %c0_i32_0 = arith.constant 0 : i32
    %c0_i32_1 = arith.constant 0 : i32
    return %arg0, %c0_i32, %c0_i32_0 : i32, i32, i32
  }
}

</mosaic_0001>

<bundles_post_ra>
// kernel: generator_forward.1
= control target key start
LH: loop header
LB: loop body
LE: loop exit
PB: predicated region body
PF: predicated region fallthrough
CT: control target
= control target key end

     0   :  { %s4898_s21 = smov 0   ;;  %s7355_s0 = inlined_call_operand.vmem [shape: bf16[2,32,1024], index: 0, kind: input, shape index: {}]   ;;  %s7356_s1 = inlined_call_operand.vmem [shape: bf16[64,32], index: 1, kind: input, shape index: {}]   ;;  %s7357_s2 = inlined_call_operand.vmem [shape: f32[64,3], index: 2, kind: input, shape index: {}]   ;;  %s7358_s3 = inlined_call_operand.vmem [shape: f32[64,32], index: 3, kind: input, shape index: {}]   ;;  %s7359_s4 = inlined_call_operand.vmem [shape: f32[32,64], index: 4, kind: input, shape index: {}]   ;;  %s7360_s5 = inlined_call_operand.vmem [shape: bf16[64,64], index: 5, kind: input, shape index: {}]   ;;  %s7361_s6 = inlined_call_operand.vmem [shape: bf16[64,32], index: 6, kind: input, shape index: {}]   ;;  %s7362_s7 = inlined_call_operand.vmem [shape: f32[64,3], index: 7, kind: input, shape index: {}]   ;;  %s7363_s8 = inlined_call_operand.vmem [shape: f32[64,32], index: 8, kind: input, shape index: {}]   ;;  %s7364_s9 = inlined_call_operand.vmem [shape: f32[32,64], index: 9, kind: input, shape index: {}]   ;;  %s7365_s10 = inlined_call_operand.vmem [shape: bf16[3,64], index: 10, kind: input, shape index: {}]   ;;  %s7366_s11 = inlined_call_operand.vmem [shape: f32[3,1], index: 11, kind: input, shape index: {}]   ;;  %s7367_s12 = inlined_call_operand.vmem [shape: f32[2,3,1024], index: 12, kind: output, shape index: {}]  }
   0x1 LB: > { %s4334_s22 = sadd.s32 4294967295, %s4825_s21   ;;  %p4338_p0 = scmp.ge.s32.totalorder %s4825_s21, 1  ;;  %s4825_s21 = sphi %s4898_s21, %s22_s21  }
   0x2   : > { %p362_p1 = scmp.lt.s32.totalorder %s4825_s21, 3 }
   0x4   : > { %p363_p2 = pnand %p4338_p0, %p362_p1 }
   0x6   : > { %366 = sbr.rel (%p363_p2) target bundleno = 3038 (0xbde), region = 68 }
   0xb   : > { %p404_p3 = scmp.lt.s32.totalorder %s4334_s22, 1  ;;  %v7368_v0 = vmov 0   ;;  %v444_v1 = vld [vmem:[%s7357_s2 + $0x28] sm:$0xff]  ;;  %v446_v2 = vld [vmem:[%s7357_s2 + $0x38] sm:$0xff]  ;;  %v443_v3 = vld [vmem:[%s7357_s2 + $0x20] sm:$0xff]  ;;  %vm587_vm0 = vcmask 261120  }
   0xc   : > { %632 = vmatprep.mubr.bf16.mxu0 %v7368_v0  ;;  %705 = vmatprep.mubr.bf16.mxu1 %v7368_v0  ;;  %v445_v12 = vld [vmem:[%s7357_s2 + $0x30] sm:$0xff]  ;;  %v4775_v26 = vld [vmem:[%s7356_s1] sm:$0xff]   ;;  %v442_v30 = vld [vmem:[%s7357_s2 + $0x18] sm:$0xff]  ;;  %vm1112_vm1 = vcmask 523264   ;;  %s4828_s27 = smov 1   ;;  %s4829_s14 = smov 127  }
   0xd   : > { %s7802_s22 = smov (!%p404_p3, %s4334_s22), 1  ;;  %4754 = vset.pattern.permute.xlu1 %v7368_v0  ;;  %4753 = vset.pattern.permute.xlu0 %v7368_v0  ;;  %v441_v24 = vld [vmem:[%s7357_s2 + $0x10] sm:$0xff]  ;;  %v439_v34 = vld [vmem:[%s7357_s2] sm:$0xff]  ;;  %v440_v39 = vld [vmem:[%s7357_s2 + $0x8] sm:$0xff] }
   0xe   : > { %s4473_s23 = sshll.u32 %s7802_s22, 7  ;;  %474 = vperm.xlu1 %4754, %v444_v1   ;;  %484 = vperm.xlu0 %4753, %v446_v2   ;;  %v4776_v42 = vld [vmem:[%s7356_s1 + $0x8] sm:$0xff]   ;;  %v4777_v43 = vld [vmem:[%s7356_s1 + $0x10] sm:$0xff]   ;;  %v4778_v44 = vld [vmem:[%s7356_s1 + $0x18] sm:$0xff]  }
   0xf   : > { %s4922_s30 = scalar_lea.vmem %s7355_s0, %s4473_s23 }
  0x10   : > { %v423_v4 = vld [vmem:[%s4922_s30 + $0x40] sm:$0xff]  ;;  %v424_v6 = vld [vmem:[%s4922_s30 + $0x48] sm:$0xff]  ;;  %v425_v18 = vld [vmem:[%s4922_s30 + $0x50] sm:$0xff] }
  0x11   : > { %v427_v5 = vld [vmem:[%s4922_s30 + $0x60] sm:$0xff]  ;;  %v428_v8 = vld [vmem:[%s4922_s30 + $0x68] sm:$0xff]  ;;  %v429_v20 = vld [vmem:[%s4922_s30 + $0x70] sm:$0xff] }
  0x12   : > { %v4930_v7 = vcombine.high %v423_v4, %v427_v5  ;;  %v4933_v9 = vcombine.low %v423_v4, %v427_v5  ;;  %v415_v10 = vld [vmem:[%s4922_s30] sm:$0xff]  ;;  %v4940_v13 = vcombine.high %v424_v6, %v428_v8  ;;  %v4942_v14 = vcombine.low %v424_v6, %v428_v8  ;;  %v416_v16 = vld [vmem:[%s4922_s30 + $0x8] sm:$0xff]  ;;  %v426_v21 = vld [vmem:[%s4922_s30 + $0x58] sm:$0xff]  ;;  %469 = vperm.xlu1 %4754, %v443_v3  }
  0x13   : > { %v419_v11 = vld [vmem:[%s4922_s30 + $0x20] sm:$0xff]  ;;  %v420_v17 = vld [vmem:[%s4922_s30 + $0x28] sm:$0xff]  ;;  %v430_v22 = vld [vmem:[%s4922_s30 + $0x78] sm:$0xff]  ;;  %v4969_v27 = vcombine.high %v425_v18, %v429_v20  ;;  %479 = vperm.xlu0 %4753, %v445_v12   ;;  %v4986_v35 = vcombine.low %v425_v18, %v429_v20 }
  0x14   : > { %7487 = vst [vmem:[#allocation2_spill] sm:$0xff] %v4940_v13  ;;  %7488 = vst [vmem:[#allocation3_spill] sm:$0xff] %v4942_v14  ;;  %v4944_v15 = vcombine.high %v415_v10, %v419_v11  ;;  %612 = vmatprep.subr.bf16.mxu0 %v4930_v7  ;;  %v4950_v19 = vcombine.high %v416_v16, %v420_v17  ;;  %685 = vmatprep.subr.bf16.mxu1 %v4940_v13  ;;  %v417_v28 = vld [vmem:[%s4922_s30 + $0x10] sm:$0xff]  ;;  %v418_v32 = vld [vmem:[%s4922_s30 + $0x18] sm:$0xff] }
  0x15   : > { %613 = vmatpush1.bf16.msra.mxu0 %v4933_v9  ;;  %v4957_v23 = vcombine.low %v415_v10, %v419_v11  ;;  %686 = vmatpush1.bf16.msra.mxu1 %v4942_v14  ;;  %v4964_v25 = vcombine.low %v416_v16, %v420_v17  ;;  %v421_v29 = vld [vmem:[%s4922_s30 + $0x30] sm:$0xff]  ;;  %v4977_v31 = vcombine.high %v426_v21, %v430_v22  ;;  %v422_v33 = vld [vmem:[%s4922_s30 + $0x38] sm:$0xff]  ;;  %s4831_s30 = smov 2  }
  0x16   : > { %7489 = vst [vmem:[#allocation4_spill] sm:$0xff] %v4950_v19  ;;  %614 = vmatprep.subr.bf16.mxu0 %v4944_v15  ;;  %687 = vmatprep.subr.bf16.mxu1 %v4950_v19  ;;  %7492 = vst [vmem:[#allocation7_spill] sm:$0xff] %v4986_v35  ;;  %v4989_v36 = vcombine.low %v426_v21, %v430_v22  ;;  %v4992_v37 = vcombine.high %v417_v28, %v421_v29 }
  0x17   : > { %7490 = vst [vmem:[#allocation5_spill] sm:$0xff] %v4964_v25  ;;  %7491 = vst [vmem:[#allocation6_spill] sm:$0xff] %v4977_v31  ;;  %459 = vperm.xlu1 %4754, %v441_v24   ;;  %464 = vperm.xlu0 %4753, %v442_v30   ;;  %v4995_v38 = vcombine.high %v418_v32, %v422_v33  ;;  %v5004_v40 = vcombine.low %v417_v28, %v421_v29 }
  0x18   : > { %7493 = vst [vmem:[#allocation8_spill] sm:$0xff] %v4989_v36  ;;  %7494 = vst [vmem:[#allocation9_spill] sm:$0xff] %v4992_v37  ;;  %v5008_v41 = vcombine.low %v418_v32, %v422_v33 }
  0x19   : > { %615 = vmatpush1.bf16.msra.mxu0 %v4957_v23  ;;  %688 = vmatpush1.bf16.msra.mxu1 %v4964_v25  ;;  %7495 = vst [vmem:[#allocation10_spill] sm:$0xff] %v4995_v38  ;;  %7496 = vst [vmem:[#allocation11_spill] sm:$0xff] %v5004_v40 }
  0x1a   : > { %758 = vmatprep.subr.bf16.mxu0 %v4969_v27  ;;  %831 = vmatprep.subr.bf16.mxu1 %v4977_v31  ;;  %7497 = vst [vmem:[#allocation12_spill] sm:$0xff] %v5008_v41 }
  0x1b   : > { %449 = vperm.xlu1 %4754, %v439_v34   ;;  %454 = vperm.xlu0 %4753, %v440_v39  }
  0x1c   : > { %4363 = vmatmul.mubr.msk.bf16.vlgmr.msra.gmra.mxu0 %vm587_vm0, %v4775_v26  ;;  %4367 = vmatmul.mubr.msk.bf16.vlgmr.msra.gmra.mxu1 %vm587_vm0, %v4775_v26 }
  0x1d   : > { %642 = vmatprep.mubr.bf16.mxu0 %v7368_v0  ;;  %715 = vmatprep.mubr.bf16.mxu1 %v7368_v0 }
  0x1e   : > { %759 = vmatpush1.bf16.msra.mxu0 %v4986_v35  ;;  %832 = vmatpush1.bf16.msra.mxu1 %v4989_v36 }
  0x1f   : > { %760 = vmatprep.subr.bf16.mxu0 %v4992_v37  ;;  %833 = vmatprep.subr.bf16.mxu1 %v4995_v38 }
  0x22   : > { %761 = vmatpush1.bf16.msra.mxu0 %v5004_v40  ;;  %834 = vmatpush1.bf16.msra.mxu1 %v5008_v41 }
  0x24   : > { %4364 = vmatmul.mubr.msk.bf16.gmra.mxu0 %vm587_vm0, %v4776_v42  ;;  %4368 = vmatmul.mubr.msk.bf16.gmra.mxu1 %vm587_vm0, %v4776_v42 }
  0x25   : > { %652 = vmatprep.mubr.bf16.mxu0 %v7368_v0  ;;  %725 = vmatprep.mubr.bf16.mxu1 %v7368_v0 }
  0x2c   : > { %4365 = vmatmul.mubr.msk.bf16.gmra.mxu0 %vm587_vm0, %v4777_v43  ;;  %4369 = vmatmul.mubr.msk.bf16.gmra.mxu1 %vm587_vm0, %v4777_v43 }
  0x2d   : > { %662 = vmatprep.mubr.bf16.mxu0 %v7368_v0  ;;  %735 = vmatprep.mubr.bf16.mxu1 %v7368_v0 }
  0x34   : > { %4366 = vmatmul.mubr.msk.bf16.gmra.mxu0 %vm587_vm0, %v4778_v44  ;;  %4370 = vmatmul.mubr.msk.bf16.gmra.mxu1 %vm587_vm0, %v4778_v44 }
  0x35   : > { %778 = vmatprep.mubr.bf16.mxu0 %v7368_v0  ;;  %851 = vmatprep.mubr.bf16.mxu1 %v7368_v0 }
  0x3c   : > { %4371 = vmatmul.mubr.msk.bf16.vlgmr.msra.gmra.mxu0 %vm587_vm0, %v4775_v26  ;;  %4375 = vmatmul.mubr.msk.bf16.vlgmr.msra.gmra.mxu1 %vm587_vm0, %v4775_v26 }
  0x3d   : > { %788 = vmatprep.mubr.bf16.mxu0 %v7368_v0  ;;  %861 = vmatprep.mubr.bf16.mxu1 %v7368_v0 }
  0x44   : > { %4372 = vmatmul.mubr.msk.bf16.gmra.mxu0 %vm587_vm0, %v4776_v42  ;;  %4376 = vmatmul.mubr.msk.bf16.gmra.mxu1 %vm587_vm0, %v4776_v42 }
  0x45   : > { %798 = vmatprep.mubr.bf16.mxu0 %v7368_v0  ;;  %871 = vmatprep.mubr.bf16.mxu1 %v7368_v0 }
  0x4c   : > { %4373 = vmatmul.mubr.msk.bf16.gmra.mxu0 %vm587_vm0, %v4777_v43  ;;  %4377 = vmatmul.mubr.msk.bf16.gmra.mxu1 %vm587_vm0, %v4777_v43 }
  0x4d   : > { %808 = vmatprep.mubr.bf16.mxu0 %v7368_v0  ;;  %881 = vmatprep.mubr.bf16.mxu1 %v7368_v0 }
  0x54   : > { %4374 = vmatmul.mubr.msk.bf16.gmra.mxu0 %vm587_vm0, %v4778_v44  ;;  %4378 = vmatmul.mubr.msk.bf16.gmra.mxu1 %vm587_vm0, %v4778_v44 }
  0x89   : > { %v5048_v45 = vpop.permute.xlu0 %484  ;;  %v5050_v46 = vpop.permute.xlu1 %474 }
  0x8d   : > { %v5054_v52 = vpop.permute.xlu1 %469 }
  0x8e   : > { %v5052_v50 = vpop.permute.xlu0 %479 }
  0x92   : > { %v5056_v58 = vpop.permute.xlu0 %464  ;;  %v5058_v60 = vpop.permute.xlu1 %459 }
  0x96   : > { %v5060_v3 = vpop.permute.xlu0 %454  ;;  %v5062_v5 = vpop.permute.xlu1 %449 }
  0xdc   : > { %v634_v47 = vpop.f32.mrf.mxu0  ;;  %v707_v48 = vpop.f32.mrf.mxu1 }
  0xdd   : > { %v5074_v17 = vadd.f32 %v634_v47, %v5062_v5  ;;  %v5084_v24 = vadd.f32 %v707_v48, %v5062_v5 }
  0xde   : > { %v636_v49 = vpop.f32.mrf.mxu0  ;;  %v709_v51 = vpop.f32.mrf.mxu1 }
  0xdf   : > { %v5068_v10 = vadd.f32 %v636_v49, %v5062_v5  ;;  %7501 = vst [vmem:[#allocation16_spill] sm:$0xff] %v5074_v17  ;;  %7503 = vst [vmem:[#allocation18_spill] sm:$0xff] %v5084_v24  ;;  %v5110_v49 = vadd.f32 %v709_v51, %v5062_v5  ;;  %v964_v51 = vmul.f32 %v5074_v17, %v5074_v17 }
  0xe0   : > { %v638_v53 = vpop.f32.mrf.mxu0  ;;  %v711_v54 = vpop.f32.mrf.mxu1 }
  0xe1   : > { %7499 = vst [vmem:[#allocation14_spill] sm:$0xff] %v5068_v10  ;;  %v5071_v12 = vadd.f32 %v638_v53, %v5060_v3  ;;  %v892_v26 = vadd.f32 %v5068_v10, %v5074_v17  ;;  %v5093_v30 = vadd.f32 %v711_v54, %v5060_v3  ;;  %v965_v48 = vmul.f32 %v5068_v10, %v5068_v10 }
  0xe2   : > { %v640_v55 = vpop.f32.mrf.mxu0  ;;  %v713_v56 = vpop.f32.mrf.mxu1  ;;  %7507 = vst [vmem:[#allocation22_spill] sm:$0xff] %v5110_v49 }
  0xe3   : > { %v5065_v6 = vadd.f32 %v640_v55, %v5060_v3  ;;  %7500 = vst [vmem:[#allocation15_spill] sm:$0xff] %v5071_v12  ;;  %v972_v29 = vmul.f32 %v5071_v12, %v5071_v12  ;;  %7504 = vst [vmem:[#allocation19_spill] sm:$0xff] %v5093_v30  ;;  %v893_v53 = vadd.f32 %v892_v26, %v5084_v24 }
  0xe4   : > { %v644_v57 = vpop.f32.mrf.mxu0  ;;  %v717_v59 = vpop.f32.mrf.mxu1  ;;  %v974_v55 = vmul.f32 %v5093_v30, %v5093_v30  ;;  %v5126_v26 = vmul.f32 %v5084_v24, %v5084_v24  ;;  %v5141_v24 = vmul.f32 %v5110_v49, %v5110_v49 }
  0xe5   : > { %7498 = vst [vmem:[#allocation13_spill] sm:$0xff] %v5065_v6  ;;  %v973_v20 = vmul.f32 %v5065_v6, %v5065_v6  ;;  %v5096_v32 = vadd.f32 %v644_v57, %v5058_v60  ;;  %v901_v34 = vadd.f32 %v5065_v6, %v5071_v12  ;;  %v5103_v43 = vadd.f32 %v717_v59, %v5058_v60 }
  0xe6   : > { %v646_v61 = vpop.f32.mrf.mxu0  ;;  %v719_v62 = vpop.f32.mrf.mxu1  ;;  %v5116_v57 = vadd.f32 %v713_v56, %v5060_v3 }
  0xe7   : > { %v5081_v21 = vadd.f32 %v646_v61, %v5058_v60  ;;  %7505 = vst [vmem:[#allocation20_spill] sm:$0xff] %v5096_v32  ;;  %v1037_v42 = vadd.f32 %v973_v20, %v972_v29  ;;  %7506 = vst [vmem:[#allocation21_spill] sm:$0xff] %v5103_v43  ;;  %v980_v59 = vmul.f32 %v5096_v32, %v5096_v32 }
  0xe8   : > { %v648_v63 = vpop.f32.mrf.mxu0  ;;  %v721_v1 = vpop.f32.mrf.mxu1  ;;  %7508 = vst [vmem:[#allocation23_spill] sm:$0xff] %v5116_v57  ;;  %v902_v29 = vadd.f32 %v901_v34, %v5093_v30  ;;  %v982_v6 = vmul.f32 %v5103_v43, %v5103_v43 }
  0xe9   : > { %7502 = vst [vmem:[#allocation17_spill] sm:$0xff] %v5081_v21  ;;  %v981_v44 = vmul.f32 %v5081_v21, %v5081_v21  ;;  %v910_v61 = vadd.f32 %v5081_v21, %v5096_v32  ;;  %v1038_v12 = vadd.f32 %v1037_v42, %v974_v55  ;;  %v5137_v32 = vadd.f32 %v719_v62, %v5058_v60 }
  0xea   : > { %v650_v2 = vpop.f32.mrf.mxu0  ;;  %v723_v4 = vpop.f32.mrf.mxu1  ;;  %v5144_v34 = vadd.f32 %v648_v63, %v5056_v58  ;;  %v5157_v62 = vadd.f32 %v893_v53, %v5110_v49  ;;  %v5163_v21 = vadd.f32 %v902_v29, %v5116_v57 }
  0xeb   : > { %v5130_v0 = vadd.f32 %v650_v2, %v5056_v58  ;;  %v1046_v10 = vadd.f32 %v981_v44, %v980_v59  ;;  %7510 = vst [vmem:[#allocation25_spill] sm:$0xff] %v5137_v32  ;;  %v5147_v2 = vadd.f32 %v721_v1, %v5056_v58  ;;  %v5154_v44 = vadd.f32 %v965_v48, %v964_v51 }
  0xec   : > { %v654_v8 = vpop.f32.mrf.mxu0  ;;  %v727_v11 = vpop.f32.mrf.mxu1  ;;  %7511 = vst [vmem:[#allocation26_spill] sm:$0xff] %v5144_v34  ;;  %v975_v59 = vmul.f32 %v5116_v57, %v5116_v57  ;;  %v911_v30 = vadd.f32 %v910_v61, %v5103_v43  ;;  %v983_v61 = vmul.f32 %v5137_v32, %v5137_v32 }
  0xed   : > { %7509 = vst [vmem:[#allocation24_spill] sm:$0xff] %v5130_v0  ;;  %7512 = vst [vmem:[#allocation27_spill] sm:$0xff] %v5147_v2  ;;  %v989_v1 = vmul.f32 %v5130_v0, %v5130_v0  ;;  %v5171_v48 = vadd.f32 %v654_v8, %v5054_v52  ;;  %v1047_v49 = vadd.f32 %v1046_v10, %v982_v6 }
  0xee   : > { %v656_v16 = vpop.f32.mrf.mxu0  ;;  %v5076_v18 = vpop.f32.mrf.mxu1  ;;  %v5175_v51 = vadd.f32 %v1038_v12, %v975_v59  ;;  %v990_v8 = vmul.f32 %v5147_v2, %v5147_v2  ;;  %v5189_v43 = vadd.f32 %v727_v11, %v5054_v52  ;;  %v5196_v6 = vadd.f32 %v911_v30, %v5137_v32 }
  0xef   : > { %v5150_v42 = vadd.f32 %v656_v16, %v5054_v52  ;;  %v5168_v16 = vadd.f32 %v723_v4, %v5056_v58  ;;  %7515 = vst [vmem:[#allocation30_spill] sm:$0xff] %v5171_v48  ;;  %v988_v4 = vmul.f32 %v5144_v34, %v5144_v34  ;;  %v919_v10 = vadd.f32 %v5130_v0, %v5144_v34 }
  0xf0   : > { %v658_v22 = vpop.f32.mrf.mxu0  ;;  %v5088_v28 = vpop.f32.mrf.mxu1  ;;  %7517 = vst [vmem:[#allocation32_spill] sm:$0xff] %v5189_v43  ;;  %v996_v37 = vmul.f32 %v5171_v48, %v5171_v48  ;;  %v5216_v34 = vadd.f32 %v1047_v49, %v983_v61  ;;  %v998_v0 = vmul.f32 %v5189_v43, %v5189_v43 }
  0xf1   : > { %7513 = vst [vmem:[#allocation28_spill] sm:$0xff] %v5150_v42  ;;  %7514 = vst [vmem:[#allocation29_spill] sm:$0xff] %v5168_v16  ;;  %v997_v12 = vmul.f32 %v5150_v42, %v5150_v42  ;;  %v1055_v11 = vadd.f32 %v989_v1, %v988_v4  ;;  %v991_v38 = vmul.f32 %v5168_v16, %v5168_v16 }
  0xf2   : > { %v660_v33 = vpop.f32.mrf.mxu0  ;;  %v5100_v39 = vpop.f32.mrf.mxu1  ;;  %v928_v30 = vadd.f32 %v5150_v42, %v5171_v48  ;;  %v5230_v48 = vadd.f32 %v5088_v28, %v5050_v46 }
  0xf3   : > { %v5180_v29 = vadd.f32 %v660_v33, %v5050_v46  ;;  %v5201_v33 = vadd.f32 %v658_v22, %v5050_v46  ;;  %v1064_v36 = vadd.f32 %v997_v12, %v996_v37  ;;  %v1056_v28 = vadd.f32 %v1055_v11, %v990_v8 }
  0xf4   : > { %v664_v47 = vpop.f32.mrf.mxu0  ;;  %v737_v54 = vpop.f32.mrf.mxu1  ;;  %7522 = vst [vmem:[#allocation37_spill] sm:$0xff] %v5230_v48  ;;  %v929_v12 = vadd.f32 %v928_v30, %v5189_v43  ;;  %v1006_v30 = vmul.f32 %v5230_v48, %v5230_v48 }
  0xf5   : > { %7516 = vst [vmem:[#allocation31_spill] sm:$0xff] %v5180_v29  ;;  %7518 = vst [vmem:[#allocation33_spill] sm:$0xff] %v5201_v33  ;;  %v1005_v22 = vmul.f32 %v5180_v29, %v5180_v29  ;;  %v5233_v49 = vadd.f32 %v737_v54, %v5052_v50  ;;  %v5249_v54 = vadd.f32 %v5076_v18, %v5054_v52 }
  0xf6   : > { %v666_v20 = vpop.f32.mrf.mxu0  ;;  %v5132_v56 = vpop.f32.mrf.mxu1  ;;  %v1065_v18 = vadd.f32 %v1064_v36, %v998_v0  ;;  %v5290_v14 = vadd.f32 %v1056_v28, %v991_v38 }
  0xf7   : > { %v5204_v41 = vadd.f32 %v666_v20, %v5052_v50  ;;  %v5221_v20 = vadd.f32 %v664_v47, %v5052_v50  ;;  %7523 = vst [vmem:[#allocation38_spill] sm:$0xff] %v5233_v49  ;;  %v920_v47 = vadd.f32 %v919_v10, %v5147_v2  ;;  %7525 = vst [vmem:[#allocation40_spill] sm:$0xff] %v5249_v54 }
  0xf8   : > { %v668_v17 = vpop.f32.mrf.mxu0  ;;  %v5152_v55 = vpop.f32.mrf.mxu1  ;;  %v937_v10 = vadd.f32 %v5180_v29, %v5201_v33 }
  0xf9   : > { %7519 = vst [vmem:[#allocation34_spill] sm:$0xff] %v5204_v41  ;;  %7520 = vst [vmem:[#allocation35_spill] sm:$0xff] %v5221_v20  ;;  %v1013_v42 = vmul.f32 %v5204_v41, %v5204_v41  ;;  %v5243_v35 = vadd.f32 %v668_v17, %v5048_v45  ;;  %v1012_v25 = vmul.f32 %v5221_v20, %v5221_v20 }
  0xfa   : > { %v670_v63 = vpop.f32.mrf.mxu0  ;;  %v5173_v53 = vpop.f32.mrf.mxu1  ;;  %v946_v17 = vadd.f32 %v5204_v41, %v5221_v20  ;;  %v5276_v20 = vadd.f32 %v5152_v55, %v5048_v45  ;;  %v999_v41 = vmul.f32 %v5249_v54, %v5249_v54  ;;  %v938_v19 = vadd.f32 %v937_v10, %v5230_v48 }
  0xfb   : > { %v5224_v1 = vadd.f32 %v670_v63, %v5048_v45  ;;  %v1004_v63 = vmul.f32 %v5201_v33, %v5201_v33  ;;  %7524 = vst [vmem:[#allocation39_spill] sm:$0xff] %v5243_v35  ;;  %v5266_v33 = vadd.f32 %v5100_v39, %v5050_v46  ;;  %v1082_v29 = vadd.f32 %v1013_v42, %v1012_v25 }
  0xfc   : > { %v5182_v57 = vpop.f32.mrf.mxu0  ;;  %v5193_v59 = vpop.f32.mrf.mxu1  ;;  %v1020_v43 = vmul.f32 %v5243_v35, %v5243_v35  ;;  %7527 = vst [vmem:[#allocation42_spill] sm:$0xff] %v5276_v20  ;;  %v921_v39 = vadd.f32 %v920_v47, %v5168_v16  ;;  %v5286_v25 = vadd.f32 %v5132_v56, %v5052_v50  ;;  %v947_v13 = vadd.f32 %v946_v17, %v5233_v49 }
  0xfd   : > { %7521 = vst [vmem:[#allocation36_spill] sm:$0xff] %v5224_v1  ;;  %v1073_v31 = vadd.f32 %v1005_v22, %v1004_v63  ;;  %v1021_v8 = vmul.f32 %v5224_v1, %v5224_v1  ;;  %7526 = vst [vmem:[#allocation41_spill] sm:$0xff] %v5266_v33  ;;  %v1014_v22 = vmul.f32 %v5233_v49, %v5233_v49 }
  0xfe   : > { %v5206_v40 = vpop.f32.mrf.mxu0  ;;  %v5214_v32 = vpop.f32.mrf.mxu1  ;;  %v955_v0 = vadd.f32 %v5224_v1, %v5243_v35  ;;  %7528 = vst [vmem:[#allocation43_spill] sm:$0xff] %v5286_v25  ;;  %v930_v47 = vadd.f32 %v929_v12, %v5249_v54  ;;  %v1007_v16 = vmul.f32 %v5266_v33, %v5266_v33  ;;  %v5298_v10 = vadd.f32 %v5173_v53, %v5048_v45 }
  0xff   : > { %v1074_v55 = vadd.f32 %v1073_v31, %v1006_v30  ;;  %v1091_v35 = vadd.f32 %v1021_v8, %v1020_v43  ;;  %v1066_v38 = vadd.f32 %v1065_v18, %v999_v41  ;;  %v1083_v28 = vadd.f32 %v1082_v29, %v1014_v22 }
 0x100   : > { %v784_v4 = vpop.f32.mrf.mxu0  ;;  %v5235_v61 = vpop.f32.mrf.mxu1  ;;  %7529 = vst [vmem:[#allocation44_spill] sm:$0xff] %v5298_v10  ;;  %v1022_v31 = vmul.f32 %v5276_v20, %v5276_v20  ;;  %v956_v43 = vadd.f32 %v955_v0, %v5276_v20  ;;  %v939_v12 = vadd.f32 %v938_v19, %v5266_v33  ;;  %v1015_v8 = vmul.f32 %v5286_v25, %v5286_v25 }
 0x101   : > { %v1075_v54 = vadd.f32 %v1074_v55, %v1007_v16  ;;  %v948_v41 = vadd.f32 %v947_v13, %v5286_v25  ;;  %v5315_v18 = vadd.f32 %v784_v4, %v5060_v3  ;;  %v1023_v19 = vmul.f32 %v5298_v10, %v5298_v10 }
 0x102   : > { %v5245_v37 = vpop.f32.mrf.mxu0  ;;  %v5254_v2 = vpop.f32.mrf.mxu1  ;;  %v1092_v29 = vadd.f32 %v1091_v35, %v1022_v31  ;;  %v1084_v16 = vadd.f32 %v1083_v28, %v1015_v8  ;;  %v5327_v13 = vadd.f32 %v956_v43, %v5298_v10  ;;  %v5331_v35 = vadd.f32 %v5182_v57, %v5062_v5 }
 0x103   : > { %7532 = vst [vmem:[#allocation47_spill] sm:$0xff] %v5315_v18  ;;  %v5347_v57 = vmul.f32 %v5315_v18, %v5315_v18 }
 0x104   : > { %v790_v11 = vpop.f32.mrf.mxu0  ;;  %v5270_v63 = vpop.f32.mrf.mxu1  ;;  %7535 = vst [vmem:[#allocation50_spill] sm:$0xff] %v5331_v35  ;;  %v5343_v8 = vadd.f32 %v1092_v29, %v1023_v19 }
 0x105   : > { %v5334_v4 = vadd.f32 %v790_v11, %v5058_v60 }
 0x106   : > { %v792_v36 = vpop.f32.mrf.mxu0  ;;  %v5288_v42 = vpop.f32.mrf.mxu1 }
 0x108   : > { %v794_v1 = vpop.f32.mrf.mxu0  ;;  %v867_v48 = vpop.f32.mrf.mxu1 }
 0x109   : > { %v5301_v56 = vadd.f32 %v794_v1, %v5056_v58  ;;  %v5320_v0 = vadd.f32 %v867_v48, %v5056_v58 }
 0x10a   : > { %v796_v17 = vpop.f32.mrf.mxu0  ;;  %v869_v1 = vpop.f32.mrf.mxu1 }
 0x10b   : > { %7530 = vst [vmem:[#allocation45_spill] sm:$0xff] %v5301_v56  ;;  %v922_v53 = vadd.f32 %v921_v39, %v5301_v56  ;;  %v5311_v30 = vadd.f32 %v796_v17, %v5056_v58  ;;  %7533 = vst [vmem:[#allocation48_spill] sm:$0xff] %v5320_v0  ;;  %v5350_v11 = vadd.f32 %v869_v1, %v5056_v58 }
 0x10c   : > { %v800_v22 = vpop.f32.mrf.mxu0  ;;  %v873_v33 = vpop.f32.mrf.mxu1  ;;  %v5366_v58 = vadd.f32 %v792_v36, %v5058_v60  ;;  %v992_v36 = vmul.f32 %v5301_v56, %v5301_v56 }
 0x10d   : > { %7531 = vst [vmem:[#allocation46_spill] sm:$0xff] %v5311_v30  ;;  %v923_v39 = vadd.f32 %v922_v53, %v5311_v30  ;;  %v5324_v17 = vadd.f32 %v800_v22, %v5054_v52  ;;  %7537 = vst [vmem:[#allocation52_spill] sm:$0xff] %v5350_v11 }
 0x10e   : > { %v802_v55 = vpop.f32.mrf.mxu0  ;;  %v875_v28 = vpop.f32.mrf.mxu1 }
 0x10f   : > { %7534 = vst [vmem:[#allocation49_spill] sm:$0xff] %v5324_v17  ;;  %v931_v48 = vadd.f32 %v930_v47, %v5324_v17  ;;  %v1000_v31 = vmul.f32 %v5324_v17, %v5324_v17  ;;  %v5340_v53 = vadd.f32 %v802_v55, %v5054_v52  ;;  %v924_v43 = vadd.f32 %v923_v39, %v5320_v0 }
 0x110   : > { %v5353_v47 = vadd.f32 %v873_v33, %v5054_v52  ;;  %v804_v22 = vpop.f32.mrf.mxu0  ;;  %v877_v19 = vpop.f32.mrf.mxu1  ;;  %v5363_v39 = vmul.f32 %v5334_v4, %v5334_v4  ;;  %v5369_v33 = vadd.f32 %v875_v28, %v5054_v52 }
 0x111   : > { %7536 = vst [vmem:[#allocation51_spill] sm:$0xff] %v5340_v53  ;;  %v1067_v17 = vadd.f32 %v1066_v38, %v1000_v31  ;;  %v932_v55 = vadd.f32 %v931_v48, %v5340_v53  ;;  %v1001_v20 = vmul.f32 %v5340_v53, %v5340_v53  ;;  %v5359_v29 = vadd.f32 %v804_v22, %v5050_v46 }
 0x112   : > { %7538 = vst [vmem:[#allocation53_spill] sm:$0xff] %v5353_v47  ;;  %7540 = vst [vmem:[#allocation55_spill] sm:$0xff] %v5369_v33  ;;  %v806_v38 = vpop.f32.mrf.mxu0  ;;  %v925_v1 = vadd.f32 %v924_v43, %v5350_v11  ;;  %v879_v53 = vpop.f32.mrf.mxu1  ;;  %v1002_v52 = vmul.f32 %v5353_v47, %v5353_v47  ;;  %v5384_v28 = vadd.f32 %v877_v19, %v5050_v46 }
 0x113   : > { %7539 = vst [vmem:[#allocation54_spill] sm:$0xff] %v5359_v29  ;;  %v940_v48 = vadd.f32 %v939_v12, %v5359_v29  ;;  %v1008_v31 = vmul.f32 %v5359_v29, %v5359_v29  ;;  %v5376_v22 = vadd.f32 %v806_v38, %v5050_v46  ;;  %v933_v49 = vadd.f32 %v932_v55, %v5353_v47 }
 0x114   : > { %926 = vadd.xlane.f32.xlu0 %v925_v1  ;;  %v810_v12 = vpop.f32.mrf.mxu0  ;;  %v1068_v43 = vadd.f32 %v1067_v17, %v1001_v20  ;;  %v883_v25 = vpop.f32.mrf.mxu1  ;;  %v5393_v56 = vadd.f32 %v879_v53, %v5050_v46  ;;  %v1003_v1 = vmul.f32 %v5369_v33, %v5369_v33  ;;  %v1058_v46 = vadd.f32 %v5290_v14, %v992_v36 }
 0x115   : > { %7541 = vst [vmem:[#allocation56_spill] sm:$0xff] %v5376_v22  ;;  %v1076_v10 = vadd.f32 %v1075_v54, %v1008_v31  ;;  %v941_v29 = vadd.f32 %v940_v48, %v5376_v22  ;;  %v1009_v38 = vmul.f32 %v5376_v22, %v5376_v22  ;;  %v5390_v55 = vadd.f32 %v810_v12, %v5052_v50 }
 0x116   : > { %v812_v47 = vpop.f32.mrf.mxu0  ;;  %v934_v19 = vadd.f32 %v933_v49, %v5369_v33  ;;  %v1069_v20 = vadd.f32 %v1068_v43, %v1002_v52  ;;  %v885_v31 = vpop.f32.mrf.mxu1  ;;  %v1010_v49 = vmul.f32 %v5384_v28, %v5384_v28 }
 0x117   : > { %7542 = vst [vmem:[#allocation57_spill] sm:$0xff] %v5390_v55  ;;  %v949_v54 = vadd.f32 %v948_v41, %v5390_v55  ;;  %v1016_v17 = vmul.f32 %v5390_v55, %v5390_v55  ;;  %v5402_v48 = vadd.f32 %v812_v47, %v5052_v50  ;;  %v942_v12 = vadd.f32 %v941_v29, %v5384_v28 }
 0x118   : > { %935 = vadd.xlane.f32.xlu0 %v934_v19  ;;  %v814_v53 = vpop.f32.mrf.mxu0  ;;  %v1070_v22 = vadd.f32 %v1069_v20, %v1003_v1  ;;  %v1077_v52 = vadd.f32 %v1076_v10, %v1009_v38  ;;  %v887_v55 = vpop.f32.mrf.mxu1  ;;  %v5415_v29 = vadd.f32 %v883_v25, %v5052_v50  ;;  %v1011_v10 = vmul.f32 %v5393_v56, %v5393_v56 }
 0x119   : > { %v1085_v43 = vadd.f32 %v1084_v16, %v1016_v17  ;;  %v950_v41 = vadd.f32 %v949_v54, %v5402_v48  ;;  %v1017_v33 = vmul.f32 %v5402_v48, %v5402_v48  ;;  %v5412_v47 = vadd.f32 %v814_v53, %v5048_v45 }
 0x11a   : > { %1071 = vadd.xlane.f32.xlu1 %v1070_v22  ;;  %v816_v14 = vpop.f32.mrf.mxu0  ;;  %v943_v36 = vadd.f32 %v942_v12, %v5393_v56  ;;  %v1078_v16 = vadd.f32 %v1077_v52, %v1010_v49  ;;  %v5425_v1 = vadd.f32 %v887_v55, %v5048_v45  ;;  %v993_v22 = vmul.f32 %v5311_v30, %v5311_v30  ;;  %v889_v20 = vpop.f32.mrf.mxu1 }
 0x11b   : > { %v958_v38 = vadd.f32 %v5327_v13, %v5412_v47  ;;  %v1024_v19 = vmul.f32 %v5412_v47, %v5412_v47  ;;  %v5428_v25 = vadd.f32 %v816_v14, %v5048_v45  ;;  %v951_v17 = vadd.f32 %v950_v41, %v5415_v29 }
 0x11c   : > { %944 = vadd.xlane.f32.xlu0 %v943_v36  ;;  %v1079_v54 = vadd.f32 %v1078_v16, %v1011_v10  ;;  %v1086_v12 = vadd.f32 %v1085_v43, %v1017_v33  ;;  %v913_v13 = vadd.f32 %v5196_v6, %v5334_v4  ;;  %v5441_v52 = vadd.f32 %v5245_v37, %v5060_v3 }
 0x11d   : > { %v1094_v49 = vadd.f32 %v5343_v8, %v1024_v19  ;;  %v959_v55 = vadd.f32 %v958_v38, %v5428_v25  ;;  %v1025_v53 = vmul.f32 %v5428_v25, %v5428_v25  ;;  %v1049_v14 = vadd.f32 %v5216_v34, %v5363_v39 }
 0x11e   : > { %7543 = vst [vmem:[#allocation58_spill] sm:$0xff] %v5441_v52  ;;  %v1018_v33 = vmul.f32 %v5415_v29, %v5415_v29  ;;  %v5448_v43 = vadd.f32 %v885_v31, %v5052_v50  ;;  %1080 = vadd.xlane.f32.xlu1 %v1079_v54  ;;  %v1026_v6 = vmul.f32 %v5425_v1, %v5425_v1 }
 0x11f   : > { %v5453_v8 = vadd.f32 %v889_v20, %v5048_v45  ;;  %v960_v41 = vadd.f32 %v959_v55, %v5425_v1  ;;  %v1095_v37 = vadd.f32 %v1094_v49, %v1025_v53  ;;  %v985_v36 = vmul.f32 %v5366_v58, %v5366_v58 }
 0x120   : > { %v952_v34 = vadd.f32 %v951_v17, %v5448_v43  ;;  %v1087_v39 = vadd.f32 %v1086_v12, %v1018_v33  ;;  %v1059_v10 = vadd.f32 %v1058_v46, %v993_v22  ;;  %v904_v50 = vadd.f32 %v5163_v21, %v5315_v18 }
 0x121   : > { %v914_v31 = vadd.f32 %v913_v13, %v5366_v58  ;;  %v961_v16 = vadd.f32 %v960_v41, %v5453_v8  ;;  %v1096_v38 = vadd.f32 %v1095_v37, %v1026_v6  ;;  %v1029_v45 = vadd.f32 %v5154_v44, %v5126_v26 }
 0x122   : > { %v5467_v19 = vadd.f32 %v5270_v63, %v5058_v60  ;;  %v994_v20 = vmul.f32 %v5320_v0, %v5320_v0  ;;  %953 = vadd.xlane.f32.xlu1 %v952_v34  ;;  %v1019_v46 = vmul.f32 %v5448_v43, %v5448_v43  ;;  %v895_v21 = vadd.f32 %v5157_v62, %v5331_v35 }
 0x123   : > { %v5477_v22 = vadd.f32 %v5206_v40, %v5062_v5  ;;  %v1040_v26 = vadd.f32 %v5175_v51, %v5347_v57  ;;  %962 = vadd.xlane.f32.xlu0 %v961_v16  ;;  %v1027_v44 = vmul.f32 %v5453_v8, %v5453_v8  ;;  %v977_v63 = vmul.f32 %v5441_v52, %v5441_v52 }
 0x124   : > { %v1088_v54 = vadd.f32 %v1087_v39, %v1019_v46  ;;  %v1060_v17 = vadd.f32 %v1059_v10, %v994_v20  ;;  %v1050_v12 = vadd.f32 %v1049_v14, %v985_v36  ;;  %v968_v62 = vmul.f32 %v5331_v35, %v5331_v35 }
 0x125   : > { %7544 = vst [vmem:[#allocation59_spill] sm:$0xff] %v5477_v22  ;;  %v905_v13 = vadd.f32 %v904_v50, %v5441_v52  ;;  %v1097_v40 = vadd.f32 %v1096_v38, %v1027_v44  ;;  %v915_v49 = vadd.f32 %v914_v31, %v5467_v19  ;;  %v5491_v51 = vadd.f32 %v5235_v61, %v5060_v3 }
 0x126   : > { %v986_v57 = vmul.f32 %v5467_v19, %v5467_v19  ;;  %v5497_v55 = vadd.f32 %v5288_v42, %v5058_v60  ;;  %1089 = vadd.xlane.f32.xlu1 %v1088_v54  ;;  %v995_v53 = vmul.f32 %v5350_v11, %v5350_v11  ;;  %v1030_v14 = vadd.f32 %v1029_v45, %v5141_v24 }
 0x127   : > { %7545 = vst [vmem:[#allocation60_spill] sm:$0xff] %v5491_v51  ;;  %v5504_v33 = vadd.f32 %v5193_v59, %v5062_v5  ;;  %1098 = vadd.xlane.f32.xlu0 %v1097_v40  ;;  %v969_v61 = vmul.f32 %v5477_v22, %v5477_v22  ;;  %v1041_v37 = vadd.f32 %v1040_v26, %v977_v63  ;;  %v1108_v63 = vld [vmem:[%s7359_s4] sm:$0xff] }
 0x128   : > { %v1061_v6 = vadd.f32 %v1060_v17, %v995_v53  ;;  %v1051_v41 = vadd.f32 %v1050_v12, %v986_v57  ;;  %v1031_v36 = vadd.f32 %v1030_v14, %v968_v62  ;;  %v896_v60 = vadd.f32 %v895_v21, %v5477_v22  ;;  %4587 = vmatprep.mubr.msk.f32.mxu0 %vm1112_vm1, %v1108_v63 }
 0x129   : > { %7546 = vst [vmem:[#allocation61_spill] sm:$0xff] %v5504_v33  ;;  %v916_v42 = vadd.f32 %v915_v49, %v5497_v55  ;;  %v906_v34 = vadd.f32 %v905_v13, %v5491_v51  ;;  %v978_v24 = vmul.f32 %v5491_v51, %v5491_v51  ;;  %v5515_v59 = vadd.f32 %v5254_v2, %v5060_v3 }
 0x12a   : > { %1062 = vadd.xlane.f32.xlu1 %v1061_v6  ;;  %v987_v39 = vmul.f32 %v5497_v55, %v5497_v55  ;;  %v970_v31 = vmul.f32 %v5504_v33, %v5504_v33  ;;  %v897_v38 = vadd.f32 %v896_v60, %v5504_v33  ;;  %v1032_v45 = vadd.f32 %v1031_v36, %v969_v61  ;;  %v1110_v36 = vld [vmem:[%s7359_s4 + $0x10] sm:$0xff] }
 0x12b   : > { %7547 = vst [vmem:[#allocation62_spill] sm:$0xff] %v5515_v59  ;;  %917 = vadd.xlane.f32.xlu0 %v916_v42  ;;  %v1042_v50 = vadd.f32 %v1041_v37, %v978_v24  ;;  %v907_v16 = vadd.f32 %v906_v34, %v5515_v59  ;;  %v979_v3 = vmul.f32 %v5515_v59, %v5515_v59  ;;  %v1109_v37 = vld [vmem:[%s7359_s4 + $0x8] sm:$0xff]  ;;  %v1111_v42 = vld [vmem:[%s7359_s4 + $0x18] sm:$0xff]  ;;  %v1100_v34 = vld [vmem:[%s7358_s3] sm:$0xff] }
 0x12c   : > { %v1052_v10 = vadd.f32 %v1051_v41, %v987_v39  ;;  %v5527_v2 = vadd.f32 %v5214_v32, %v5062_v5  ;;  %v1033_v21 = vadd.f32 %v1032_v45, %v970_v31  ;;  %4609 = vmatprep.mubr.msk.f32.mxu1 %vm1112_vm1, %v1108_v63 }
 0x12d   : > { %v1043_v20 = vadd.f32 %v1042_v50, %v979_v3 }
 0x12e   : > { %1053 = vadd.xlane.f32.xlu1 %v1052_v10  ;;  %7548 = vst [vmem:[#allocation63_spill] sm:$0xff] %v5527_v2  ;;  %v898_v46 = vadd.f32 %v897_v38, %v5527_v2  ;;  %v971_v26 = vmul.f32 %v5527_v2, %v5527_v2 }
 0x12f   : > { %908 = vadd.xlane.f32.xlu0 %v907_v16 }
 0x130   : > { %v1034_v44 = vadd.f32 %v1033_v21, %v971_v26 }
 0x132   : > { %1044 = vadd.xlane.f32.xlu1 %v1043_v20 }
 0x133   : > { %899 = vadd.xlane.f32.xlu0 %v898_v46 }
 0x137   : > { %1035 = vadd.xlane.f32.xlu0 %v1034_v44 }
 0x19d   : > { %v927_v5 = vpop.xlane.xlu0 %926 }
 0x1a1   : > { %v936_v32 = vpop.xlane.xlu0 %935 }
 0x1a3   : > { %v1072_v54 = vpop.xlane.xlu1 %1071 }
 0x1a5   : > { %v945_v12 = vpop.xlane.xlu0 %944 }
 0x1a7   : > { %v1081_v17 = vpop.xlane.xlu1 %1080 }
 0x1ab   : > { %v954_v62 = vpop.xlane.xlu1 %953 }
 0x1ac   : > { %v963_v13 = vpop.xlane.xlu0 %962 }
 0x1ad   : > { %4571 = vmatprep.subr.mxu0 %v963_v13 }
 0x1ae   : > { %4572 = vmatpush3.msra.mxu0 %v963_v13 }
 0x1af   : > { %v1090_v40 = vpop.xlane.xlu1 %1089  ;;  %4573 = vmatprep.subr.mxu0 %v954_v62 }
 0x1b0   : > { %4574 = vmatpush3.msra.mxu0 %v954_v62  ;;  %v1099_v49 = vpop.xlane.xlu0 %1098 }
 0x1b1   : > { %4575 = vmatprep.subr.mxu0 %v945_v12  ;;  %4593 = vmatprep.subr.mxu1 %v1099_v49 }
 0x1b2   : > { %4576 = vmatpush3.msra.mxu0 %v945_v12  ;;  %4594 = vmatpush3.msra.mxu1 %v1099_v49 }
 0x1b3   : > { %v1063_v57 = vpop.xlane.xlu1 %1062  ;;  %4577 = vmatprep.subr.mxu0 %v936_v32  ;;  %4595 = vmatprep.subr.mxu1 %v1090_v40 }
 0x1b4   : > { %4578 = vmatpush3.msra.mxu0 %v936_v32  ;;  %4596 = vmatpush3.msra.mxu1 %v1090_v40  ;;  %v918_v53 = vpop.xlane.xlu0 %917 }
 0x1b5   : > { %4579 = vmatprep.subr.mxu0 %v927_v5  ;;  %4597 = vmatprep.subr.mxu1 %v1081_v17 }
 0x1b6   : > { %4580 = vmatpush3.msra.mxu0 %v927_v5  ;;  %4598 = vmatpush3.msra.mxu1 %v1081_v17 }
 0x1b7   : > { %v1054_v14 = vpop.xlane.xlu1 %1053  ;;  %4581 = vmatprep.subr.mxu0 %v918_v53  ;;  %4599 = vmatprep.subr.mxu1 %v1072_v54 }
 0x1b8   : > { %4582 = vmatpush3.msra.mxu0 %v918_v53  ;;  %4600 = vmatpush3.msra.mxu1 %v1072_v54  ;;  %v909_v61 = vpop.xlane.xlu0 %908 }
 0x1b9   : > { %4583 = vmatprep.subr.mxu0 %v909_v61  ;;  %4601 = vmatprep.subr.mxu1 %v1063_v57 }
 0x1ba   : > { %4602 = vmatpush3.msra.mxu1 %v1063_v57  ;;  %4584 = vmatpush3.msra.mxu0 %v909_v61 }
 0x1bb   : > { %4603 = vmatprep.subr.mxu1 %v1054_v14  ;;  %v1045_v6 = vpop.xlane.xlu1 %1044 }
 0x1bc   : > { %4604 = vmatpush3.msra.mxu1 %v1054_v14  ;;  %v900_v41 = vpop.xlane.xlu0 %899  ;;  %v1101_v14 = vld [vmem:[%s7358_s3 + $0x8] sm:$0xff] }
 0x1bd   : > { %4585 = vmatprep.subr.mxu0 %v900_v41  ;;  %4605 = vmatprep.subr.mxu1 %v1045_v6 }
 0x1be   : > { %4586 = vmatpush3.msra.mxu0 %v900_v41  ;;  %4606 = vmatpush3.msra.mxu1 %v1045_v6 }
 0x1bf   : > { %4588 = vmatmul.mubr.msk.f32.vlgmr.msra.gmra.mxu0 %vm1112_vm1, %v1109_v37 }
 0x1c0   : > { %v1036_v60 = vpop.xlane.xlu0 %1035  ;;  %4590 = vmatprep.mubr.msk.f32.mxu0 %vm1112_vm1, %v1110_v36 }
 0x1c1   : > { %4607 = vmatprep.subr.mxu1 %v1036_v60 }
 0x1c2   : > { %4608 = vmatpush3.msra.mxu1 %v1036_v60 }
 0x1c3   : > { %4591 = vmatmul.mubr.msk.f32.gmra.mxu0 %vm1112_vm1, %v1111_v42  ;;  %4610 = vmatmul.mubr.msk.f32.vlgmr.msra.gmra.mxu1 %vm1112_vm1, %v1109_v37  ;;  %v1102_v37 = vld [vmem:[%s7358_s3 + $0x10] sm:$0xff] }
 0x1c4   : > { %4612 = vmatprep.mubr.msk.f32.mxu1 %vm1112_vm1, %v1110_v36  ;;  %4623 = vmatprep.mubr.msk.f32.mxu0 %vm587_vm0, %v1100_v34 }
 0x1c7   : > { %4613 = vmatmul.mubr.msk.f32.gmra.mxu1 %vm1112_vm1, %v1111_v42  ;;  %v1103_v42 = vld [vmem:[%s7358_s3 + $0x18] sm:$0xff] }
 0x1c8   : > { %4643 = vmatprep.mubr.msk.f32.mxu1 %vm587_vm0, %v1100_v34 }
 0x27f   : > { %v4589_v24 = vpop.f32.mrf.mxu0 }
 0x280   : > { %v1296_v39 = vmul.f32 0.00048828125, %v4589_v24  ;;  %v1104_v24 = vld [vmem:[%s7358_s3 + $0x20] sm:$0xff] }
 0x281   : > { %v1191_v10 = vpop.f32.mrf.mxu0 }
 0x282   : > { %v1295_v16 = vmul.f32 0.00048828125, %v1191_v10  ;;  %v1304_v3 = vmul.f32 %v1296_v39, %v1296_v39 }
 0x283   : > { %v4592_v50 = vpop.f32.mrf.mxu0  ;;  %v4611_v31 = vpop.f32.mrf.mxu1 }
 0x284   : > { %v1298_v38 = vmul.f32 0.00048828125, %v4592_v50  ;;  %v1300_v45 = vmul.f32 0.00048828125, %v4611_v31  ;;  %v1303_v32 = vmul.f32 %v1295_v16, %v1295_v16  ;;  %v7550_v31 = vld [vmem:[#allocation2_spill] sm:$0xff] }
 0x285   : > { %v1201_v20 = vpop.f32.mrf.mxu0  ;;  %v1276_v46 = vpop.f32.mrf.mxu1 }
 0x286   : > { %v1297_v21 = vmul.f32 0.00048828125, %v1201_v20  ;;  %v1299_v26 = vmul.f32 0.00048828125, %v1276_v46  ;;  %4615 = vmatprep.subr.mxu0 %v1298_v38  ;;  %v1306_v44 = vmul.f32 %v1298_v38, %v1298_v38  ;;  %v1308_v5 = vsub.f32 %v1300_v45, %v1304_v3  ;;  %v7553_v45 = vld [vmem:[#allocation5_spill] sm:$0xff]  ;;  %v7554_v3 = vld [vmem:[#allocation6_spill] sm:$0xff] }
 0x287   : > { %v4614_v63 = vpop.f32.mrf.mxu1  ;;  %4616 = vmatpush3.msra.mxu0 %v1298_v38  ;;  %v7552_v38 = vld [vmem:[#allocation4_spill] sm:$0xff] }
 0x288   : > { %v1302_v54 = vmul.f32 0.00048828125, %v4614_v63  ;;  %4617 = vmatprep.subr.mxu0 %v1297_v21  ;;  %v1307_v12 = vsub.f32 %v1299_v26, %v1303_v32  ;;  %v1305_v40 = vmul.f32 %v1297_v21, %v1297_v21  ;;  %v1312_v49 = vmax.f32 %v1308_v5, 0.0 }
 0x289   : > { %v1286_v17 = vpop.f32.mrf.mxu1  ;;  %4618 = vmatpush3.msra.mxu0 %v1297_v21 }
 0x28a   : > { %v1310_v62 = vsub.f32 %v1302_v54, %v1306_v44  ;;  %v1301_v13 = vmul.f32 0.00048828125, %v1286_v17  ;;  %4619 = vmatprep.subr.mxu0 %v1296_v39  ;;  %v1311_v61 = vmax.f32 %v1307_v12, 0.0  ;;  %v1316_v36 = vadd.f32 1e-05, %v1312_v49  ;;  %v5615_v12 = vld [vmem:[%s7357_s2 + $0x38] sm:$0xff] }
 0x28b   : > { %4620 = vmatpush3.msra.mxu0 %v1296_v39 }
 0x28c   : > { %v1314_v57 = vmax.f32 %v1310_v62, 0.0  ;;  %v1309_v53 = vsub.f32 %v1301_v13, %v1305_v40  ;;  %4621 = vmatprep.subr.mxu0 %v1295_v16  ;;  %v1315_v34 = vadd.f32 1e-05, %v1311_v61  ;;  %v5623_v40 = vld [vmem:[%s7357_s2 + $0x30] sm:$0xff] }
 0x28d   : > { %4622 = vmatpush3.msra.mxu0 %v1295_v16  ;;  %v7551_v16 = vld [vmem:[#allocation3_spill] sm:$0xff] }
 0x28e   : > { %v1318_v6 = vadd.f32 1e-05, %v1314_v57  ;;  %v1313_v41 = vmax.f32 %v1309_v53, 0.0  ;;  %4624 = vmatmul.mubr.msk.f32.vlgmr.msra.gmra.mxu0 %vm587_vm0, %v1101_v14  ;;  %2161 = vmatprep.subr.bf16.mxu0 %v4930_v7  ;;  %v1105_v7 = vld [vmem:[%s7358_s3 + $0x28] sm:$0xff] }
 0x28f   : > { %4626 = vmatprep.mubr.msk.f32.mxu0 %vm587_vm0, %v1102_v37  ;;  %2162 = vmatpush1.bf16.msra.mxu0 %v4933_v9  ;;  %v1106_v9 = vld [vmem:[%s7358_s3 + $0x30] sm:$0xff] }
 0x290   : > { %4787 = vrsqrt.f32 %v1318_v6  ;;  %v1317_v60 = vadd.f32 1e-05, %v1313_v41  ;;  %2163 = vmatprep.subr.bf16.mxu0 %v4944_v15  ;;  %v1107_v15 = vld [vmem:[%s7358_s3 + $0x38] sm:$0xff]  ;;  %v5638_v6 = vld [vmem:[%s7357_s2 + $0x28] sm:$0xff] }
 0x292   : > { %4789 = vrsqrt.f32 %v1317_v60  ;;  %4627 = vmatmul.mubr.msk.f32.gmra.mxu0 %vm587_vm0, %v1103_v42  ;;  %v5648_v60 = vld [vmem:[%s7357_s2 + $0x10] sm:$0xff] }
 0x293   : > { %4629 = vmatprep.mubr.msk.f32.mxu0 %vm587_vm0, %v1104_v24  ;;  %2164 = vmatpush1.bf16.msra.mxu0 %v4957_v23  ;;  %4791 = vrsqrt.f32 %v1316_v36  ;;  %v7549_v23 = vmov 0  }
 0x294   : > { %2307 = vmatprep.subr.bf16.mxu0 %v4969_v27  ;;  %4793 = vrsqrt.f32 %v1315_v34  ;;  %v5654_v34 = vld [vmem:[%s7357_s2 + $0x18] sm:$0xff] }
 0x296   : > { %4630 = vmatmul.mubr.msk.f32.gmra.mxu0 %vm587_vm0, %v1105_v7 }
 0x297   : > { %4632 = vmatprep.mubr.msk.f32.mxu0 %vm587_vm0, %v1106_v9 }
 0x29a   : > { %4633 = vmatmul.mubr.msk.f32.gmra.mxu0 %vm587_vm0, %v1107_v15 }
 0x29b   : > { %2181 = vmatprep.mubr.bf16.mxu0 %v7549_v23 }
 0x29d   : > { %v4788_v27 = vpop.eup %4787 }
 0x29e   : > { %4635 = vmatprep.subr.mxu1 %v4788_v27 }
 0x29f   : > { %v4790_v39 = vpop.eup %4789  ;;  %4636 = vmatpush3.msra.mxu1 %v4788_v27 }
 0x2a0   : > { %4637 = vmatprep.subr.mxu1 %v4790_v39  ;;  %v4792_v10 = vpop.eup %4791 }
 0x2a1   : > { %4638 = vmatpush3.msra.mxu1 %v4790_v39  ;;  %v4794_v50 = vpop.eup %4793  ;;  %v5673_v39 = vld [vmem:[%s7357_s2 + $0x8] sm:$0xff] }
 0x2a2   : > { %4639 = vmatprep.subr.mxu1 %v4792_v10 }
 0x2a3   : > { %4640 = vmatpush3.msra.mxu1 %v4792_v10 }
 0x2a4   : > { %4641 = vmatprep.subr.mxu1 %v4794_v50 }
 0x2a5   : > { %4642 = vmatpush3.msra.mxu1 %v4794_v50 }
 0x2a6   : > { %4644 = vmatmul.mubr.msk.f32.vlgmr.msra.gmra.mxu1 %vm587_vm0, %v1101_v14  ;;  %2234 = vmatprep.subr.bf16.mxu1 %v7550_v31  ;;  %v5632_v14 = vld [vmem:[%s7357_s2 + $0x20] sm:$0xff] }
 0x2a7   : > { %4646 = vmatprep.mubr.msk.f32.mxu1 %vm587_vm0, %v1102_v37  ;;  %2235 = vmatpush1.bf16.msra.mxu1 %v7551_v16  ;;  %v7423_v37 = vmov 1  }
 0x2a8   : > { %2236 = vmatprep.subr.bf16.mxu1 %v7552_v38  ;;  %4755 = vset.pattern.permute.xlu0 %v7423_v37 }
 0x2a9   : > { %4756 = vset.pattern.permute.xlu1 %v7423_v37 }
 0x2aa   : > { %4647 = vmatmul.mubr.msk.f32.gmra.mxu1 %vm587_vm0, %v1103_v42 }
 0x2ab   : > { %4649 = vmatprep.mubr.msk.f32.mxu1 %vm587_vm0, %v1104_v24  ;;  %2237 = vmatpush1.bf16.msra.mxu1 %v7553_v45 }
 0x2ac   : > { %2380 = vmatprep.subr.bf16.mxu1 %v7554_v3 }
 0x2ae   : > { %4650 = vmatmul.mubr.msk.f32.gmra.mxu1 %vm587_vm0, %v1105_v7 }
 0x2af   : > { %4652 = vmatprep.mubr.msk.f32.mxu1 %vm587_vm0, %v1106_v9 }
 0x2b2   : > { %4653 = vmatmul.mubr.msk.f32.gmra.mxu1 %vm587_vm0, %v1107_v15  ;;  %v5665_v15 = vld [vmem:[%s7357_s2] sm:$0xff] }
 0x2b3   : > { %2254 = vmatprep.mubr.bf16.mxu1 %v7549_v23 }
 0x34e   : > { %v4625_v50 = vpop.f32.mrf.mxu0 }
 0x350   : > { %v1413_v31 = vpop.f32.mrf.mxu0 }
 0x352   : > { %v4628_v16 = vpop.f32.mrf.mxu0 }
 0x354   : > { %v1423_v38 = vpop.f32.mrf.mxu0 }
 0x356   : > { %v4631_v45 = vpop.f32.mrf.mxu0 }
 0x358   : > { %v1433_v3 = vpop.f32.mrf.mxu0 }
 0x366   : > { %v4645_v20 = vpop.f32.mrf.mxu1 }
 0x368   : > { %v1518_v46 = vpop.f32.mrf.mxu1 }
 0x36a   : > { %v4648_v21 = vpop.f32.mrf.mxu1 }
 0x36c   : > { %v1528_v26 = vpop.f32.mrf.mxu1 }
 0x36e   : > { %v4651_v44 = vpop.f32.mrf.mxu1 }
 0x370   : > { %v1538_v63 = vpop.f32.mrf.mxu1 }
 0x371   : > { %1573 = vrot.lane.b32.xlu1 %v1538_v63, %s4828_s27 }
 0x372   : > { %v4654_v5 = vpop.f32.mrf.mxu1 }
 0x373   : > { %1579 = vrot.lane.b32.xlu0 %v4654_v5, %s4828_s27 }
 0x374   : > { %v1548_v32 = vpop.f32.mrf.mxu1 }
 0x375   : > { %1577 = vrot.lane.b32.xlu1 %v1548_v32, %s4828_s27 }
 0x377   : > { %1569 = vrot.lane.b32.xlu0 %v1528_v26, %s4828_s27 }
 0x379   : > { %1575 = vrot.lane.b32.xlu1 %v4651_v44, %s4828_s27 }
 0x37b   : > { %1565 = vrot.lane.b32.xlu0 %v1518_v46, %s4828_s27 }
 0x37d   : > { %1571 = vrot.lane.b32.xlu1 %v4648_v21, %s4828_s27 }
 0x381   : > { %1567 = vrot.lane.b32.xlu1 %v4645_v20, %s4828_s27  ;;  %v4634_v20 = vpop.f32.mrf.mxu0 }
 0x383   : > { %v1443_v21 = vpop.f32.mrf.mxu0 }
 0x3e3   : > { %v1574_v54 = vpop.permute.xlu1 %1573 }
 0x3e4   : > { %v1593_v61 = vmul.f32 %v5632_v14, %v1574_v54 }
 0x3e5   : > { %v1580_v17 = vpop.permute.xlu0 %1579 }
 0x3e6   : > { %v5618_v62 = vmul.f32 %v5615_v12, %v1580_v17 }
 0x3e7   : > { %v1578_v13 = vpop.permute.xlu1 %1577 }
 0x3e8   : > { %v1595_v49 = vmul.f32 %v5623_v40, %v1578_v13  ;;  %1619 = vrot.lane.b32.xlu1 %v5618_v62, %s4829_s14 }
 0x3e9   : > { %v1570_v57 = vpop.permute.xlu0 %1569 }
 0x3ea   : > { %1617 = vrot.lane.b32.xlu0 %v1595_v49, %s4829_s14  ;;  %v1591_v42 = vmul.f32 %v5648_v60, %v1570_v57 }
 0x3eb   : > { %v1576_v53 = vpop.permute.xlu1 %1575 }
 0x3ec   : > { %v1594_v41 = vmul.f32 %v5638_v6, %v1576_v53 }
 0x3ed   : > { %v1566_v7 = vpop.permute.xlu0 %1565 }
 0x3ee   : > { %1613 = vrot.lane.b32.xlu0 %v1593_v61, %s4829_s14  ;;  %1615 = vrot.lane.b32.xlu1 %v1594_v41, %s4829_s14  ;;  %v5668_v27 = vmul.f32 %v5665_v15, %v1566_v7 }
 0x3ef   : > { %v1572_v36 = vpop.permute.xlu1 %1571 }
 0x3f0   : > { %v5657_v24 = vmul.f32 %v5654_v34, %v1572_v36 }
 0x3f2   : > { %1609 = vrot.lane.b32.xlu0 %v1591_v42, %s4829_s14  ;;  %1611 = vrot.lane.b32.xlu1 %v5657_v24, %s4829_s14 }
 0x3f3   : > { %v1568_v9 = vpop.permute.xlu1 %1567 }
 0x3f4   : > { %v5676_v10 = vmul.f32 %v5673_v39, %v1568_v9 }
 0x3f6   : > { %1605 = vrot.lane.b32.xlu0 %v5668_v27, %s4829_s14  ;;  %1607 = vrot.lane.b32.xlu1 %v5676_v10, %s4829_s14 }
 0x45a   : > { %v1620_v46 = vpop.permute.xlu1 %1619 }
 0x45b   : > { %v1636_v26 = vmul.f32 %v4634_v20, %v1620_v46 }
 0x45c   : > { %v1618_v44 = vpop.permute.xlu0 %1617 }
 0x45d   : > { %v1635_v63 = vmul.f32 %v1618_v44, %v1443_v21  ;;  %1659 = vrot.lane.b32.xlu1 %v1636_v26, %s4831_s30 }
 0x45f   : > { %1657 = vrot.lane.b32.xlu0 %v1635_v63, %s4831_s30 }
 0x460   : > { %v1614_v5 = vpop.permute.xlu0 %1613  ;;  %v1616_v32 = vpop.permute.xlu1 %1615 }
 0x461   : > { %v1633_v54 = vmul.f32 %v1614_v5, %v1433_v3  ;;  %v1634_v17 = vmul.f32 %v4631_v45, %v1616_v32  ;;  %v4781_v45 = vld [vmem:[%s7361_s6 + $0x10] sm:$0xff]   ;;  %v4782_v3 = vld [vmem:[%s7361_s6 + $0x18] sm:$0xff]  }
 0x463   : > { %1653 = vrot.lane.b32.xlu0 %v1633_v54, %s4831_s30  ;;  %1655 = vrot.lane.b32.xlu1 %v1634_v17, %s4831_s30 }
 0x464   : > { %v1610_v13 = vpop.permute.xlu0 %1609  ;;  %v1612_v57 = vpop.permute.xlu1 %1611 }
 0x465   : > { %v1631_v53 = vmul.f32 %v1610_v13, %v1423_v38  ;;  %v1632_v36 = vmul.f32 %v4628_v16, %v1612_v57  ;;  %v4779_v16 = vld [vmem:[%s7361_s6] sm:$0xff]   ;;  %v7560_v38 = vld [vmem:[#allocation12_spill] sm:$0xff] }
 0x466   : > { %4407 = vmatmul.mubr.msk.bf16.vlgmr.msra.gmra.mxu0 %vm587_vm0, %v4779_v16  ;;  %4411 = vmatmul.mubr.msk.bf16.vlgmr.msra.gmra.mxu1 %vm587_vm0, %v4779_v16 }
 0x467   : > { %1649 = vrot.lane.b32.xlu0 %v1631_v53, %s4831_s30  ;;  %1651 = vrot.lane.b32.xlu1 %v1632_v36, %s4831_s30 }
 0x468   : > { %v1606_v7 = vpop.permute.xlu0 %1605  ;;  %v1608_v9 = vpop.permute.xlu1 %1607  ;;  %2191 = vmatprep.mubr.bf16.mxu0 %v7549_v23  ;;  %2264 = vmatprep.mubr.bf16.mxu1 %v7549_v23 }
 0x469   : > { %v1629_v20 = vmul.f32 %v1606_v7, %v1413_v31  ;;  %v1630_v46 = vmul.f32 %v4625_v50, %v1608_v9  ;;  %v7421_v31 = vmov 2   ;;  %v7558_v50 = vld [vmem:[#allocation10_spill] sm:$0xff]  ;;  %v2768_v7 = vld [vmem:[%s7362_s7 + $0x18] sm:$0xff] }
 0x46b   : > { %1645 = vrot.lane.b32.xlu0 %v1629_v20, %s4831_s30  ;;  %1647 = vrot.lane.b32.xlu1 %v1630_v46, %s4831_s30  ;;  %v7561_v20 = vld [vmem:[#allocation34_spill] sm:$0xff] }
 0x46f   : > { %1702 = vperm.xlu0 %4755, %v1595_v49   ;;  %1706 = vperm.xlu1 %4756, %v5618_v62   ;;  %v7555_v49 = vld [vmem:[#allocation7_spill] sm:$0xff]  ;;  %v7556_v62 = vld [vmem:[#allocation8_spill] sm:$0xff] }
 0x470   : > { %2308 = vmatpush1.bf16.msra.mxu0 %v7555_v49  ;;  %2381 = vmatpush1.bf16.msra.mxu1 %v7556_v62  ;;  %v7563_v62 = vld [vmem:[#allocation43_spill] sm:$0xff] }
 0x471   : > { %2382 = vmatprep.subr.bf16.mxu1 %v7558_v50 }
 0x473   : > { %1686 = vperm.xlu0 %4755, %v1591_v42   ;;  %1694 = vperm.xlu1 %4756, %v1593_v61   ;;  %v4780_v61 = vld [vmem:[%s7361_s6 + $0x8] sm:$0xff]   ;;  %v7557_v42 = vld [vmem:[#allocation9_spill] sm:$0xff] }
 0x474   : > { %2309 = vmatprep.subr.bf16.mxu0 %v7557_v42  ;;  %2383 = vmatpush1.bf16.msra.mxu1 %v7560_v38  ;;  %v7564_v42 = vld [vmem:[#allocation44_spill] sm:$0xff] }
 0x475   : > { %4408 = vmatmul.mubr.msk.bf16.gmra.mxu0 %vm587_vm0, %v4780_v61  ;;  %4412 = vmatmul.mubr.msk.bf16.gmra.mxu1 %vm587_vm0, %v4780_v61 }
 0x476   : > { %2201 = vmatprep.mubr.bf16.mxu0 %v7549_v23  ;;  %2274 = vmatprep.mubr.bf16.mxu1 %v7549_v23 }
 0x477   : > { %1698 = vperm.xlu1 %4756, %v1594_v41   ;;  %4758 = vset.pattern.permute.xlu0 %v7421_v31  ;;  %v7559_v41 = vld [vmem:[#allocation11_spill] sm:$0xff] }
 0x478   : > { %2310 = vmatpush1.bf16.msra.mxu0 %v7559_v41  ;;  %v7565_v41 = vld [vmem:[#allocation35_spill] sm:$0xff] }
 0x47b   : > { %4757 = vset.pattern.permute.xlu1 %v7421_v31 }
 0x47d   : > { %4409 = vmatmul.mubr.msk.bf16.gmra.mxu0 %vm587_vm0, %v4781_v45  ;;  %4413 = vmatmul.mubr.msk.bf16.gmra.mxu1 %vm587_vm0, %v4781_v45 }
 0x47e   : > { %2211 = vmatprep.mubr.bf16.mxu0 %v7549_v23  ;;  %2284 = vmatprep.mubr.bf16.mxu1 %v7549_v23 }
 0x485   : > { %4410 = vmatmul.mubr.msk.bf16.gmra.mxu0 %vm587_vm0, %v4782_v3  ;;  %4414 = vmatmul.mubr.msk.bf16.gmra.mxu1 %vm587_vm0, %v4782_v3 }
 0x486   : > { %2327 = vmatprep.mubr.bf16.mxu0 %v7549_v23  ;;  %2400 = vmatprep.mubr.bf16.mxu1 %v7549_v23 }
 0x48d   : > { %4415 = vmatmul.mubr.msk.bf16.vlgmr.msra.gmra.mxu0 %vm587_vm0, %v4779_v16  ;;  %4419 = vmatmul.mubr.msk.bf16.vlgmr.msra.gmra.mxu1 %vm587_vm0, %v4779_v16  ;;  %v7562_v16 = vld [vmem:[#allocation36_spill] sm:$0xff] }
 0x48e   : > { %2337 = vmatprep.mubr.bf16.mxu0 %v7549_v23  ;;  %2410 = vmatprep.mubr.bf16.mxu1 %v7549_v23 }
 0x495   : > { %4416 = vmatmul.mubr.msk.bf16.gmra.mxu0 %vm587_vm0, %v4780_v61  ;;  %4420 = vmatmul.mubr.msk.bf16.gmra.mxu1 %vm587_vm0, %v4780_v61 }
 0x496   : > { %2347 = vmatprep.mubr.bf16.mxu0 %v7549_v23  ;;  %2420 = vmatprep.mubr.bf16.mxu1 %v7549_v23 }
 0x49d   : > { %4417 = vmatmul.mubr.msk.bf16.gmra.mxu0 %vm587_vm0, %v4781_v45  ;;  %4421 = vmatmul.mubr.msk.bf16.gmra.mxu1 %vm587_vm0, %v4781_v45  ;;  %v7566_v45 = vld [vmem:[#allocation39_spill] sm:$0xff] }
 0x49e   : > { %2357 = vmatprep.mubr.bf16.mxu0 %v7549_v23  ;;  %2430 = vmatprep.mubr.bf16.mxu1 %v7549_v23 }
 0x4a5   : > { %4418 = vmatmul.mubr.msk.bf16.gmra.mxu0 %vm587_vm0, %v4782_v3  ;;  %4422 = vmatmul.mubr.msk.bf16.gmra.mxu1 %vm587_vm0, %v4782_v3 }
 0x4a6   : > { %2505 = vmatprep.mubr.bf16.mxu0 %v7549_v23  ;;  %2578 = vmatprep.mubr.bf16.mxu1 %v7549_v23 }
 0x4cf   : > { %v1660_v21 = vpop.permute.xlu1 %1659 }
 0x4d0   : > { %v1676_v26 = vsub.f32 %v5615_v12, %v1660_v21  ;;  %v7567_v21 = vld [vmem:[#allocation38_spill] sm:$0xff] }
 0x4d1   : > { %v1658_v44 = vpop.permute.xlu0 %1657 }
 0x4d2   : > { %1810 = vperm.xlu0 %4758, %v1676_v26  }
 0x4d5   : > { %v1654_v63 = vpop.permute.xlu0 %1653  ;;  %v1656_v5 = vpop.permute.xlu1 %1655 }
 0x4d6   : > { %v1673_v32 = vsub.f32 %v5632_v14, %v1654_v63  ;;  %v1674_v54 = vsub.f32 %v5638_v6, %v1656_v5  ;;  %v1675_v14 = vsub.f32 %v5623_v40, %v1658_v44  ;;  %v2772_v40 = vld [vmem:[%s7362_s7 + $0x38] sm:$0xff]  ;;  %v2765_v44 = vld [vmem:[%s7362_s7] sm:$0xff]  ;;  %v2766_v63 = vld [vmem:[%s7362_s7 + $0x8] sm:$0xff] }
 0x4d8   : > { %1795 = vperm.xlu0 %4758, %v1673_v32   ;;  %1800 = vperm.xlu1 %4757, %v1674_v54   ;;  %v7568_v32 = vld [vmem:[#allocation42_spill] sm:$0xff] }
 0x4d9   : > { %v1650_v17 = vpop.permute.xlu0 %1649  ;;  %v1652_v13 = vpop.permute.xlu1 %1651 }
 0x4da   : > { %v1672_v57 = vsub.f32 %v5654_v34, %v1652_v13  ;;  %v1671_v36 = vsub.f32 %v5648_v60, %v1650_v17  ;;  %v2771_v60 = vld [vmem:[%s7362_s7 + $0x30] sm:$0xff] }
 0x4dc   : > { %4759 = vset.pattern.permute.xlu1 %v7423_v37  ;;  %1790 = vperm.xlu0 %4758, %v1672_v57  }
 0x4dd   : > { %v1646_v53 = vpop.permute.xlu0 %1645  ;;  %1690 = vperm.xlu1 %4759, %v5657_v24   ;;  %v1648_v6 = vpop.permute.xlu1 %1647 }
 0x4de   : > { %v1669_v12 = vsub.f32 %v5665_v15, %v1646_v53  ;;  %v1670_v34 = vsub.f32 %v5673_v39, %v1648_v6  ;;  %v2769_v15 = vld [vmem:[%s7362_s7 + $0x20] sm:$0xff] }
 0x4e0   : > { %1775 = vperm.xlu0 %4758, %v1669_v12   ;;  %v7569_v12 = vld [vmem:[#allocation57_spill] sm:$0xff] }
 0x4e1   : > { %4760 = vset.pattern.permute.xlu1 %v7421_v31 }
 0x4e2   : > { %1785 = vperm.xlu1 %4760, %v1671_v36  }
 0x4e4   : > { %4763 = vset.pattern.permute.xlu0 %v7549_v23 }
 0x4e5   : > { %2810 = vperm.xlu0 %4763, %v2772_v40  }
 0x4e6   : > { %1805 = vperm.xlu1 %4760, %v1675_v14  }
 0x4e9   : > { %2795 = vperm.xlu0 %4763, %v2769_v15  }
 0x4ea   : > { %4761 = vset.pattern.permute.xlu1 %v7423_v37  ;;  %v1707_v24 = vpop.permute.xlu1 %1706  ;;  %v1703_v39 = vpop.permute.xlu0 %1702 }
 0x4eb   : > { %1678 = vperm.xlu1 %4761, %v5668_v27   ;;  %v2770_v27 = vld [vmem:[%s7362_s7 + $0x28] sm:$0xff]  ;;  %v5779_v46 = vmul.f32 %v1703_v39, %v7561_v20  ;;  %v1766_v49 = vmul.f32 %v1707_v24, %v7562_v16  ;;  %v5783_v61 = vmul.f32 %v1703_v39, %v7563_v62  ;;  %v1768_v50 = vmul.f32 %v1707_v24, %v7564_v42  ;;  %v7577_v62 = vld [vmem:[#allocation21_spill] sm:$0xff] }
 0x4ec   : > { %v5787_v38 = vmul.f32 %v1703_v39, %v7565_v41  ;;  %v1765_v3 = vmul.f32 %v1707_v24, %v7566_v45  ;;  %v5791_v26 = vmul.f32 %v1703_v39, %v7567_v21  ;;  %v1767_v54 = vmul.f32 %v1707_v24, %v7568_v32  ;;  %v7579_v41 = vld [vmem:[#allocation55_spill] sm:$0xff]  ;;  %v7580_v21 = vld [vmem:[#allocation49_spill] sm:$0xff] }
 0x4ed   : > { %v5801_v17 = vmul.f32 %v1703_v39, %v5402_v48  ;;  %v1770_v13 = vmul.f32 %v1707_v24, %v5428_v25  ;;  %v5805_v57 = vmul.f32 %v1703_v39, %v5448_v43  ;;  %v1772_v53 = vmul.f32 %v1707_v24, %v5453_v8  ;;  %v7572_v43 = vld [vmem:[#allocation30_spill] sm:$0xff]  ;;  %v7573_v8 = vld [vmem:[#allocation32_spill] sm:$0xff] }
 0x4ee   : > { %v1695_v9 = vpop.permute.xlu1 %1694  ;;  %v1687_v5 = vpop.permute.xlu0 %1686  ;;  %v5809_v36 = vmul.f32 %v1703_v39, %v7569_v12  ;;  %v1769_v14 = vmul.f32 %v1707_v24, %v5412_v47  ;;  %v5813_v6 = vmul.f32 %v1703_v39, %v5415_v29  ;;  %v1771_v15 = vmul.f32 %v1707_v24, %v5425_v1  ;;  %v7575_v47 = vld [vmem:[#allocation25_spill] sm:$0xff]  ;;  %v7576_v29 = vld [vmem:[#allocation20_spill] sm:$0xff]  ;;  %v7578_v1 = vld [vmem:[#allocation51_spill] sm:$0xff] }
 0x4ef   : > { %1682 = vperm.xlu1 %4761, %v5676_v10   ;;  %v2767_v10 = vld [vmem:[%s7362_s7 + $0x10] sm:$0xff]  ;;  %v5824_v16 = vmul.f32 %v1687_v5, %v7575_v47  ;;  %v5827_v39 = vmul.f32 %v1687_v5, %v7576_v29  ;;  %v5830_v42 = vmul.f32 %v1687_v5, %v7577_v62  ;;  %v5833_v24 = vmul.f32 %v1695_v9, %v7578_v1  ;;  %v7587_v47 = vld [vmem:[#allocation41_spill] sm:$0xff] }
 0x4f0   : > { %2785 = vperm.xlu0 %4763, %v2767_v10   ;;  %v1743_v10 = vmul.f32 %v1695_v9, %v7573_v8  ;;  %v5836_v45 = vmul.f32 %v1695_v9, %v7579_v41  ;;  %v5845_v12 = vmul.f32 %v1687_v5, %v5366_v58  ;;  %v5852_v8 = vmul.f32 %v1687_v5, %v5334_v4  ;;  %v7588_v58 = vld [vmem:[#allocation33_spill] sm:$0xff]  ;;  %v7590_v41 = vld [vmem:[#allocation56_spill] sm:$0xff] }
 0x4f1   : > { %v7589_v1 = vld [vmem:[#allocation37_spill] sm:$0xff] }
 0x4f2   : > { %v1699_v25 = vpop.permute.xlu1 %1698  ;;  %7582 = vst [vmem:[#allocation2_spill] sm:$0xff] %v5845_v12  ;;  %7585 = vst [vmem:[#allocation4_spill] sm:$0xff] %v5852_v8 }
 0x4f3   : > { %4762 = vset.pattern.permute.xlu1 %v7421_v31  ;;  %v1752_v29 = vmul.f32 %v1699_v25, %v7587_v47  ;;  %v1749_v62 = vmul.f32 %v1699_v25, %v7588_v58  ;;  %v5874_v47 = vmul.f32 %v1699_v25, %v5384_v28 }
 0x4f4   : > { %1780 = vperm.xlu1 %4762, %v1670_v34   ;;  %v7570_v34 = vld [vmem:[#allocation28_spill] sm:$0xff]  ;;  %2775 = vperm.xlu0 %4763, %v2765_v44   ;;  %v5839_v44 = vmul.f32 %v1695_v9, %v7580_v21  ;;  %v5863_v21 = vmul.f32 %v1699_v25, %v7590_v41 }
 0x4f5   : > { %v1742_v40 = vmul.f32 %v1695_v9, %v7570_v34  ;;  %v5848_v34 = vmul.f32 %v1687_v5, %v5497_v55  ;;  %v1751_v55 = vmul.f32 %v1699_v25, %v7589_v1 }
 0x4f7   : > { %7583 = vst [vmem:[#allocation3_spill] sm:$0xff] %v5848_v34 }
 0x4f8   : > { %4764 = vset.pattern.permute.xlu1 %v7549_v23  ;;  %4766 = vset.pattern.permute.xlu0 %v7423_v37 }
 0x4f9   : > { %2805 = vperm.xlu1 %4764, %v2771_v60   ;;  %v7571_v60 = vld [vmem:[#allocation40_spill] sm:$0xff] }
 0x4fa   : > { %v1744_v48 = vmul.f32 %v1695_v9, %v7571_v60  ;;  %v7584_v60 = vld [vmem:[#allocation31_spill] sm:$0xff] }
 0x4fd   : > { %2800 = vperm.xlu1 %4764, %v2770_v27   ;;  %v1741_v27 = vmul.f32 %v1695_v9, %v7572_v43  ;;  %v1750_v43 = vmul.f32 %v1699_v25, %v7584_v60 }
 0x501   : > { %2790 = vperm.xlu1 %4764, %v2768_v7   ;;  %v7574_v7 = vld [vmem:[#allocation17_spill] sm:$0xff] }
 0x502   : > { %v5821_v20 = vmul.f32 %v1687_v5, %v7574_v7  ;;  %v5855_v7 = vmul.f32 %v1687_v5, %v5467_v19  ;;  %v5868_v5 = vmul.f32 %v1699_v25, %v5393_v56 }
 0x504   : > { %7586 = vst [vmem:[#allocation5_spill] sm:$0xff] %v5855_v7 }
 0x505   : > { %2780 = vperm.xlu1 %4764, %v2766_v63   ;;  %v7581_v63 = vld [vmem:[#allocation53_spill] sm:$0xff] }
 0x506   : > { %v5842_v32 = vmul.f32 %v1695_v9, %v7581_v63 }
 0x509   : > { %4765 = vset.pattern.permute.xlu1 %v7423_v37  ;;  %v7591_v37 = vld [vmem:[#allocation54_spill] sm:$0xff] }
 0x50a   : > { %v5871_v51 = vmul.f32 %v1699_v25, %v7591_v37 }
 0x54d   : > { %v1811_v9 = vpop.permute.xlu0 %1810 }
 0x54e   : > { %v1870_v63 = vadd.f32 %v1811_v9, %v1766_v49  ;;  %v1872_v4 = vadd.f32 %v1811_v9, %v1768_v50  ;;  %v1869_v60 = vadd.f32 %v1811_v9, %v1765_v3  ;;  %v1871_v31 = vadd.f32 %v1811_v9, %v1767_v54 }
 0x54f   : > { %v5865_v19 = vadd.f32 %v1811_v9, %v1770_v13  ;;  %v5878_v54 = vadd.f32 %v1811_v9, %v1772_v53  ;;  %v5880_v56 = vadd.f32 %v1811_v9, %v1769_v14  ;;  %v5882_v13 = vadd.f32 %v1811_v9, %v1771_v15 }
 0x550   : > { %vm1934_vm2 = vcmp.gt.f32.partialorder %v1870_v63, 0.0  ;;  %v1998_v58 = vmul.f32 0.01, %v1870_v63  ;;  %vm1936_vm3 = vcmp.gt.f32.partialorder %v1872_v4, 0.0  ;;  %v2000_v1 = vmul.f32 0.01, %v1872_v4 }
 0x551   : > { %vm1933_vm4 = vcmp.gt.f32.partialorder %v1869_v60, 0.0  ;;  %v1997_v49 = vmul.f32 0.01, %v1869_v60  ;;  %vm1935_vm5 = vcmp.gt.f32.partialorder %v1871_v31, 0.0  ;;  %v1999_v50 = vmul.f32 0.01, %v1871_v31 }
 0x552   : > { %v5876_v3 = vsel %vm1934_vm2, %v1870_v63, %v1998_v58  ;;  %v5888_v25 = vsel %vm1936_vm3, %v1872_v4, %v2000_v1  ;;  %v5895_v18 = vmul.f32 0.01, %v5865_v19 }
 0x553   : > { %v5884_v37 = vpop.permute.xlu0 %1795  ;;  %v5886_v28 = vpop.permute.xlu1 %1800  ;;  %v5890_v41 = vsel %vm1933_vm4, %v1869_v60, %v1997_v49  ;;  %v5892_v33 = vsel %vm1935_vm5, %v1871_v31, %v1999_v50 }
 0x554   : > { %v1846_v53 = vadd.f32 %v5884_v37, %v1742_v40  ;;  %v1854_v14 = vadd.f32 %v5886_v28, %v1750_v43  ;;  %v1848_v15 = vadd.f32 %v5884_v37, %v1744_v48  ;;  %v1856_v9 = vadd.f32 %v5886_v28, %v1752_v29 }
 0x555   : > { %v1845_v63 = vadd.f32 %v5884_v37, %v1741_v27  ;;  %v1853_v4 = vadd.f32 %v5886_v28, %v1749_v62  ;;  %v1847_v60 = vadd.f32 %v5884_v37, %v1743_v10  ;;  %v1855_v31 = vadd.f32 %v5886_v28, %v1751_v55  ;;  %v7596_v27 = vld [vmem:[#allocation27_spill] sm:$0xff] }
 0x556   : > { %vm1910_vm6 = vcmp.gt.f32.partialorder %v1846_v53, 0.0  ;;  %vm1918_vm7 = vcmp.gt.f32.partialorder %v1854_v14, 0.0  ;;  %v1974_v58 = vmul.f32 0.01, %v1846_v53  ;;  %v1982_v1 = vmul.f32 0.01, %v1854_v14 }
 0x557   : > { %vm1912_vm8 = vcmp.gt.f32.partialorder %v1848_v15, 0.0  ;;  %vm1920_vm9 = vcmp.gt.f32.partialorder %v1856_v9, 0.0  ;;  %v1976_v40 = vmul.f32 0.01, %v1848_v15  ;;  %v1984_v43 = vmul.f32 0.01, %v1856_v9  ;;  %v5923_v2 = vpop.permute.xlu0 %1790 }
 0x558   : > { %v5905_v49 = vpop.permute.xlu1 %1690  ;;  %v5907_v48 = vsel %vm1910_vm6, %v1846_v53, %v1974_v58  ;;  %v5909_v29 = vsel %vm1918_vm7, %v1854_v14, %v1982_v1  ;;  %vm1909_vm10 = vcmp.gt.f32.partialorder %v1845_v63, 0.0  ;;  %vm1917_vm11 = vcmp.gt.f32.partialorder %v1853_v4, 0.0  ;;  %v7593_v1 = vld [vmem:[#allocation24_spill] sm:$0xff] }
 0x559   : > { %7592 = vst [vmem:[#allocation6_spill] sm:$0xff] %v5905_v49  ;;  %v5913_v10 = vsel %vm1912_vm8, %v1848_v15, %v1976_v40  ;;  %v5915_v62 = vsel %vm1920_vm9, %v1856_v9, %v1984_v43  ;;  %v1973_v55 = vmul.f32 0.01, %v1845_v63  ;;  %v1981_v35 = vmul.f32 0.01, %v1853_v4  ;;  %v7594_v9 = vld [vmem:[#allocation29_spill] sm:$0xff] }
 0x55a   : > { %vm1911_vm12 = vcmp.gt.f32.partialorder %v1847_v60, 0.0  ;;  %vm1919_vm13 = vcmp.gt.f32.partialorder %v1855_v31, 0.0  ;;  %v1975_v14 = vmul.f32 0.01, %v1847_v60  ;;  %v1983_v58 = vmul.f32 0.01, %v1855_v31 }
 0x55b   : > { %v5919_v53 = vsel %vm1909_vm10, %v1845_v63, %v1973_v55  ;;  %v1734_v59 = vmul.f32 %v5905_v49, %v7593_v1  ;;  %v5925_v15 = vsel %vm1917_vm11, %v1853_v4, %v1981_v35  ;;  %v1736_v40 = vmul.f32 %v5905_v49, %v7594_v9  ;;  %v7595_v43 = vld [vmem:[#allocation26_spill] sm:$0xff] }
 0x55c   : > { %v1733_v50 = vmul.f32 %v5905_v49, %v7595_v43  ;;  %v1735_v52 = vmul.f32 %v5905_v49, %v7596_v27  ;;  %v5937_v22 = vsel %vm1911_vm12, %v1847_v60, %v1975_v14  ;;  %v5939_v1 = vsel %vm1919_vm13, %v1855_v31, %v1983_v58 }
 0x55d   : > { %v5933_v63 = vpop.permute.xlu1 %1785  ;;  %v1838_v35 = vadd.f32 %v5923_v2, %v1734_v59  ;;  %v1840_v43 = vadd.f32 %v5923_v2, %v1736_v40  ;;  %vm1938_vm12 = vcmp.gt.f32.partialorder %v5865_v19, 0.0  ;;  %vm1940_vm13 = vcmp.gt.f32.partialorder %v5878_v54, 0.0 }
 0x55e   : > { %v1830_v9 = vadd.f32 %v5933_v63, %v5821_v20  ;;  %v1832_v27 = vadd.f32 %v5933_v63, %v5824_v16  ;;  %v1829_v60 = vadd.f32 %v5933_v63, %v5827_v39  ;;  %v1837_v31 = vadd.f32 %v5923_v2, %v1733_v50 }
 0x55f   : > { %vm1902_vm14 = vcmp.gt.f32.partialorder %v1838_v35, 0.0  ;;  %v1966_v7 = vmul.f32 0.01, %v1838_v35  ;;  %vm1904_vm3 = vcmp.gt.f32.partialorder %v1840_v43, 0.0  ;;  %v1968_v4 = vmul.f32 0.01, %v1840_v43 }
 0x560   : > { %vm1894_vm15 = vcmp.gt.f32.partialorder %v1830_v9, 0.0  ;;  %v1958_v59 = vmul.f32 0.01, %v1830_v9  ;;  %vm1896_vm2 = vcmp.gt.f32.partialorder %v1832_v27, 0.0  ;;  %v1960_v20 = vmul.f32 0.01, %v1832_v27 }
 0x561   : > { %v5952_v14 = vpop.permute.xlu1 %1805  ;;  %v5954_v58 = vsel %vm1902_vm14, %v1838_v35, %v1966_v7  ;;  %vm1893_vm4 = vcmp.gt.f32.partialorder %v1829_v60, 0.0  ;;  %v2032_v8 = vsel %vm1904_vm3, %v1840_v43, %v1968_v4  ;;  %vm1901_vm5 = vcmp.gt.f32.partialorder %v1837_v31, 0.0 }
 0x562   : > { %v1862_v16 = vadd.f32 %v5952_v14, %v5779_v46  ;;  %v1864_v40 = vadd.f32 %v5952_v14, %v5783_v61  ;;  %v1861_v39 = vadd.f32 %v5952_v14, %v5787_v38  ;;  %v1863_v50 = vadd.f32 %v5952_v14, %v5791_v26 }
 0x563   : > { %v2022_v55 = vsel %vm1894_vm15, %v1830_v9, %v1958_v59  ;;  %v2024_v0 = vsel %vm1896_vm2, %v1832_v27, %v1960_v20  ;;  %v1957_v20 = vmul.f32 0.01, %v1829_v60  ;;  %v1965_v30 = vmul.f32 0.01, %v1837_v31 }
 0x564   : > { %vm1926_vm6 = vcmp.gt.f32.partialorder %v1862_v16, 0.0  ;;  %v1990_v7 = vmul.f32 0.01, %v1862_v16  ;;  %vm1928_vm7 = vcmp.gt.f32.partialorder %v1864_v40, 0.0  ;;  %v1992_v35 = vmul.f32 0.01, %v1864_v40 }
 0x565   : > { %vm1925_vm8 = vcmp.gt.f32.partialorder %v1861_v39, 0.0  ;;  %v1989_v34 = vmul.f32 0.01, %v1861_v39  ;;  %vm1927_vm9 = vcmp.gt.f32.partialorder %v1863_v50, 0.0  ;;  %v1991_v46 = vmul.f32 0.01, %v1863_v50 }
 0x566   : > { %v5964_v11 = vpop.permute.xlu1 %1678  ;;  %v2054_v61 = vsel %vm1926_vm6, %v1862_v16, %v1990_v7  ;;  %v2056_v12 = vsel %vm1928_vm7, %v1864_v40, %v1992_v35  ;;  %v2086_v38 = vpack.c.bf16 %v5954_v58, %v2022_v55  ;;  %v2088_v49 = vpack.c.bf16 %v2032_v8, %v2024_v0  ;;  %v7597_v0 = vld [vmem:[#allocation14_spill] sm:$0xff]  ;;  %v7602_v35 = vld [vmem:[#allocation23_spill] sm:$0xff] }
 0x567   : > { %v2102_v26 = vpack.c.bf16 %v5876_v3, %v2054_v61  ;;  %v2104_v4 = vpack.c.bf16 %v5888_v25, %v2056_v12  ;;  %v2053_v9 = vsel %vm1925_vm8, %v1861_v39, %v1989_v34  ;;  %v2055_v27 = vsel %vm1927_vm9, %v1863_v50, %v1991_v46  ;;  %v7598_v25 = vld [vmem:[#allocation22_spill] sm:$0xff]  ;;  %v7604_v61 = vld [vmem:[#allocation15_spill] sm:$0xff] }
 0x568   : > { %v2101_v43 = vpack.c.bf16 %v5890_v41, %v2053_v9  ;;  %v2103_v59 = vpack.c.bf16 %v5892_v33, %v2055_v27  ;;  %v1831_v16 = vadd.f32 %v5933_v63, %v5830_v42  ;;  %v1839_v55 = vadd.f32 %v5923_v2, %v1735_v52  ;;  %v5988_v52 = vpop.permute.xlu0 %1775 }
 0x569   : > { %2481 = vmatprep.subr.bf16.mxu0 %v2102_v26  ;;  %2554 = vmatprep.subr.bf16.mxu1 %v2104_v4  ;;  %v1710_v8 = vmul.f32 %v5964_v11, %v7597_v0  ;;  %v5977_v12 = vmul.f32 0.01, %v5878_v54  ;;  %v2021_v33 = vsel %vm1893_vm4, %v1829_v60, %v1957_v20  ;;  %v2029_v3 = vsel %vm1901_vm5, %v1837_v31, %v1965_v30  ;;  %v7601_v31 = vld [vmem:[#allocation13_spill] sm:$0xff] }
 0x56a   : > { %2482 = vmatpush1.bf16.msra.mxu0 %v2101_v43  ;;  %2555 = vmatpush1.bf16.msra.mxu1 %v2103_v59  ;;  %v5979_v34 = vpop.permute.xlu1 %1682  ;;  %v1712_v41 = vmul.f32 %v5964_v11, %v7598_v25  ;;  %v5986_v42 = vmul.f32 0.01, %v5880_v56  ;;  %v7599_v58 = vpack.c.bf16 %v5909_v29, %v5907_v48  ;;  %v7600_v40 = vpack.c.bf16 %v5915_v62, %v5913_v10  ;;  %v7603_v10 = vld [vmem:[#allocation16_spill] sm:$0xff]  ;;  %v7607_v59 = vld [vmem:[#allocation18_spill] sm:$0xff] }
 0x56b   : > { %v2085_v39 = vpack.c.bf16 %v2029_v3, %v2021_v33  ;;  %vm1895_vm10 = vcmp.gt.f32.partialorder %v1831_v16, 0.0  ;;  %vm1903_vm11 = vcmp.gt.f32.partialorder %v1839_v55, 0.0  ;;  %v1959_v30 = vmul.f32 0.01, %v1831_v16 }
 0x56c   : > { %2483 = vmatprep.subr.bf16.mxu0 %v7599_v58  ;;  %2556 = vmatprep.subr.bf16.mxu1 %v7600_v40  ;;  %v1967_v60 = vmul.f32 0.01, %v1839_v55  ;;  %v1718_v50 = vmul.f32 %v5979_v34, %v7601_v31  ;;  %v1814_v7 = vadd.f32 %v5988_v52, %v1710_v8  ;;  %v1720_v46 = vmul.f32 %v5979_v34, %v7602_v35 }
 0x56d   : > { %v2023_v48 = vsel %vm1895_vm10, %v1831_v16, %v1959_v30  ;;  %v1816_v29 = vadd.f32 %v5988_v52, %v1712_v41  ;;  %v1709_v62 = vmul.f32 %v5964_v11, %v7603_v10  ;;  %v1717_v26 = vmul.f32 %v5979_v34, %v7604_v61 }
 0x56e   : > { %v7605_v4 = vpack.c.bf16 %v5925_v15, %v5919_v53  ;;  %v7606_v9 = vpack.c.bf16 %v5939_v1, %v5937_v22  ;;  %v2031_v27 = vsel %vm1903_vm11, %v1839_v55, %v1967_v60  ;;  %vm1878_vm14 = vcmp.gt.f32.partialorder %v1814_v7, 0.0 }
 0x56f   : > { %v1942_v43 = vmul.f32 0.01, %v1814_v7  ;;  %v1711_v20 = vmul.f32 %v5964_v11, %v7607_v59  ;;  %v6016_v16 = vpop.permute.xlu1 %1780  ;;  %v2087_v0 = vpack.c.bf16 %v2031_v27, %v2023_v48  ;;  %vm1880_vm15 = vcmp.gt.f32.partialorder %v1816_v29, 0.0 }
 0x570   : > { %2484 = vmatpush1.bf16.msra.mxu0 %v7605_v4  ;;  %2557 = vmatpush1.bf16.msra.mxu1 %v7606_v9  ;;  %v1944_v8 = vmul.f32 0.01, %v1816_v29  ;;  %v1813_v53 = vadd.f32 %v5988_v52, %v1709_v62  ;;  %vm1937_vm2 = vcmp.gt.f32.partialorder %v5880_v56, 0.0  ;;  %v1822_v22 = vadd.f32 %v6016_v16, %v1718_v50 }
 0x571   : > { %2485 = vmatprep.subr.bf16.mxu0 %v2086_v38  ;;  %2558 = vmatprep.subr.bf16.mxu1 %v2088_v49  ;;  %v2006_v15 = vsel %vm1878_vm14, %v1814_v7, %v1942_v43  ;;  %v1824_v1 = vadd.f32 %v6016_v16, %v1720_v46  ;;  %v1821_v55 = vadd.f32 %v6016_v16, %v1717_v26  ;;  %v7608_v49 = vld [vmem:[#allocation19_spill] sm:$0xff]  ;;  %v6038_v26 = vld [vmem:[%s7360_s5] sm:$0xff]  }
 0x572   : > { %v2008_v33 = vsel %vm1880_vm15, %v1816_v29, %v1944_v8  ;;  %vm1877_vm3 = vcmp.gt.f32.partialorder %v1813_v53, 0.0  ;;  %v1941_v38 = vmul.f32 0.01, %v1813_v53  ;;  %v1719_v3 = vmul.f32 %v5979_v34, %v7608_v49 }
 0x573   : > { %vm1886_vm4 = vcmp.gt.f32.partialorder %v1822_v22, 0.0  ;;  %v1950_v25 = vmul.f32 0.01, %v1822_v22  ;;  %vm1888_vm5 = vcmp.gt.f32.partialorder %v1824_v1, 0.0  ;;  %v1952_v41 = vmul.f32 0.01, %v1824_v1 }
 0x574   : > { %2486 = vmatpush1.bf16.msra.mxu0 %v2085_v39  ;;  %2559 = vmatpush1.bf16.msra.mxu1 %v2087_v0  ;;  %vm1885_vm6 = vcmp.gt.f32.partialorder %v1821_v55, 0.0  ;;  %v1949_v58 = vmul.f32 0.01, %v1821_v55  ;;  %v2005_v40 = vsel %vm1877_vm3, %v1813_v53, %v1941_v38  ;;  %v1815_v30 = vadd.f32 %v5988_v52, %v1711_v20 }
 0x575   : > { %v2014_v60 = vsel %vm1886_vm4, %v1822_v22, %v1950_v25  ;;  %v2016_v31 = vsel %vm1888_vm5, %v1824_v1, %v1952_v41  ;;  %v1823_v50 = vadd.f32 %v6016_v16, %v1719_v3  ;;  %v1866_v7 = vadd.f32 %v5952_v14, %v5801_v17 }
 0x576   : > { %v2078_v35 = vpack.c.bf16 %v2014_v60, %v2006_v15  ;;  %v2080_v46 = vpack.c.bf16 %v2016_v31, %v2008_v33  ;;  %v2013_v39 = vsel %vm1885_vm6, %v1821_v55, %v1949_v58  ;;  %vm1879_vm7 = vcmp.gt.f32.partialorder %v1815_v30, 0.0  ;;  %v6073_v33 = vld [vmem:[%s7360_s5 + $0x8] sm:$0xff]  }
 0x577   : > { %v2077_v48 = vpack.c.bf16 %v2013_v39, %v2005_v40  ;;  %vm1887_vm8 = vcmp.gt.f32.partialorder %v1823_v50, 0.0  ;;  %v1943_v29 = vmul.f32 0.01, %v1815_v30  ;;  %v1951_v10 = vmul.f32 0.01, %v1823_v50 }
 0x578   : > { %2487 = vmatprep.subr.bf16.mxu0 %v2078_v35  ;;  %2560 = vmatprep.subr.bf16.mxu1 %v2080_v46  ;;  %vm1930_vm9 = vcmp.gt.f32.partialorder %v1866_v7, 0.0  ;;  %v1994_v62 = vmul.f32 0.01, %v1866_v7  ;;  %v2066_v61 = vsel %vm1938_vm12, %v5865_v19, %v5895_v18  ;;  %v1868_v17 = vadd.f32 %v5952_v14, %v5805_v57  ;;  %v7611_v46 = vld [vmem:[#allocation2_spill] sm:$0xff] }
 0x579   : > { %2488 = vmatpush1.bf16.msra.mxu0 %v2077_v48  ;;  %v2007_v4 = vsel %vm1879_vm7, %v1815_v30, %v1943_v29  ;;  %v2015_v9 = vsel %vm1887_vm8, %v1823_v50, %v1951_v10  ;;  %v2068_v27 = vsel %vm1940_vm13, %v5878_v54, %v5977_v12  ;;  %v1865_v43 = vadd.f32 %v5952_v14, %v5809_v36  ;;  %v7609_v50 = vld [vmem:[#allocation46_spill] sm:$0xff] }
 0x57a   : > { %v2079_v18 = vpack.c.bf16 %v2015_v9, %v2007_v4  ;;  %v2058_v19 = vsel %vm1930_vm9, %v1866_v7, %v1994_v62  ;;  %vm1932_vm10 = vcmp.gt.f32.partialorder %v1868_v17, 0.0  ;;  %v1996_v57 = vmul.f32 0.01, %v1868_v17  ;;  %v7610_v7 = vld [vmem:[#allocation6_spill] sm:$0xff]  ;;  %v7612_v62 = vld [vmem:[#allocation52_spill] sm:$0xff] }
 0x57b   : > { %v2106_v59 = vpack.c.bf16 %v2066_v61, %v2058_v19  ;;  %vm1929_vm11 = vcmp.gt.f32.partialorder %v1865_v43, 0.0  ;;  %v1993_v20 = vmul.f32 0.01, %v1865_v43  ;;  %v2065_v0 = vsel %vm1937_vm2, %v5880_v56, %v5986_v42  ;;  %v6100_v9 = vld [vmem:[%s7360_s5 + $0x10] sm:$0xff]  }
 0x57c   : > { %2561 = vmatpush1.bf16.msra.mxu1 %v2079_v18  ;;  %v2060_v8 = vsel %vm1932_vm10, %v1868_v17, %v1996_v57  ;;  %4427 = vmatmul.mubr.msk.bf16.vlgmr.msra.gmra.mxu0 %vm1112_vm1, %v6038_v26  ;;  %v1867_v36 = vadd.f32 %v5952_v14, %v5813_v6  ;;  %vm1939_vm12 = vcmp.gt.f32.partialorder %v5882_v13, 0.0  ;;  %v2003_v54 = vmul.f32 0.01, %v5882_v13  ;;  %v7613_v17 = vld [vmem:[#allocation3_spill] sm:$0xff] }
 0x57d   : > { %2627 = vmatprep.subr.bf16.mxu0 %v2106_v59  ;;  %v2108_v12 = vpack.c.bf16 %v2068_v27, %v2060_v8  ;;  %v2057_v53 = vsel %vm1929_vm11, %v1865_v43, %v1993_v20  ;;  %v1850_v22 = vadd.f32 %v5884_v37, %v5833_v24  ;;  %v1858_v56 = vadd.f32 %v5886_v28, %v5863_v21  ;;  %v7614_v8 = vld [vmem:[#allocation45_spill] sm:$0xff] }
 0x57e   : > { %v2105_v42 = vpack.c.bf16 %v2065_v0, %v2057_v53  ;;  %vm1931_vm13 = vcmp.gt.f32.partialorder %v1867_v36, 0.0  ;;  %v1995_v15 = vmul.f32 0.01, %v1867_v36  ;;  %v2067_v1 = vsel %vm1939_vm12, %v5882_v13, %v2003_v54  ;;  %2515 = vmatprep.mubr.bf16.mxu0 %v7549_v23  ;;  %v7615_v54 = vld [vmem:[#allocation4_spill] sm:$0xff] }
 0x57f   : > { %2700 = vmatprep.subr.bf16.mxu1 %v2108_v12  ;;  %4431 = vmatmul.mubr.msk.bf16.vlgmr.msra.gmra.mxu1 %vm1112_vm1, %v6038_v26  ;;  %vm1914_vm14 = vcmp.gt.f32.partialorder %v1850_v22, 0.0  ;;  %vm1922_vm15 = vcmp.gt.f32.partialorder %v1858_v56, 0.0  ;;  %v1978_v6 = vmul.f32 0.01, %v1850_v22  ;;  %v1986_v14 = vmul.f32 0.01, %v1858_v56 }
 0x580   : > { %2628 = vmatpush1.bf16.msra.mxu0 %v2105_v42  ;;  %v2059_v24 = vsel %vm1931_vm13, %v1867_v36, %v1995_v15  ;;  %v1852_v21 = vadd.f32 %v5884_v37, %v5836_v45  ;;  %v1860_v55 = vadd.f32 %v5886_v28, %v5868_v5  ;;  %v1849_v13 = vadd.f32 %v5884_v37, %v5839_v44 }
 0x581   : > { %v2107_v38 = vpack.c.bf16 %v2067_v1, %v2059_v24  ;;  %v2042_v49 = vsel %vm1914_vm14, %v1850_v22, %v1978_v6  ;;  %v2050_v3 = vsel %vm1922_vm15, %v1858_v56, %v1986_v14  ;;  %v1857_v25 = vadd.f32 %v5886_v28, %v5871_v51  ;;  %2588 = vmatprep.mubr.bf16.mxu1 %v7549_v23  ;;  %v7616_v56 = vld [vmem:[#allocation48_spill] sm:$0xff]  ;;  %v7617_v24 = vld [vmem:[#allocation5_spill] sm:$0xff] }
 0x582   : > { %v2098_v45 = vpack.c.bf16 %v2050_v3, %v2042_v49  ;;  %vm1916_vm2 = vcmp.gt.f32.partialorder %v1852_v21, 0.0  ;;  %vm1924_vm3 = vcmp.gt.f32.partialorder %v1860_v55, 0.0  ;;  %v1980_v5 = vmul.f32 0.01, %v1852_v21 }
 0x583   : > { %2701 = vmatpush1.bf16.msra.mxu1 %v2107_v38  ;;  %v1988_v41 = vmul.f32 0.01, %v1860_v55  ;;  %vm1913_vm4 = vcmp.gt.f32.partialorder %v1849_v13, 0.0  ;;  %vm1921_vm5 = vcmp.gt.f32.partialorder %v1857_v25, 0.0  ;;  %v1977_v44 = vmul.f32 0.01, %v1849_v13 }
 0x584   : > { %2629 = vmatprep.subr.bf16.mxu0 %v2098_v45  ;;  %v2044_v58 = vsel %vm1916_vm2, %v1852_v21, %v1980_v5  ;;  %v1985_v40 = vmul.f32 0.01, %v1857_v25  ;;  %v1851_v30 = vadd.f32 %v5884_v37, %v5842_v32  ;;  %v1859_v51 = vadd.f32 %v5886_v28, %v5874_v47  ;;  %4428 = vmatmul.mubr.msk.bf16.gmra.mxu0 %vm1112_vm1, %v6073_v33 }
 0x585   : > { %v2052_v60 = vsel %vm1924_vm3, %v1860_v55, %v1988_v41  ;;  %v2041_v31 = vsel %vm1913_vm4, %v1849_v13, %v1977_v44  ;;  %v1738_v35 = vmul.f32 %v7610_v7, %v7609_v50  ;;  %v1834_v39 = vadd.f32 %v5933_v63, %v7611_v46  ;;  %2525 = vmatprep.mubr.bf16.mxu0 %v7549_v23  ;;  %v7618_v13 = vld [vmem:[#allocation59_spill] sm:$0xff]  ;;  %v7619_v41 = vld [vmem:[#allocation58_spill] sm:$0xff] }
 0x586   : > { %v2100_v48 = vpack.c.bf16 %v2052_v60, %v2044_v58  ;;  %v2049_v29 = vsel %vm1921_vm5, %v1857_v25, %v1985_v40  ;;  %vm1915_vm6 = vcmp.gt.f32.partialorder %v1851_v30, 0.0  ;;  %vm1923_vm7 = vcmp.gt.f32.partialorder %v1859_v51, 0.0  ;;  %v7620_v58 = vld [vmem:[#allocation63_spill] sm:$0xff]  ;;  %v7621_v50 = vld [vmem:[#allocation62_spill] sm:$0xff] }
 0x587   : > { %v2097_v32 = vpack.c.bf16 %v2049_v29, %v2041_v31  ;;  %v1979_v37 = vmul.f32 0.01, %v1851_v30  ;;  %v1987_v47 = vmul.f32 0.01, %v1859_v51  ;;  %v1842_v28 = vadd.f32 %v5923_v2, %v1738_v35  ;;  %4432 = vmatmul.mubr.msk.bf16.gmra.mxu1 %vm1112_vm1, %v6073_v33 }
 0x588   : > { %2702 = vmatprep.subr.bf16.mxu1 %v2100_v48  ;;  %vm1898_vm8 = vcmp.gt.f32.partialorder %v1834_v39, 0.0  ;;  %v1962_v10 = vmul.f32 0.01, %v1834_v39  ;;  %v1740_v61 = vmul.f32 %v7610_v7, %v7612_v62  ;;  %v1836_v4 = vadd.f32 %v5933_v63, %v7613_v17  ;;  %2598 = vmatprep.mubr.bf16.mxu1 %v7549_v23 }
 0x589   : > { %2630 = vmatpush1.bf16.msra.mxu0 %v2097_v32  ;;  %v2043_v27 = vsel %vm1915_vm6, %v1851_v30, %v1979_v37  ;;  %v2051_v43 = vsel %vm1923_vm7, %v1859_v51, %v1987_v47  ;;  %vm1906_vm9 = vcmp.gt.f32.partialorder %v1842_v28, 0.0  ;;  %v1970_v18 = vmul.f32 0.01, %v1842_v28  ;;  %v6129_v30 = vld [vmem:[%s7360_s5 + $0x18] sm:$0xff]   ;;  %v7622_v32 = vld [vmem:[#allocation50_spill] sm:$0xff]  ;;  %v7623_v47 = vld [vmem:[#allocation47_spill] sm:$0xff] }
 0x58a   : > { %v2099_v19 = vpack.c.bf16 %v2051_v43, %v2043_v27  ;;  %v2026_v57 = vsel %vm1898_vm8, %v1834_v39, %v1962_v10  ;;  %v1844_v59 = vadd.f32 %v5923_v2, %v1740_v61  ;;  %vm1900_vm10 = vcmp.gt.f32.partialorder %v1836_v4, 0.0  ;;  %v7624_v61 = vld [vmem:[#allocation61_spill] sm:$0xff] }
 0x58b   : > { %v2034_v20 = vsel %vm1906_vm9, %v1842_v28, %v1970_v18  ;;  %v1964_v0 = vmul.f32 0.01, %v1836_v4  ;;  %v1737_v36 = vmul.f32 %v7610_v7, %v7614_v8  ;;  %v1833_v12 = vadd.f32 %v5933_v63, %v7615_v54 }
 0x58c   : > { %2703 = vmatpush1.bf16.msra.mxu1 %v2099_v19  ;;  %v2090_v53 = vpack.c.bf16 %v2034_v20, %v2026_v57  ;;  %vm1908_vm11 = vcmp.gt.f32.partialorder %v1844_v59, 0.0  ;;  %v1972_v22 = vmul.f32 0.01, %v1844_v59  ;;  %v1739_v42 = vmul.f32 %v7610_v7, %v7616_v56  ;;  %4429 = vmatmul.mubr.msk.bf16.gmra.mxu0 %vm1112_vm1, %v6100_v9  ;;  %v7625_v57 = vld [vmem:[#allocation60_spill] sm:$0xff] }
 0x58d   : > { %v2028_v15 = vsel %vm1900_vm10, %v1836_v4, %v1964_v0  ;;  %v1841_v1 = vadd.f32 %v5923_v2, %v1737_v36  ;;  %vm1897_vm12 = vcmp.gt.f32.partialorder %v1833_v12, 0.0  ;;  %v1961_v6 = vmul.f32 0.01, %v1833_v12  ;;  %2535 = vmatprep.mubr.bf16.mxu0 %v7549_v23 }
 0x58e   : > { %2631 = vmatprep.subr.bf16.mxu0 %v2090_v53  ;;  %v2036_v14 = vsel %vm1908_vm11, %v1844_v59, %v1972_v22  ;;  %v1835_v21 = vadd.f32 %v5933_v63, %v7617_v24  ;;  %v1843_v55 = vadd.f32 %v5923_v2, %v1739_v42  ;;  %v1714_v38 = vmul.f32 %v5964_v11, %v7618_v13 }
 0x58f   : > { %v2092_v49 = vpack.c.bf16 %v2036_v14, %v2028_v15  ;;  %vm1905_vm13 = vcmp.gt.f32.partialorder %v1841_v1, 0.0  ;;  %v1969_v3 = vmul.f32 0.01, %v1841_v1  ;;  %v2025_v25 = vsel %vm1897_vm12, %v1833_v12, %v1961_v6  ;;  %4433 = vmatmul.mubr.msk.bf16.gmra.mxu1 %vm1112_vm1, %v6100_v9 }
 0x590   : > { %vm1899_vm14 = vcmp.gt.f32.partialorder %v1835_v21, 0.0  ;;  %vm1907_vm15 = vcmp.gt.f32.partialorder %v1843_v55, 0.0  ;;  %v1963_v45 = vmul.f32 0.01, %v1835_v21  ;;  %v1971_v5 = vmul.f32 0.01, %v1843_v55  ;;  %2608 = vmatprep.mubr.bf16.mxu1 %v7549_v23 }
 0x591   : > { %2704 = vmatprep.subr.bf16.mxu1 %v2092_v49  ;;  %v2033_v63 = vsel %vm1905_vm13, %v1841_v1, %v1969_v3  ;;  %v1722_v2 = vmul.f32 %v5979_v34, %v7619_v41  ;;  %v1818_v44 = vadd.f32 %v5988_v52, %v1714_v38  ;;  %v1716_v40 = vmul.f32 %v5964_v11, %v7620_v58 }
 0x592   : > { %v2089_v51 = vpack.c.bf16 %v2033_v63, %v2025_v25  ;;  %v2027_v60 = vsel %vm1899_vm14, %v1835_v21, %v1963_v45  ;;  %v2035_v31 = vsel %vm1907_vm15, %v1843_v55, %v1971_v5  ;;  %v1724_v7 = vmul.f32 %v5979_v34, %v7621_v50 }
 0x593   : > { %v2091_v35 = vpack.c.bf16 %v2035_v31, %v2027_v60  ;;  %v1826_v46 = vadd.f32 %v6016_v16, %v1722_v2  ;;  %vm1882_vm2 = vcmp.gt.f32.partialorder %v1818_v44, 0.0  ;;  %v1946_v39 = vmul.f32 0.01, %v1818_v44 }
 0x594   : > { %2632 = vmatpush1.bf16.msra.mxu0 %v2089_v51  ;;  %v1820_v48 = vadd.f32 %v5988_v52, %v1716_v40  ;;  %v1828_v29 = vadd.f32 %v6016_v16, %v1724_v7  ;;  %v1713_v37 = vmul.f32 %v5964_v11, %v7622_v32  ;;  %v1721_v28 = vmul.f32 %v5979_v34, %v7623_v47 }
 0x595   : > { %2705 = vmatpush1.bf16.msra.mxu1 %v2091_v35  ;;  %vm1890_vm3 = vcmp.gt.f32.partialorder %v1826_v46, 0.0  ;;  %v1954_v10 = vmul.f32 0.01, %v1826_v46  ;;  %v2010_v62 = vsel %vm1882_vm2, %v1818_v44, %v1946_v39  ;;  %v1715_v17 = vmul.f32 %v5964_v11, %v7624_v61  ;;  %4430 = vmatmul.mubr.msk.bf16.gmra.mxu0 %vm1112_vm1, %v6129_v30 }
 0x596   : > { %vm1884_vm4 = vcmp.gt.f32.partialorder %v1820_v48, 0.0  ;;  %vm1892_vm5 = vcmp.gt.f32.partialorder %v1828_v29, 0.0  ;;  %v1948_v4 = vmul.f32 0.01, %v1820_v48  ;;  %v1956_v27 = vmul.f32 0.01, %v1828_v29  ;;  %2651 = vmatprep.mubr.bf16.mxu0 %v7549_v23 }
 0x597   : > { %v2018_v43 = vsel %vm1890_vm3, %v1826_v46, %v1954_v10  ;;  %v1817_v18 = vadd.f32 %v5988_v52, %v1713_v37  ;;  %v1825_v19 = vadd.f32 %v6016_v16, %v1721_v28  ;;  %v1723_v59 = vmul.f32 %v5979_v34, %v7625_v57  ;;  %4434 = vmatmul.mubr.msk.bf16.gmra.mxu1 %vm1112_vm1, %v6129_v30 }
 0x598   : > { %v2082_v11 = vpack.c.bf16 %v2018_v43, %v2010_v62  ;;  %v2012_v20 = vsel %vm1884_vm4, %v1820_v48, %v1948_v4  ;;  %v2020_v0 = vsel %vm1892_vm5, %v1828_v29, %v1956_v27  ;;  %v1819_v8 = vadd.f32 %v5988_v52, %v1715_v17  ;;  %2724 = vmatprep.mubr.bf16.mxu1 %v7549_v23 }
 0x599   : > { %v2084_v36 = vpack.c.bf16 %v2020_v0, %v2012_v20  ;;  %vm1881_vm6 = vcmp.gt.f32.partialorder %v1817_v18, 0.0  ;;  %vm1889_vm7 = vcmp.gt.f32.partialorder %v1825_v19, 0.0  ;;  %v1945_v54 = vmul.f32 0.01, %v1817_v18 }
 0x59a   : > { %2633 = vmatprep.subr.bf16.mxu0 %v2082_v11  ;;  %v1953_v12 = vmul.f32 0.01, %v1825_v19  ;;  %v1827_v53 = vadd.f32 %v6016_v16, %v1723_v59  ;;  %v1947_v22 = vmul.f32 0.01, %v1819_v8  ;;  %vm1883_vm8 = vcmp.gt.f32.partialorder %v1819_v8, 0.0  ;;  %v6176_v16 = vpop.f32.mrf.mxu0 }
 0x59b   : > { %2706 = vmatprep.subr.bf16.mxu1 %v2084_v36  ;;  %v2009_v34 = vsel %vm1881_vm6, %v1817_v18, %v1945_v54 }
 0x59c   : > { %v2017_v56 = vsel %vm1889_vm7, %v1825_v19, %v1953_v12  ;;  %vm1891_vm9 = vcmp.gt.f32.partialorder %v1827_v53, 0.0  ;;  %v1955_v42 = vmul.f32 0.01, %v1827_v53  ;;  %v2011_v1 = vsel %vm1883_vm8, %v1819_v8, %v1947_v22 }
 0x59d   : > { %v2081_v15 = vpack.c.bf16 %v2017_v56, %v2009_v34 }
 0x59e   : > { %v2019_v52 = vsel %vm1891_vm9, %v1827_v53, %v1955_v42 }
 0x59f   : > { %2634 = vmatpush1.bf16.msra.mxu0 %v2081_v15  ;;  %v2083_v6 = vpack.c.bf16 %v2019_v52, %v2011_v1  ;;  %v6294_v15 = vpop.permute.xlu0 %2810 }
 0x5a1   : > { %2707 = vmatpush1.bf16.msra.mxu1 %v2083_v6 }
 0x5a2   : > { %4435 = vmatmul.mubr.msk.bf16.vlgmr.msra.gmra.mxu0 %vm1112_vm1, %v6038_v26 }
 0x5a3   : > { %2661 = vmatprep.mubr.bf16.mxu0 %v7549_v23  ;;  %v6300_v6 = vpop.permute.xlu0 %2795 }
 0x5a4   : > { %4439 = vmatmul.mubr.msk.bf16.vlgmr.msra.gmra.mxu1 %vm1112_vm1, %v6038_v26  ;;  %v6178_v26 = vpop.f32.mrf.mxu1 }
 0x5a5   : > { %2734 = vmatprep.mubr.bf16.mxu1 %v7549_v23 }
 0x5a6   : > { %v6182_v14 = vpop.f32.mrf.mxu1 }
 0x5a8   : > { %v6186_v21 = vpop.f32.mrf.mxu1 }
 0x5aa   : > { %4436 = vmatmul.mubr.msk.bf16.gmra.mxu0 %vm1112_vm1, %v6073_v33  ;;  %v6190_v55 = vpop.f32.mrf.mxu1 }
 0x5ab   : > { %2671 = vmatprep.mubr.bf16.mxu0 %v7549_v23 }
 0x5ac   : > { %4440 = vmatmul.mubr.msk.bf16.gmra.mxu1 %vm1112_vm1, %v6073_v33  ;;  %v6180_v33 = vpop.f32.mrf.mxu0  ;;  %v6194_v38 = vpop.f32.mrf.mxu1 }
 0x5ad   : > { %2744 = vmatprep.mubr.bf16.mxu1 %v7549_v23 }
 0x5ae   : > { %v6184_v24 = vpop.f32.mrf.mxu0  ;;  %v6198_v3 = vpop.f32.mrf.mxu1 }
 0x5b0   : > { %v6202_v45 = vpop.f32.mrf.mxu1 }
 0x5b2   : > { %4437 = vmatmul.mubr.msk.bf16.gmra.mxu0 %vm1112_vm1, %v6100_v9  ;;  %v6206_v63 = vpop.f32.mrf.mxu1 }
 0x5b3   : > { %2681 = vmatprep.mubr.bf16.mxu0 %v7549_v23 }
 0x5b4   : > { %4441 = vmatmul.mubr.msk.bf16.gmra.mxu1 %vm1112_vm1, %v6100_v9  ;;  %v6188_v9 = vpop.f32.mrf.mxu0  ;;  %v6210_v2 = vpop.f32.mrf.mxu1 }
 0x5b5   : > { %2754 = vmatprep.mubr.bf16.mxu1 %v7549_v23 }
 0x5b6   : > { %v6192_v13 = vpop.f32.mrf.mxu0  ;;  %v6214_v58 = vpop.f32.mrf.mxu1 }
 0x5b8   : > { %v6196_v49 = vpop.f32.mrf.mxu0 }
 0x5ba   : > { %4438 = vmatmul.mubr.msk.bf16.gmra.mxu0 %vm1112_vm1, %v6129_v30  ;;  %v6200_v25 = vpop.f32.mrf.mxu0 }
 0x5bc   : > { %4442 = vmatmul.mubr.msk.bf16.gmra.mxu1 %vm1112_vm1, %v6129_v30  ;;  %v6204_v5 = vpop.f32.mrf.mxu0  ;;  %v6218_v30 = vpop.f32.mrf.mxu1 }
 0x5be   : > { %v6208_v41 = vpop.f32.mrf.mxu0  ;;  %v6222_v60 = vpop.f32.mrf.mxu1 }
 0x5c0   : > { %v6212_v44 = vpop.f32.mrf.mxu0  ;;  %v6226_v50 = vpop.f32.mrf.mxu1 }
 0x5c2   : > { %v6216_v40 = vpop.f32.mrf.mxu0  ;;  %v6230_v35 = vpop.f32.mrf.mxu1 }
 0x5c4   : > { %v6220_v51 = vpop.f32.mrf.mxu0  ;;  %v6234_v39 = vpop.f32.mrf.mxu1 }
 0x5c6   : > { %v6224_v31 = vpop.f32.mrf.mxu0  ;;  %v6238_v29 = vpop.f32.mrf.mxu1 }
 0x5c8   : > { %v6228_v7 = vpop.f32.mrf.mxu0  ;;  %v6242_v37 = vpop.f32.mrf.mxu1 }
 0x5c9   : > { %7627 = vst [vmem:[#allocation8_spill] sm:$0xff] %v6242_v37 }
 0x5ca   : > { %v6232_v46 = vpop.f32.mrf.mxu0  ;;  %v6246_v28 = vpop.f32.mrf.mxu1 }
 0x5cb   : > { %7629 = vst [vmem:[#allocation10_spill] sm:$0xff] %v6246_v28 }
 0x5cc   : > { %v6236_v48 = vpop.f32.mrf.mxu0  ;;  %v6250_v62 = vpop.f32.mrf.mxu1 }
 0x5cd   : > { %7631 = vst [vmem:[#allocation12_spill] sm:$0xff] %v6250_v62 }
 0x5ce   : > { %v6240_v32 = vpop.f32.mrf.mxu0  ;;  %v6254_v17 = vpop.f32.mrf.mxu1 }
 0x5cf   : > { %7626 = vst [vmem:[#allocation7_spill] sm:$0xff] %v6240_v32  ;;  %7633 = vst [vmem:[#allocation36_spill] sm:$0xff] %v6254_v17  ;;  %v6306_v17 = vpop.permute.xlu1 %2805 }
 0x5d0   : > { %v6244_v47 = vpop.f32.mrf.mxu0  ;;  %v6258_v27 = vpop.f32.mrf.mxu1 }
 0x5d1   : > { %7628 = vst [vmem:[#allocation9_spill] sm:$0xff] %v6244_v47  ;;  %7635 = vst [vmem:[#allocation44_spill] sm:$0xff] %v6258_v27 }
 0x5d2   : > { %v6248_v10 = vpop.f32.mrf.mxu0  ;;  %v6262_v18 = vpop.f32.mrf.mxu1 }
 0x5d3   : > { %7630 = vst [vmem:[#allocation11_spill] sm:$0xff] %v6248_v10  ;;  %7637 = vst [vmem:[#allocation39_spill] sm:$0xff] %v6262_v18  ;;  %v6312_v27 = vpop.permute.xlu1 %2800 }
 0x5d4   : > { %v6252_v61 = vpop.f32.mrf.mxu0  ;;  %v6266_v57 = vpop.f32.mrf.mxu1 }
 0x5d5   : > { %7632 = vst [vmem:[#allocation34_spill] sm:$0xff] %v6252_v61  ;;  %7639 = vst [vmem:[#allocation42_spill] sm:$0xff] %v6266_v57 }
 0x5d6   : > { %v6256_v4 = vpop.f32.mrf.mxu0  ;;  %v6270_v11 = vpop.f32.mrf.mxu1 }
 0x5d7   : > { %7634 = vst [vmem:[#allocation43_spill] sm:$0xff] %v6256_v4  ;;  %7641 = vst [vmem:[#allocation28_spill] sm:$0xff] %v6270_v11 }
 0x5d8   : > { %v6260_v43 = vpop.f32.mrf.mxu0  ;;  %v6274_v0 = vpop.f32.mrf.mxu1 }
 0x5d9   : > { %7636 = vst [vmem:[#allocation35_spill] sm:$0xff] %v6260_v43  ;;  %7643 = vst [vmem:[#allocation30_spill] sm:$0xff] %v6274_v0 }
 0x5da   : > { %v6264_v19 = vpop.f32.mrf.mxu0  ;;  %v6278_v36 = vpop.f32.mrf.mxu1 }
 0x5db   : > { %7638 = vst [vmem:[#allocation38_spill] sm:$0xff] %v6264_v19  ;;  %7645 = vst [vmem:[#allocation17_spill] sm:$0xff] %v6278_v36 }
 0x5dc   : > { %v6268_v59 = vpop.f32.mrf.mxu0  ;;  %v6282_v12 = vpop.f32.mrf.mxu1 }
 0x5dd   : > { %7640 = vst [vmem:[#allocation57_spill] sm:$0xff] %v6268_v59  ;;  %7647 = vst [vmem:[#allocation20_spill] sm:$0xff] %v6282_v12 }
 0x5de   : > { %v6272_v20 = vpop.f32.mrf.mxu0  ;;  %v6286_v22 = vpop.f32.mrf.mxu1 }
 0x5df   : > { %7642 = vst [vmem:[#allocation40_spill] sm:$0xff] %v6272_v20  ;;  %7649 = vst [vmem:[#allocation51_spill] sm:$0xff] %v6286_v22 }
 0x5e0   : > { %v6276_v8 = vpop.f32.mrf.mxu0  ;;  %v6290_v56 = vpop.f32.mrf.mxu1 }
 0x5e1   : > { %7644 = vst [vmem:[#allocation32_spill] sm:$0xff] %v6276_v8  ;;  %7651 = vst [vmem:[#allocation49_spill] sm:$0xff] %v6290_v56  ;;  %v6318_v8 = vpop.permute.xlu1 %2790 }
 0x5e2   : > { %v6280_v54 = vpop.f32.mrf.mxu0  ;;  %v6296_v1 = vpop.f32.mrf.mxu1 }
 0x5e3   : > { %7646 = vst [vmem:[#allocation25_spill] sm:$0xff] %v6280_v54  ;;  %7653 = vst [vmem:[#allocation31_spill] sm:$0xff] %v6296_v1 }
 0x5e4   : > { %v6284_v53 = vpop.f32.mrf.mxu0  ;;  %v6302_v23 = vpop.f32.mrf.mxu1 }
 0x5e5   : > { %7648 = vst [vmem:[#allocation21_spill] sm:$0xff] %v6284_v53  ;;  %7655 = vst [vmem:[#allocation33_spill] sm:$0xff] %v6302_v23  ;;  %v6333_v61 = vpop.permute.xlu1 %2780 }
 0x5e6   : > { %v6288_v34 = vpop.f32.mrf.mxu0  ;;  %v6308_v22 = vpop.f32.mrf.mxu1 }
 0x5e7   : > { %7650 = vst [vmem:[#allocation55_spill] sm:$0xff] %v6288_v34  ;;  %7657 = vst [vmem:[#allocation56_spill] sm:$0xff] %v6308_v22  ;;  %v6310_v34 = vpop.permute.xlu0 %2785 }
 0x5e8   : > { %v6292_v42 = vpop.f32.mrf.mxu0 }
 0x5e9   : > { %7652 = vst [vmem:[#allocation53_spill] sm:$0xff] %v6292_v42 }
 0x5ea   : > { %v6298_v52 = vpop.f32.mrf.mxu0 }
 0x5eb   : > { %7654 = vst [vmem:[#allocation41_spill] sm:$0xff] %v6298_v52  ;;  %v6316_v54 = vpop.permute.xlu0 %2775 }
 0x5ec   : > { %v6304_v28 = vpop.f32.mrf.mxu0 }
 0x5ed   : > { %7656 = vst [vmem:[#allocation37_spill] sm:$0xff] %v6304_v28 }
 0x63c   : > { %v2507_v18 = vpop.f32.mrf.mxu0 }
 0x63d   : > { %v2508_v23 = vadd.f32 %v2507_v18, %v6176_v16 }
 0x63e   : > { %v2509_v56 = vpop.f32.mrf.mxu0 }
 0x63f   : > { %v2580_v42 = vpop.f32.mrf.mxu1  ;;  %v2510_v12 = vadd.f32 %v2509_v56, %v6180_v33  ;;  %v6324_v11 = vadd.f32 %v6316_v54, %v2508_v23 }
 0x640   : > { %v2511_v1 = vpop.f32.mrf.mxu0  ;;  %v2581_v33 = vadd.f32 %v2580_v42, %v6178_v26 }
 0x641   : > { %v2582_v53 = vpop.f32.mrf.mxu1  ;;  %v6321_v0 = vadd.f32 %v6316_v54, %v2510_v12  ;;  %7659 = vst [vmem:[#allocation24_spill] sm:$0xff] %v6324_v11  ;;  %v2512_v57 = vadd.f32 %v2511_v1, %v6184_v24  ;;  %v2949_v12 = vmul.f32 %v6324_v11, %v6324_v11 }
 0x642   : > { %v2513_v52 = vpop.f32.mrf.mxu0  ;;  %v2583_v26 = vadd.f32 %v2582_v53, %v6182_v14 }
 0x643   : > { %v2584_v43 = vpop.f32.mrf.mxu1  ;;  %7658 = vst [vmem:[#allocation54_spill] sm:$0xff] %v6321_v0  ;;  %v2514_v56 = vadd.f32 %v2513_v52, %v6188_v9  ;;  %v2950_v4 = vmul.f32 %v6321_v0, %v6321_v0  ;;  %v2877_v37 = vadd.f32 %v6321_v0, %v6324_v11  ;;  %v6339_v9 = vadd.f32 %v6316_v54, %v2581_v33 }
 0x644   : > { %v2517_v28 = vpop.f32.mrf.mxu0  ;;  %v2585_v10 = vadd.f32 %v2584_v43, %v6186_v21  ;;  %v6348_v32 = vadd.f32 %v6333_v61, %v2512_v57  ;;  %v6352_v33 = vadd.f32 %v6316_v54, %v2583_v26 }
 0x645   : > { %v2586_v36 = vpop.f32.mrf.mxu1  ;;  %7660 = vst [vmem:[#allocation29_spill] sm:$0xff] %v6339_v9  ;;  %v6342_v42 = vadd.f32 %v6333_v61, %v2514_v56  ;;  %v3013_v19 = vadd.f32 %v2950_v4, %v2949_v12  ;;  %v2518_v14 = vadd.f32 %v2517_v28, %v6192_v13  ;;  %v2878_v56 = vadd.f32 %v2877_v37, %v6339_v9 }
 0x646   : > { %v2519_v22 = vpop.f32.mrf.mxu0  ;;  %v2587_v47 = vadd.f32 %v2586_v36, %v6190_v55  ;;  %7662 = vst [vmem:[#allocation27_spill] sm:$0xff] %v6348_v32  ;;  %7663 = vst [vmem:[#allocation14_spill] sm:$0xff] %v6352_v33  ;;  %v6368_v37 = vadd.f32 %v6333_v61, %v2585_v10 }
 0x647   : > { %v2590_v62 = vpop.f32.mrf.mxu1  ;;  %7661 = vst [vmem:[#allocation26_spill] sm:$0xff] %v6342_v42  ;;  %v2520_v24 = vadd.f32 %v2519_v22, %v6196_v49  ;;  %v2951_v49 = vmul.f32 %v6339_v9, %v6339_v9  ;;  %v2886_v21 = vadd.f32 %v6342_v42, %v6348_v32  ;;  %v2958_v55 = vmul.f32 %v6342_v42, %v6342_v42 }
 0x648   : > { %v2521_v20 = vpop.f32.mrf.mxu0  ;;  %7665 = vst [vmem:[#allocation13_spill] sm:$0xff] %v6368_v37  ;;  %v6371_v36 = vadd.f32 %v6333_v61, %v2587_v47  ;;  %v2957_v22 = vmul.f32 %v6348_v32, %v6348_v32  ;;  %v6376_v26 = vadd.f32 %v6310_v34, %v2518_v14  ;;  %v2952_v47 = vmul.f32 %v6352_v33, %v6352_v33 }
 0x649   : > { %v2592_v16 = vpop.f32.mrf.mxu1  ;;  %v6364_v43 = vadd.f32 %v6310_v34, %v2520_v24  ;;  %v3014_v57 = vadd.f32 %v3013_v19, %v2951_v49  ;;  %v2591_v24 = vadd.f32 %v2590_v62, %v6194_v38  ;;  %v6382_v19 = vadd.f32 %v2878_v56, %v6352_v33 }
 0x64a   : > { %v2523_v18 = vpop.f32.mrf.mxu0  ;;  %7666 = vst [vmem:[#allocation23_spill] sm:$0xff] %v6371_v36  ;;  %7667 = vst [vmem:[#allocation16_spill] sm:$0xff] %v6376_v26  ;;  %v2593_v9 = vadd.f32 %v2592_v16, %v6198_v3  ;;  %v2887_v10 = vadd.f32 %v2886_v21, %v6368_v37  ;;  %v3022_v32 = vadd.f32 %v2958_v55, %v2957_v22 }
 0x64b   : > { %v2594_v59 = vpop.f32.mrf.mxu1  ;;  %7664 = vst [vmem:[#allocation22_spill] sm:$0xff] %v6364_v43  ;;  %v2524_v13 = vadd.f32 %v2523_v18, %v6204_v5  ;;  %v2522_v5 = vadd.f32 %v2521_v20, %v6200_v25  ;;  %v2895_v14 = vadd.f32 %v6364_v43, %v6376_v26  ;;  %v6395_v25 = vadd.f32 %v3014_v57, %v2952_v47 }
 0x64c   : > { %v2527_v23 = vpop.f32.mrf.mxu0  ;;  %v2595_v38 = vadd.f32 %v2594_v59, %v6202_v45  ;;  %v2959_v62 = vmul.f32 %v6368_v37, %v6368_v37  ;;  %v6401_v20 = vmul.f32 %v6371_v36, %v6371_v36  ;;  %v2966_v16 = vmul.f32 %v6364_v43, %v6364_v43 }
 0x64d   : > { %v2596_v52 = vpop.f32.mrf.mxu1  ;;  %v6393_v3 = vadd.f32 %v6318_v8, %v2524_v13  ;;  %v6406_v55 = vadd.f32 %v6310_v34, %v2591_v24  ;;  %v6409_v45 = vadd.f32 %v6310_v34, %v2593_v9  ;;  %v6412_v59 = vadd.f32 %v6318_v8, %v2522_v5 }
 0x64e   : > { %v2529_v1 = vpop.f32.mrf.mxu0  ;;  %v2597_v13 = vadd.f32 %v2596_v52, %v6206_v63  ;;  %v6416_v57 = vadd.f32 %v2887_v10, %v6371_v36  ;;  %v2965_v22 = vmul.f32 %v6376_v26, %v6376_v26  ;;  %v2528_v47 = vadd.f32 %v2527_v23, %v6208_v41 }
 0x64f   : > { %v2600_v11 = vpop.f32.mrf.mxu1  ;;  %7668 = vst [vmem:[#allocation15_spill] sm:$0xff] %v6393_v3  ;;  %7669 = vst [vmem:[#allocation18_spill] sm:$0xff] %v6406_v55  ;;  %v2530_v37 = vadd.f32 %v2529_v1, %v6212_v44  ;;  %v6422_v33 = vadd.f32 %v3022_v32, %v2959_v62  ;;  %v2896_v9 = vadd.f32 %v2895_v14, %v6406_v55 }
 0x650   : > { %v2531_v53 = vpop.f32.mrf.mxu0  ;;  %7670 = vst [vmem:[#allocation19_spill] sm:$0xff] %v6409_v45  ;;  %7671 = vst [vmem:[#allocation46_spill] sm:$0xff] %v6412_v59  ;;  %v6426_v5 = vadd.f32 %v6318_v8, %v2595_v38  ;;  %v2904_v63 = vadd.f32 %v6393_v3, %v6412_v59  ;;  %v3031_v52 = vadd.f32 %v2966_v16, %v2965_v22 }
 0x651   : > { %v6359_v4 = vpop.f32.mrf.mxu1  ;;  %v2974_v10 = vmul.f32 %v6393_v3, %v6393_v3  ;;  %v2601_v41 = vadd.f32 %v2600_v11, %v6210_v2  ;;  %v2967_v32 = vmul.f32 %v6406_v55, %v6406_v55  ;;  %v6438_v23 = vmul.f32 %v6409_v45, %v6409_v45 }
 0x652   : > { %v2533_v28 = vpop.f32.mrf.mxu0  ;;  %7672 = vst [vmem:[#allocation6_spill] sm:$0xff] %v6426_v5  ;;  %v6441_v1 = vadd.f32 %v6318_v8, %v2597_v13  ;;  %v2973_v62 = vmul.f32 %v6412_v59, %v6412_v59  ;;  %v6447_v2 = vadd.f32 %v6300_v6, %v2528_v47  ;;  %v2532_v11 = vadd.f32 %v2531_v53, %v6216_v40 }
 0x653   : > { %v2604_v12 = vpop.f32.mrf.mxu1  ;;  %v2534_v44 = vadd.f32 %v2533_v28, %v6220_v51  ;;  %v6450_v51 = vadd.f32 %v6300_v6, %v2530_v37  ;;  %v6454_v16 = vadd.f32 %v2896_v9, %v6409_v45  ;;  %v2975_v13 = vmul.f32 %v6426_v5, %v6426_v5 }
 0x654   : > { %7673 = vst [vmem:[#allocation2_spill] sm:$0xff] %v6441_v1  ;;  %7674 = vst [vmem:[#allocation52_spill] sm:$0xff] %v6447_v2  ;;  %v6460_v22 = vadd.f32 %v3031_v52, %v2967_v32  ;;  %v3040_v47 = vadd.f32 %v2974_v10, %v2973_v62  ;;  %v6463_v36 = vadd.f32 %v6300_v6, %v2601_v41 }
 0x655   : > { %v6387_v18 = vpop.f32.mrf.mxu1  ;;  %v2537_v49 = vpop.f32.mrf.mxu0  ;;  %7675 = vst [vmem:[#allocation3_spill] sm:$0xff] %v6450_v51  ;;  %v6466_v37 = vadd.f32 %v6312_v27, %v2534_v44  ;;  %v2976_v40 = vmul.f32 %v6441_v1, %v6441_v1  ;;  %v2605_v53 = vadd.f32 %v2604_v12, %v6218_v30  ;;  %v2982_v52 = vmul.f32 %v6450_v51, %v6450_v51 }
 0x656   : > { %7676 = vst [vmem:[#allocation45_spill] sm:$0xff] %v6463_v36  ;;  %v6480_v10 = vadd.f32 %v6312_v27, %v2532_v11  ;;  %v2603_v30 = vadd.f32 %v6359_v4, %v6214_v58  ;;  %v2983_v62 = vmul.f32 %v6463_v36, %v6463_v36  ;;  %v2913_v11 = vadd.f32 %v6450_v51, %v6447_v2  ;;  %v7695_v51 = vld [vmem:[#allocation8_spill] sm:$0xff] }
 0x657   : > { %v2610_v56 = vpop.f32.mrf.mxu1  ;;  %v2539_v21 = vpop.f32.mrf.mxu0  ;;  %7677 = vst [vmem:[#allocation4_spill] sm:$0xff] %v6466_v37  ;;  %v2607_v58 = vadd.f32 %v6387_v18, %v6222_v60 }
 0x658   : > { %v2540_v14 = vadd.f32 %v2539_v21, %v6228_v7  ;;  %v2905_v7 = vadd.f32 %v2904_v63, %v6426_v5  ;;  %v2538_v21 = vadd.f32 %v2537_v49, %v6224_v31  ;;  %v2981_v49 = vmul.f32 %v6447_v2, %v6447_v2  ;;  %7679 = vst [vmem:[#allocation5_spill] sm:$0xff] %v6480_v10 }
 0x659   : > { %v2612_v24 = vpop.f32.mrf.mxu1  ;;  %v2541_v42 = vpop.f32.mrf.mxu0  ;;  %v2611_v41 = vadd.f32 %v2610_v56, %v6226_v50  ;;  %v2990_v50 = vmul.f32 %v6466_v37, %v6466_v37  ;;  %v6499_v56 = vadd.f32 %v6312_v27, %v2605_v53  ;;  %v6515_v53 = vadd.f32 %v6300_v6, %v2603_v30 }
 0x65a   : > { %v6472_v9 = vadd.f32 %v6306_v17, %v2540_v14  ;;  %v6484_v44 = vadd.f32 %v2905_v7, %v6441_v1  ;;  %v2542_v12 = vadd.f32 %v2541_v42, %v6232_v46  ;;  %v3041_v14 = vadd.f32 %v3040_v47, %v2975_v13 }
 0x65b   : > { %v2614_v38 = vpop.f32.mrf.mxu1  ;;  %v2543_v28 = vpop.f32.mrf.mxu0  ;;  %7681 = vst [vmem:[#allocation58_spill] sm:$0xff] %v6499_v56  ;;  %v3049_v13 = vadd.f32 %v2982_v52, %v2981_v49  ;;  %v2989_v7 = vmul.f32 %v6480_v10, %v6480_v10  ;;  %v2613_v47 = vadd.f32 %v2612_v24, %v6230_v35  ;;  %7684 = vst [vmem:[#allocation50_spill] sm:$0xff] %v6515_v53 }
 0x65c   : > { %7678 = vst [vmem:[#allocation48_spill] sm:$0xff] %v6472_v9  ;;  %v2544_v63 = vadd.f32 %v2543_v28, %v6236_v48  ;;  %v6489_v48 = vadd.f32 %v6306_v17, %v2538_v21  ;;  %v2998_v46 = vmul.f32 %v6472_v9, %v6472_v9  ;;  %v6511_v21 = vadd.f32 %v6306_v17, %v2611_v41 }
 0x65d   : > { %v2616_v31 = vpop.f32.mrf.mxu1  ;;  %v6520_v18 = vadd.f32 %v6294_v15, %v2542_v12  ;;  %v2914_v0 = vadd.f32 %v2913_v11, %v6463_v36  ;;  %v2922_v41 = vadd.f32 %v6466_v37, %v6480_v10  ;;  %v3058_v35 = vadd.f32 %v2990_v50, %v2989_v7 }
 0x65e   : > { %7680 = vst [vmem:[#allocation59_spill] sm:$0xff] %v6489_v48  ;;  %v6506_v42 = vadd.f32 %v6294_v15, %v2544_v63  ;;  %7683 = vst [vmem:[#allocation62_spill] sm:$0xff] %v6511_v21  ;;  %v2997_v60 = vmul.f32 %v6489_v48, %v6489_v48  ;;  %v2615_v63 = vadd.f32 %v2614_v38, %v6234_v39 }
 0x65f   : > { %7685 = vst [vmem:[#allocation47_spill] sm:$0xff] %v6520_v18  ;;  %v2931_v24 = vadd.f32 %v6472_v9, %v6489_v48  ;;  %v2991_v30 = vmul.f32 %v6499_v56, %v6499_v56  ;;  %v2617_v39 = vadd.f32 %v2616_v31, %v6238_v29  ;;  %v3050_v11 = vadd.f32 %v3049_v13, %v2983_v62  ;;  %v7689_v31 = vld [vmem:[#allocation7_spill] sm:$0xff] }
 0x660   : > { %7682 = vst [vmem:[#allocation63_spill] sm:$0xff] %v6506_v42  ;;  %v3067_v5 = vadd.f32 %v2998_v46, %v2997_v60  ;;  %v3006_v12 = vmul.f32 %v6506_v42, %v6506_v42  ;;  %v6538_v59 = vadd.f32 %v6312_v27, %v2607_v58  ;;  %v2999_v50 = vmul.f32 %v6511_v21, %v6511_v21  ;;  %v7713_v48 = vld [vmem:[#allocation35_spill] sm:$0xff] }
 0x661   : > { %v6543_v7 = vadd.f32 %v6306_v17, %v2613_v47  ;;  %v3005_v46 = vmul.f32 %v6520_v18, %v6520_v18  ;;  %v6548_v60 = vadd.f32 %v6294_v15, %v2615_v63  ;;  %v2940_v29 = vadd.f32 %v6506_v42, %v6520_v18 }
 0x662   : > { %v2653_v32 = vpop.f32.mrf.mxu0  ;;  %7686 = vst [vmem:[#allocation61_spill] sm:$0xff] %v6538_v59  ;;  %v2984_v26 = vmul.f32 %v6515_v53, %v6515_v53  ;;  %v2923_v47 = vadd.f32 %v2922_v41, %v6499_v56  ;;  %v3059_v1 = vadd.f32 %v3058_v35, %v2991_v30  ;;  %v2932_v45 = vadd.f32 %v2931_v24, %v6511_v21  ;;  %v7691_v35 = vld [vmem:[#allocation9_spill] sm:$0xff] }
 0x663   : > { %7687 = vst [vmem:[#allocation60_spill] sm:$0xff] %v6543_v7  ;;  %7688 = vst [vmem:[#allocation64_spill] sm:$0xff] %v6548_v60  ;;  %v2654_v62 = vadd.f32 %v2653_v32, %v7689_v31  ;;  %v6559_v3 = vadd.f32 %v3041_v14, %v2976_v40  ;;  %v3068_v63 = vadd.f32 %v3067_v5, %v2999_v50 }
 0x664   : > { %v2726_v4 = vpop.f32.mrf.mxu1  ;;  %v2655_v28 = vpop.f32.mrf.mxu0  ;;  %v3076_v43 = vadd.f32 %v3006_v12, %v3005_v46  ;;  %v6562_v36 = vadd.f32 %v6294_v15, %v2617_v39  ;;  %v2915_v31 = vadd.f32 %v2914_v0, %v6515_v53  ;;  %v6567_v2 = vadd.f32 %v3050_v11, %v2984_v26  ;;  %v7693_v11 = vld [vmem:[#allocation11_spill] sm:$0xff] }
 0x665   : > { %v2992_v41 = vmul.f32 %v6538_v59, %v6538_v59  ;;  %v2656_v30 = vadd.f32 %v2655_v28, %v7691_v35  ;;  %v3000_v40 = vmul.f32 %v6543_v7, %v6543_v7  ;;  %v3007_v5 = vmul.f32 %v6548_v60, %v6548_v60  ;;  %v7694_v35 = vld [vmem:[#allocation38_spill] sm:$0xff] }
 0x666   : > { %v6523_v49 = vpop.f32.mrf.mxu1  ;;  %v2657_v52 = vpop.f32.mrf.mxu0  ;;  %7690 = vst [vmem:[#allocation7_spill] sm:$0xff] %v6562_v36  ;;  %v2941_v14 = vadd.f32 %v2940_v29, %v6548_v60  ;;  %v6578_v24 = vadd.f32 %v6316_v54, %v2654_v62  ;;  %v6583_v26 = vadd.f32 %v2923_v47, %v6538_v59  ;;  %v6588_v28 = vadd.f32 %v2932_v45, %v6543_v7  ;;  %v7697_v45 = vld [vmem:[#allocation34_spill] sm:$0xff]  ;;  %v7698_v59 = vld [vmem:[#allocation57_spill] sm:$0xff] }
 0x667   : > { %v6585_v39 = vadd.f32 %v3059_v1, %v2992_v41  ;;  %v2658_v50 = vadd.f32 %v2657_v52, %v7693_v11  ;;  %v6591_v46 = vadd.f32 %v3068_v63, %v3000_v40  ;;  %v3008_v29 = vmul.f32 %v6562_v36, %v6562_v36 }
 0x668   : > { %v6535_v38 = vpop.f32.mrf.mxu1  ;;  %v2659_v55 = vpop.f32.mrf.mxu0  ;;  %7692 = vst [vmem:[#allocation9_spill] sm:$0xff] %v6578_v24  ;;  %v3077_v62 = vadd.f32 %v3076_v43, %v3007_v5  ;;  %v6597_v47 = vadd.f32 %v2726_v4, %v7695_v51  ;;  %v6600_v1 = vadd.f32 %v6316_v54, %v2656_v30  ;;  %v6605_v63 = vadd.f32 %v2941_v14, %v6562_v36  ;;  %v7699_v5 = vld [vmem:[#allocation42_spill] sm:$0xff] }
 0x669   : > { %v2660_v41 = vadd.f32 %v2659_v55, %v7697_v45  ;;  %v6609_v43 = vadd.f32 %v6382_v19, %v6578_v24  ;;  %v6616_v30 = vadd.f32 %v6333_v61, %v2658_v50  ;;  %v7701_v55 = vld [vmem:[#allocation43_spill] sm:$0xff]  ;;  %v6627_v19 = vmul.f32 %v6578_v24, %v6578_v24 }
 0x66a   : > { %v6553_v13 = vpop.f32.mrf.mxu1  ;;  %v2663_v58 = vpop.f32.mrf.mxu0  ;;  %7696 = vst [vmem:[#allocation11_spill] sm:$0xff] %v6600_v1 }
 0x66b   : > { %7700 = vst [vmem:[#allocation38_spill] sm:$0xff] %v6616_v30  ;;  %v2664_v11 = vadd.f32 %v2663_v58, %v7701_v55  ;;  %v6634_v58 = vmul.f32 %v6600_v1, %v6600_v1 }
 0x66c   : > { %v6564_v10 = vpop.f32.mrf.mxu1  ;;  %v2665_v32 = vpop.f32.mrf.mxu0 }
 0x66d   : > { %v2666_v36 = vadd.f32 %v2665_v32, %v7713_v48  ;;  %v7718_v48 = vld [vmem:[#allocation44_spill] sm:$0xff] }
 0x66e   : > { %v6580_v12 = vpop.f32.mrf.mxu1  ;;  %v2667_v0 = vpop.f32.mrf.mxu0  ;;  %v2737_v32 = vadd.f32 %v6564_v10, %v7718_v48 }
 0x66f   : > { %v2668_v56 = vadd.f32 %v2667_v0, %v7694_v35  ;;  %v6623_v35 = vadd.f32 %v3077_v62, %v3008_v29  ;;  %v6641_v29 = vadd.f32 %v6333_v61, %v2660_v41  ;;  %v6657_v41 = vadd.f32 %v6310_v34, %v2664_v11 }
 0x670   : > { %v2740_v53 = vpop.f32.mrf.mxu1  ;;  %v2669_v37 = vpop.f32.mrf.mxu0 }
 0x671   : > { %v2670_v52 = vadd.f32 %v2669_v37, %v7698_v59  ;;  %v6612_v40 = vadd.f32 %v6318_v8, %v2668_v56  ;;  %v2741_v51 = vadd.f32 %v2740_v53, %v7699_v5  ;;  %v7702_v37 = vld [vmem:[#allocation40_spill] sm:$0xff]  ;;  %7705 = vst [vmem:[#allocation8_spill] sm:$0xff] %v6641_v29 }
 0x672   : > { %v2742_v4 = vpop.f32.mrf.mxu1  ;;  %v2673_v0 = vpop.f32.mrf.mxu0  ;;  %v7703_v53 = vld [vmem:[#allocation28_spill] sm:$0xff] }
 0x673   : > { %v6620_v59 = vadd.f32 %v6318_v8, %v2670_v52  ;;  %v2674_v14 = vadd.f32 %v2673_v0, %v7702_v37  ;;  %v2907_v56 = vadd.f32 %v6484_v44, %v6612_v40  ;;  %v2743_v45 = vadd.f32 %v2742_v4, %v7703_v53  ;;  %v7704_v52 = vld [vmem:[#allocation12_spill] sm:$0xff]  ;;  %v7707_v4 = vld [vmem:[#allocation30_spill] sm:$0xff] }
 0x674   : > { %v2746_v50 = vpop.f32.mrf.mxu1  ;;  %v2675_v5 = vpop.f32.mrf.mxu0  ;;  %v6638_v0 = vadd.f32 %v6535_v38, %v7704_v52  ;;  %v6647_v44 = vadd.f32 %v6318_v8, %v2741_v51  ;;  %v7708_v37 = vld [vmem:[#allocation32_spill] sm:$0xff]  ;;  %v6654_v38 = vadd.f32 %v6416_v57, %v6616_v30  ;;  %v7709_v52 = vld [vmem:[#allocation17_spill] sm:$0xff] }
 0x675   : > { %v6644_v62 = vadd.f32 %v6300_v6, %v2674_v14  ;;  %v2747_v55 = vadd.f32 %v2746_v50, %v7707_v4  ;;  %v2676_v53 = vadd.f32 %v2675_v5, %v7708_v37  ;;  %v2908_v21 = vadd.f32 %v2907_v56, %v6620_v59  ;;  %v7712_v5 = vld [vmem:[#allocation25_spill] sm:$0xff] }
 0x676   : > { %v2748_v24 = vpop.f32.mrf.mxu1  ;;  %v2677_v60 = vpop.f32.mrf.mxu0  ;;  %v6662_v18 = vadd.f32 %v6318_v8, %v2743_v45 }
 0x677   : > { %7706 = vst [vmem:[#allocation34_spill] sm:$0xff] %v6644_v62  ;;  %v2916_v14 = vadd.f32 %v2915_v31, %v6644_v62  ;;  %v2749_v51 = vadd.f32 %v2748_v24, %v7709_v52  ;;  %v6665_v50 = vadd.f32 %v6300_v6, %v2676_v53  ;;  %v2678_v4 = vadd.f32 %v2677_v60, %v7712_v5  ;;  %v7714_v31 = vld [vmem:[#allocation20_spill] sm:$0xff]  ;;  %v7715_v24 = vld [vmem:[#allocation21_spill] sm:$0xff] }
 0x678   : > { %7710 = vst [vmem:[#allocation57_spill] sm:$0xff] %v6662_v18  ;;  %v2750_v56 = vpop.f32.mrf.mxu1  ;;  %v2679_v37 = vpop.f32.mrf.mxu0  ;;  %v2909_v57 = vadd.f32 %v2908_v21, %v6647_v44  ;;  %v2985_v11 = vmul.f32 %v6644_v62, %v6644_v62  ;;  %v6675_v8 = vadd.f32 %v6300_v6, %v2747_v55  ;;  %v7721_v55 = vld [vmem:[#allocation55_spill] sm:$0xff] }
 0x679   : > { %7711 = vst [vmem:[#allocation42_spill] sm:$0xff] %v6665_v50  ;;  %v2751_v7 = vadd.f32 %v2750_v56, %v7714_v31  ;;  %v2680_v52 = vadd.f32 %v2679_v37, %v7715_v24  ;;  %v6678_v45 = vadd.f32 %v6312_v27, %v2678_v4  ;;  %v2917_v21 = vadd.f32 %v2916_v14, %v6665_v50 }
 0x67a   : > { %7716 = vst [vmem:[#allocation43_spill] sm:$0xff] %v6675_v8  ;;  %v2752_v60 = vpop.f32.mrf.mxu1  ;;  %v2683_v53 = vpop.f32.mrf.mxu0  ;;  %v2910_v5 = vadd.f32 %v2909_v57, %v6662_v18  ;;  %v6685_v62 = vadd.f32 %v6300_v6, %v2749_v51  ;;  %v2986_v4 = vmul.f32 %v6665_v50, %v6665_v50  ;;  %v7722_v57 = vld [vmem:[#allocation51_spill] sm:$0xff]  ;;  %v2898_v6 = vadd.f32 %v6454_v16, %v6657_v41 }
 0x67b   : > { %7717 = vst [vmem:[#allocation40_spill] sm:$0xff] %v6678_v45  ;;  %v6688_v56 = vadd.f32 %v6312_v27, %v2680_v52  ;;  %v2684_v37 = vadd.f32 %v2683_v53, %v7721_v55  ;;  %v2925_v31 = vadd.f32 %v6583_v26, %v6678_v45  ;;  %v2753_v24 = vadd.f32 %v2752_v60, %v7722_v57  ;;  %v7723_v26 = vld [vmem:[#allocation53_spill] sm:$0xff] }
 0x67c   : > { %7719 = vst [vmem:[#allocation28_spill] sm:$0xff] %v6685_v62  ;;  %v2756_v14 = vpop.f32.mrf.mxu1  ;;  %2911 = vadd.xlane.f32.xlu1 %v2910_v5  ;;  %v2685_v42 = vpop.f32.mrf.mxu0  ;;  %v2918_v10 = vadd.f32 %v2917_v21, %v6675_v8  ;;  %v6700_v51 = vadd.f32 %v6310_v34, %v2666_v36  ;;  %v6703_v52 = vadd.f32 %v6312_v27, %v2751_v7 }
 0x67d   : > { %7720 = vst [vmem:[#allocation12_spill] sm:$0xff] %v6688_v56  ;;  %v6706_v53 = vadd.f32 %v6306_v17, %v2684_v37  ;;  %v2686_v48 = vadd.f32 %v2685_v42, %v7723_v26  ;;  %v3052_v21 = vadd.f32 %v6567_v2, %v2985_v11  ;;  %v2926_v57 = vadd.f32 %v2925_v31, %v6688_v56 }
 0x67e   : > { %v2758_v60 = vpop.f32.mrf.mxu1  ;;  %v2687_v55 = vpop.f32.mrf.mxu0  ;;  %v2919_v5 = vadd.f32 %v2918_v10, %v6685_v62  ;;  %v2993_v36 = vmul.f32 %v6678_v45, %v6678_v45  ;;  %v2994_v16 = vmul.f32 %v6688_v56, %v6688_v56  ;;  %v2987_v7 = vmul.f32 %v6675_v8, %v6675_v8  ;;  %v7724_v10 = vld [vmem:[#allocation41_spill] sm:$0xff] }
 0x67f   : > { %v2988_v42 = vmul.f32 %v6685_v62, %v6685_v62  ;;  %v6721_v37 = vadd.f32 %v6312_v27, %v2753_v24  ;;  %v2688_v26 = vadd.f32 %v2687_v55, %v7724_v10  ;;  %v3053_v31 = vadd.f32 %v3052_v21, %v2986_v4  ;;  %v7725_v8 = vld [vmem:[#allocation33_spill] sm:$0xff]  ;;  %v7728_v10 = vld [vmem:[#allocation56_spill] sm:$0xff] }
 0x680   : > { %v2760_v2 = vpop.f32.mrf.mxu1  ;;  %2920 = vadd.xlane.f32.xlu1 %v2919_v5  ;;  %v2689_v11 = vpop.f32.mrf.mxu0  ;;  %v2927_v45 = vadd.f32 %v2926_v57, %v6703_v52  ;;  %v2934_v56 = vadd.f32 %v6588_v28, %v6706_v53  ;;  %v6728_v50 = vadd.f32 %v6306_v17, %v2686_v48  ;;  %v7726_v62 = vld [vmem:[#allocation37_spill] sm:$0xff]  ;;  %v3001_v27 = vmul.f32 %v6706_v53, %v6706_v53 }
 0x681   : > { %v2761_v9 = vadd.f32 %v2760_v2, %v7725_v8  ;;  %v2690_v18 = vadd.f32 %v2689_v11, %v7726_v62  ;;  %v6735_v24 = vadd.f32 %v6294_v15, %v2688_v26  ;;  %v3054_v4 = vadd.f32 %v3053_v31, %v2987_v7  ;;  %v7727_v21 = vld [vmem:[#allocation49_spill] sm:$0xff]  ;;  %v7729_v11 = vld [vmem:[#allocation39_spill] sm:$0xff] }
 0x682   : > { %v2762_v55 = vpop.f32.mrf.mxu1  ;;  %v2928_v5 = vadd.f32 %v2927_v45, %v6721_v37  ;;  %v2757_v57 = vadd.f32 %v2756_v14, %v7727_v21  ;;  %v2899_v48 = vadd.f32 %v2898_v6, %v6700_v51  ;;  %v2890_v62 = vadd.f32 %v6654_v38, %v6641_v29 }
 0x683   : > { %v6740_v28 = vadd.f32 %v6294_v15, %v2690_v18  ;;  %v2943_v8 = vadd.f32 %v6605_v63, %v6735_v24  ;;  %v2763_v26 = vadd.f32 %v2762_v55, %v7728_v10  ;;  %v3055_v2 = vadd.f32 %v3054_v4, %v2988_v42  ;;  %v7730_v55 = vld [vmem:[#allocation31_spill] sm:$0xff] }
 0x684   : > { %2929 = vadd.xlane.f32.xlu1 %v2928_v5  ;;  %v3061_v7 = vadd.f32 %v6585_v39, %v2993_v36  ;;  %v3002_v45 = vmul.f32 %v6728_v50, %v6728_v50  ;;  %v6752_v18 = vadd.f32 %v6294_v15, %v2761_v9  ;;  %v2995_v14 = vmul.f32 %v6703_v52, %v6703_v52 }
 0x685   : > { %v2935_v38 = vadd.f32 %v2934_v56, %v6728_v50  ;;  %v3009_v63 = vmul.f32 %v6735_v24, %v6735_v24  ;;  %3056 = vadd.xlane.f32.xlu0 %v3055_v2  ;;  %v2944_v42 = vadd.f32 %v2943_v8, %v6740_v28  ;;  %v3070_v39 = vadd.f32 %v6591_v46, %v3001_v27 }
 0x686   : > { %v3062_v6 = vadd.f32 %v3061_v7, %v2994_v16  ;;  %v6762_v36 = vadd.f32 %v6310_v34, %v2737_v32  ;;  %v2739_v9 = vadd.f32 %v6580_v12, %v7729_v11  ;;  %v6767_v31 = vadd.f32 %v6306_v17, %v2757_v57 }
 0x687   : > { %v2759_v56 = vadd.f32 %v2758_v60, %v7730_v55  ;;  %v6771_v4 = vadd.f32 %v6294_v15, %v2763_v26  ;;  %v2996_v16 = vmul.f32 %v6721_v37, %v6721_v37  ;;  %v2945_v46 = vadd.f32 %v2944_v42, %v6752_v18  ;;  %v7732_v26 = vld [vmem:[#allocation36_spill] sm:$0xff] }
 0x688   : > { %v3063_v5 = vadd.f32 %v3062_v6, %v2995_v14  ;;  %v2977_v32 = vmul.f32 %v6612_v40, %v6612_v40  ;;  %v3010_v12 = vmul.f32 %v6740_v28, %v6740_v28  ;;  %v2936_v27 = vadd.f32 %v2935_v38, %v6767_v31 }
 0x689   : > { %v2900_v21 = vadd.f32 %v2899_v48, %v6762_v36  ;;  %v2946_v15 = vadd.f32 %v2945_v46, %v6771_v4  ;;  %v3071_v57 = vadd.f32 %v3070_v39, %v3002_v45  ;;  %v3079_v8 = vadd.f32 %v6623_v35, %v3009_v63 }
 0x68a   : > { %v3064_v60 = vadd.f32 %v3063_v5, %v2996_v16  ;;  %v6786_v10 = vadd.f32 %v6333_v61, %v6638_v0  ;;  %v2733_v2 = vadd.f32 %v6553_v13, %v7732_v26  ;;  %v6791_v7 = vadd.f32 %v6310_v34, %v2739_v9 }
 0x68b   : > { %v2881_v14 = vadd.f32 %v6609_v43, %v6600_v1  ;;  %v6796_v48 = vadd.f32 %v6306_v17, %v2759_v56  ;;  %2947 = vadd.xlane.f32.xlu1 %v2946_v15  ;;  %v3003_v35 = vmul.f32 %v6767_v31, %v6767_v31  ;;  %v3016_v0 = vadd.f32 %v6395_v25, %v6627_v19  ;;  %v7734_v19 = vld [vmem:[#allocation10_spill] sm:$0xff] }
 0x68c   : > { %7731 = vst [vmem:[#allocation30_spill] sm:$0xff] %v6786_v10  ;;  %3065 = vadd.xlane.f32.xlu0 %v3064_v60  ;;  %v2969_v13 = vmul.f32 %v6657_v41, %v6657_v41  ;;  %v2978_v34 = vmul.f32 %v6620_v59, %v6620_v59  ;;  %v2901_v45 = vadd.f32 %v2900_v21, %v6791_v7 }
 0x68d   : > { %v2891_v43 = vadd.f32 %v2890_v62, %v6786_v10  ;;  %v2937_v17 = vadd.f32 %v2936_v27, %v6796_v48  ;;  %v3072_v38 = vadd.f32 %v3071_v57, %v3003_v35  ;;  %v3080_v63 = vadd.f32 %v3079_v8, %v3010_v12 }
 0x68e   : > { %v3043_v6 = vadd.f32 %v6559_v3, %v2977_v32  ;;  %v3033_v42 = vadd.f32 %v6460_v22, %v6438_v23  ;;  %v6814_v25 = vadd.f32 %v6316_v54, %v6597_v47  ;;  %v2729_v39 = vadd.f32 %v6523_v49, %v7734_v19 }
 0x68f   : > { %v6819_v11 = vadd.f32 %v6333_v61, %v2733_v2  ;;  %v2961_v62 = vmul.f32 %v6616_v30, %v6616_v30  ;;  %v3004_v3 = vmul.f32 %v6796_v48, %v6796_v48  ;;  %2902 = vadd.xlane.f32.xlu1 %v2901_v45  ;;  %v3011_v23 = vmul.f32 %v6752_v18, %v6752_v18  ;;  %v7769_v30 = vld [vmem:[#allocation18_spill] sm:$0xff] }
 0x690   : > { %7733 = vst [vmem:[#allocation32_spill] sm:$0xff] %v6814_v25  ;;  %2938 = vadd.xlane.f32.xlu0 %v2937_v17  ;;  %v2970_v22 = vmul.f32 %v6700_v51, %v6700_v51  ;;  %v2882_v49 = vadd.f32 %v2881_v14, %v6814_v25  ;;  %v3017_v61 = vadd.f32 %v3016_v0, %v6634_v58 }
 0x691   : > { %7735 = vst [vmem:[#allocation17_spill] sm:$0xff] %v6819_v11  ;;  %v2892_v47 = vadd.f32 %v2891_v43, %v6819_v11  ;;  %v3073_v9 = vadd.f32 %v3072_v38, %v3004_v3  ;;  %v3081_v55 = vadd.f32 %v3080_v63, %v3011_v23  ;;  %v3044_v56 = vadd.f32 %v3043_v6, %v2978_v34  ;;  %v3093_v6 = vld [vmem:[%s7364_s9] sm:$0xff] }
 0x692   : > { %v3034_v16 = vadd.f32 %v3033_v42, %v2969_v13  ;;  %v6833_v5 = vadd.f32 %v6316_v54, %v2729_v39  ;;  %v2955_v46 = vmul.f32 %v6814_v25, %v6814_v25  ;;  %v3024_v32 = vadd.f32 %v6422_v33, %v6401_v20  ;;  %v7737_v33 = vld [vmem:[#allocation57_spill] sm:$0xff]  ;;  %4671 = vmatprep.mubr.msk.f32.mxu0 %vm1112_vm1, %v3093_v6  ;;  %v7768_v25 = vld [vmem:[#allocation46_spill] sm:$0xff] }
 0x693   : > { %v3012_v12 = vmul.f32 %v6771_v4, %v6771_v4  ;;  %2893 = vadd.xlane.f32.xlu1 %v2892_v47  ;;  %v2979_v58 = vmul.f32 %v6647_v44, %v6647_v44  ;;  %v2962_v27 = vmul.f32 %v6641_v29, %v6641_v29  ;;  %v2980_v20 = vmul.f32 %v7737_v33, %v7737_v33 }
 0x694   : > { %7736 = vst [vmem:[#allocation25_spill] sm:$0xff] %v6833_v5  ;;  %3074 = vadd.xlane.f32.xlu0 %v3073_v9  ;;  %v2883_v54 = vadd.f32 %v2882_v49, %v6833_v5  ;;  %v3018_v21 = vadd.f32 %v3017_v61, %v2955_v46  ;;  %v3035_v57 = vadd.f32 %v3034_v16, %v2970_v22  ;;  %v3094_v16 = vld [vmem:[%s7364_s9 + $0x8] sm:$0xff]  ;;  %v3095_v46 = vld [vmem:[%s7364_s9 + $0x10] sm:$0xff] }
 0x695   : > { %v3082_v60 = vadd.f32 %v3081_v55, %v3012_v12  ;;  %v3045_v15 = vadd.f32 %v3044_v56, %v2979_v58  ;;  %v3025_v8 = vadd.f32 %v3024_v32, %v2961_v62  ;;  %v2971_v26 = vmul.f32 %v6762_v36, %v6762_v36  ;;  %4693 = vmatprep.mubr.msk.f32.mxu1 %vm1112_vm1, %v3093_v6  ;;  %v3096_v12 = vld [vmem:[%s7364_s9 + $0x18] sm:$0xff] }
 0x696   : > { %v2956_v2 = vmul.f32 %v6833_v5, %v6833_v5  ;;  %v2972_v34 = vmul.f32 %v6791_v7, %v6791_v7  ;;  %v2963_v45 = vmul.f32 %v6786_v10, %v6786_v10  ;;  %v2964_v38 = vmul.f32 %v6819_v11, %v6819_v11  ;;  %v7767_v10 = vld [vmem:[#allocation16_spill] sm:$0xff] }
 0x697   : > { %2884 = vadd.xlane.f32.xlu1 %v2883_v54  ;;  %v3046_v14 = vadd.f32 %v3045_v15, %v2980_v20  ;;  %v3036_v35 = vadd.f32 %v3035_v57, %v2971_v26  ;;  %v3026_v13 = vadd.f32 %v3025_v8, %v2962_v27  ;;  %v3085_v54 = vld [vmem:[%s7363_s8] sm:$0xff] }
 0x698   : > { %3083 = vadd.xlane.f32.xlu0 %v3082_v60  ;;  %v3019_v0 = vadd.f32 %v3018_v21, %v2956_v2 }
 0x699   : > { %v3037_v43 = vadd.f32 %v3036_v35, %v2972_v34  ;;  %v3027_v17 = vadd.f32 %v3026_v13, %v2963_v45 }
 0x69b   : > { %3020 = vadd.xlane.f32.xlu1 %v3019_v0  ;;  %v3028_v63 = vadd.f32 %v3027_v17, %v2964_v38  ;;  %v3086_v17 = vld [vmem:[%s7363_s8 + $0x8] sm:$0xff] }
 0x69c   : > { %3047 = vadd.xlane.f32.xlu0 %v3046_v14 }
 0x6a0   : > { %3038 = vadd.xlane.f32.xlu0 %v3037_v43 }
 0x6a4   : > { %3029 = vadd.xlane.f32.xlu0 %v3028_v63 }
 0x705   : > { %v2912_v42 = vpop.xlane.xlu1 %2911 }
 0x709   : > { %v2921_v19 = vpop.xlane.xlu1 %2920 }
 0x70d   : > { %v2930_v62 = vpop.xlane.xlu1 %2929 }
 0x70e   : > { %v3057_v39 = vpop.xlane.xlu0 %3056 }
 0x714   : > { %v2948_v23 = vpop.xlane.xlu1 %2947 }
 0x715   : > { %v3066_v3 = vpop.xlane.xlu0 %3065  ;;  %4655 = vmatprep.subr.mxu0 %v2948_v23 }
 0x716   : > { %4656 = vmatpush3.msra.mxu0 %v2948_v23 }
 0x718   : > { %v2903_v47 = vpop.xlane.xlu1 %2902 }
 0x719   : > { %v2939_v22 = vpop.xlane.xlu0 %2938 }
 0x71a   : > { %4657 = vmatprep.subr.mxu0 %v2939_v22 }
 0x71b   : > { %4658 = vmatpush3.msra.mxu0 %v2939_v22  ;;  %v3088_v22 = vld [vmem:[%s7363_s8 + $0x18] sm:$0xff] }
 0x71c   : > { %4659 = vmatprep.subr.mxu0 %v2930_v62  ;;  %v2894_v61 = vpop.xlane.xlu1 %2893 }
 0x71d   : > { %v3075_v49 = vpop.xlane.xlu0 %3074  ;;  %4660 = vmatpush3.msra.mxu0 %v2930_v62 }
 0x71e   : > { %4661 = vmatprep.subr.mxu0 %v2921_v19 }
 0x71f   : > { %4662 = vmatpush3.msra.mxu0 %v2921_v19 }
 0x720   : > { %4663 = vmatprep.subr.mxu0 %v2912_v42  ;;  %v2885_v56 = vpop.xlane.xlu1 %2884 }
 0x721   : > { %v3084_v9 = vpop.xlane.xlu0 %3083  ;;  %4664 = vmatpush3.msra.mxu0 %v2912_v42  ;;  %v3087_v42 = vld [vmem:[%s7363_s8 + $0x10] sm:$0xff] }
 0x722   : > { %4677 = vmatprep.subr.mxu1 %v3084_v9  ;;  %4665 = vmatprep.subr.mxu0 %v2903_v47 }
 0x723   : > { %4678 = vmatpush3.msra.mxu1 %v3084_v9  ;;  %4666 = vmatpush3.msra.mxu0 %v2903_v47  ;;  %v3089_v9 = vld [vmem:[%s7363_s8 + $0x20] sm:$0xff] }
 0x724   : > { %4679 = vmatprep.subr.mxu1 %v3075_v49  ;;  %4667 = vmatprep.subr.mxu0 %v2894_v61  ;;  %v3021_v27 = vpop.xlane.xlu1 %3020 }
 0x725   : > { %4680 = vmatpush3.msra.mxu1 %v3075_v49  ;;  %v3048_v55 = vpop.xlane.xlu0 %3047  ;;  %4668 = vmatpush3.msra.mxu0 %v2894_v61 }
 0x726   : > { %4681 = vmatprep.subr.mxu1 %v3066_v3  ;;  %4669 = vmatprep.subr.mxu0 %v2885_v56 }
 0x727   : > { %4682 = vmatpush3.msra.mxu1 %v3066_v3  ;;  %4670 = vmatpush3.msra.mxu0 %v2885_v56 }
 0x728   : > { %4683 = vmatprep.subr.mxu1 %v3057_v39  ;;  %4672 = vmatmul.mubr.msk.f32.vlgmr.msra.gmra.mxu0 %vm1112_vm1, %v3094_v16 }
 0x729   : > { %4684 = vmatpush3.msra.mxu1 %v3057_v39  ;;  %v3039_v32 = vpop.xlane.xlu0 %3038  ;;  %4674 = vmatprep.mubr.msk.f32.mxu0 %vm1112_vm1, %v3095_v46 }
 0x72a   : > { %4685 = vmatprep.subr.mxu1 %v3048_v55 }
 0x72b   : > { %4686 = vmatpush3.msra.mxu1 %v3048_v55 }
 0x72c   : > { %4687 = vmatprep.subr.mxu1 %v3039_v32  ;;  %4675 = vmatmul.mubr.msk.f32.gmra.mxu0 %vm1112_vm1, %v3096_v12 }
 0x72d   : > { %4688 = vmatpush3.msra.mxu1 %v3039_v32  ;;  %v3030_v58 = vpop.xlane.xlu0 %3029  ;;  %4707 = vmatprep.mubr.msk.f32.mxu0 %vm587_vm0, %v3085_v54 }
 0x72e   : > { %4689 = vmatprep.subr.mxu1 %v3030_v58 }
 0x72f   : > { %4690 = vmatpush3.msra.mxu1 %v3030_v58  ;;  %v3091_v58 = vld [vmem:[%s7363_s8 + $0x30] sm:$0xff] }
 0x730   : > { %4691 = vmatprep.subr.mxu1 %v3021_v27 }
 0x731   : > { %4692 = vmatpush3.msra.mxu1 %v3021_v27 }
 0x732   : > { %4694 = vmatmul.mubr.msk.f32.vlgmr.msra.gmra.mxu1 %vm1112_vm1, %v3094_v16 }
 0x733   : > { %4696 = vmatprep.mubr.msk.f32.mxu1 %vm1112_vm1, %v3095_v46  ;;  %v3090_v46 = vld [vmem:[%s7363_s8 + $0x28] sm:$0xff] }
 0x736   : > { %4697 = vmatmul.mubr.msk.f32.gmra.mxu1 %vm1112_vm1, %v3096_v12 }
 0x737   : > { %4727 = vmatprep.mubr.msk.f32.mxu1 %vm587_vm0, %v3085_v54  ;;  %v3092_v54 = vld [vmem:[%s7363_s8 + $0x38] sm:$0xff] }
 0x7e8   : > { %v4673_v21 = vpop.f32.mrf.mxu0 }
 0x7e9   : > { %v3280_v20 = vmul.f32 0.00048828125, %v4673_v21  ;;  %v7738_v21 = vmov 0  }
 0x7ea   : > { %v3175_v60 = vpop.f32.mrf.mxu0 }
 0x7eb   : > { %v3279_v14 = vmul.f32 0.00048828125, %v3175_v60  ;;  %v3288_v0 = vmul.f32 %v3280_v20, %v3280_v20 }
 0x7ec   : > { %v4676_v15 = vpop.f32.mrf.mxu0 }
 0x7ed   : > { %v3282_v57 = vmul.f32 0.00048828125, %v4676_v15  ;;  %v3287_v63 = vmul.f32 %v3279_v14, %v3279_v14 }
 0x7ee   : > { %v3185_v8 = vpop.f32.mrf.mxu0 }
 0x7ef   : > { %v3281_v26 = vmul.f32 0.00048828125, %v3185_v8  ;;  %4699 = vmatprep.subr.mxu0 %v3282_v57  ;;  %v3290_v45 = vmul.f32 %v3282_v57, %v3282_v57 }
 0x7f0   : > { %4700 = vmatpush3.msra.mxu0 %v3282_v57 }
 0x7f1   : > { %4701 = vmatprep.subr.mxu0 %v3281_v26  ;;  %v3289_v23 = vmul.f32 %v3281_v26, %v3281_v26 }
 0x7f2   : > { %v4695_v2 = vpop.f32.mrf.mxu1  ;;  %4702 = vmatpush3.msra.mxu0 %v3281_v26 }
 0x7f3   : > { %v3284_v35 = vmul.f32 0.00048828125, %v4695_v2  ;;  %4703 = vmatprep.subr.mxu0 %v3280_v20 }
 0x7f4   : > { %v3260_v13 = vpop.f32.mrf.mxu1  ;;  %4704 = vmatpush3.msra.mxu0 %v3280_v20 }
 0x7f5   : > { %v3283_v34 = vmul.f32 0.00048828125, %v3260_v13  ;;  %4705 = vmatprep.subr.mxu0 %v3279_v14  ;;  %v3292_v38 = vsub.f32 %v3284_v35, %v3288_v0 }
 0x7f6   : > { %v4698_v43 = vpop.f32.mrf.mxu1  ;;  %4706 = vmatpush3.msra.mxu0 %v3279_v14 }
 0x7f7   : > { %v3286_v6 = vmul.f32 0.00048828125, %v4698_v43  ;;  %4708 = vmatmul.mubr.msk.f32.vlgmr.msra.gmra.mxu0 %vm587_vm0, %v3086_v17  ;;  %v3291_v39 = vsub.f32 %v3283_v34, %v3287_v63  ;;  %v3296_v47 = vmax.f32 %v3292_v38, 0.0  ;;  %v6931_v43 = vld [vmem:[%s7362_s7 + $0x38] sm:$0xff]  ;;  %v6937_v63 = vld [vmem:[%s7362_s7 + $0x30] sm:$0xff] }
 0x7f8   : > { %v3270_v19 = vpop.f32.mrf.mxu1  ;;  %4710 = vmatprep.mubr.msk.f32.mxu0 %vm587_vm0, %v3087_v42 }
 0x7f9   : > { %v3294_v62 = vsub.f32 %v3286_v6, %v3290_v45  ;;  %v3285_v3 = vmul.f32 0.00048828125, %v3270_v19  ;;  %v3295_v55 = vmax.f32 %v3291_v39, 0.0  ;;  %v3300_v32 = vadd.f32 1e-05, %v3296_v47  ;;  %v6945_v39 = vld [vmem:[%s7362_s7 + $0x20] sm:$0xff] }
 0x7fb   : > { %v3298_v49 = vmax.f32 %v3294_v62, 0.0  ;;  %v3293_v61 = vsub.f32 %v3285_v3, %v3289_v23  ;;  %4711 = vmatmul.mubr.msk.f32.gmra.mxu0 %vm587_vm0, %v3088_v22  ;;  %v3299_v27 = vadd.f32 1e-05, %v3295_v55  ;;  %v6951_v3 = vld [vmem:[%s7362_s7 + $0x28] sm:$0xff] }
 0x7fc   : > { %4713 = vmatprep.mubr.msk.f32.mxu0 %vm587_vm0, %v3089_v9 }
 0x7fd   : > { %v3302_v56 = vadd.f32 1e-05, %v3298_v49  ;;  %v3297_v16 = vmax.f32 %v3293_v61, 0.0  ;;  %v4815_v49 = vld [vmem:[%s7362_s7 + $0x10] sm:$0xff] }
 0x7ff   : > { %4795 = vrsqrt.f32 %v3302_v56  ;;  %v3301_v12 = vadd.f32 1e-05, %v3297_v16  ;;  %4714 = vmatmul.mubr.msk.f32.gmra.mxu0 %vm587_vm0, %v3090_v46 }
 0x800   : > { %4716 = vmatprep.mubr.msk.f32.mxu0 %vm587_vm0, %v3091_v58 }
 0x801   : > { %4797 = vrsqrt.f32 %v3301_v12  ;;  %v6976_v12 = vld [vmem:[%s7362_s7 + $0x8] sm:$0xff] }
 0x802   : > { %4799 = vrsqrt.f32 %v3300_v32 }
 0x803   : > { %4717 = vmatmul.mubr.msk.f32.gmra.mxu0 %vm587_vm0, %v3092_v54  ;;  %4801 = vrsqrt.f32 %v3299_v27 }
 0x804   : > { %4127 = vmatprep.mubr.bf16.mxu0 %v7738_v21 }
 0x80c   : > { %v4796_v60 = vpop.eup %4795 }
 0x80d   : > { %4719 = vmatprep.subr.mxu1 %v4796_v60 }
 0x80e   : > { %v4798_v15 = vpop.eup %4797  ;;  %4720 = vmatpush3.msra.mxu1 %v4796_v60 }
 0x80f   : > { %4721 = vmatprep.subr.mxu1 %v4798_v15  ;;  %v4800_v57 = vpop.eup %4799 }
 0x810   : > { %4722 = vmatpush3.msra.mxu1 %v4798_v15  ;;  %v4802_v8 = vpop.eup %4801 }
 0x811   : > { %4723 = vmatprep.subr.mxu1 %v4800_v57 }
 0x812   : > { %4724 = vmatpush3.msra.mxu1 %v4800_v57 }
 0x813   : > { %4725 = vmatprep.subr.mxu1 %v4802_v8 }
 0x814   : > { %4726 = vmatpush3.msra.mxu1 %v4802_v8 }
 0x815   : > { %4728 = vmatmul.mubr.msk.f32.vlgmr.msra.gmra.mxu1 %vm587_vm0, %v3086_v17 }
 0x816   : > { %4730 = vmatprep.mubr.msk.f32.mxu1 %vm587_vm0, %v3087_v42 }
 0x819   : > { %4731 = vmatmul.mubr.msk.f32.gmra.mxu1 %vm587_vm0, %v3088_v22 }
 0x81a   : > { %4733 = vmatprep.mubr.msk.f32.mxu1 %vm587_vm0, %v3089_v9  ;;  %v6962_v9 = vld [vmem:[%s7362_s7 + $0x18] sm:$0xff] }
 0x81d   : > { %4734 = vmatmul.mubr.msk.f32.gmra.mxu1 %vm587_vm0, %v3090_v46  ;;  %v6970_v46 = vld [vmem:[%s7362_s7] sm:$0xff] }
 0x81e   : > { %4736 = vmatprep.mubr.msk.f32.mxu1 %vm587_vm0, %v3091_v58 }
 0x821   : > { %4737 = vmatmul.mubr.msk.f32.gmra.mxu1 %vm587_vm0, %v3092_v54 }
 0x822   : > { %4168 = vmatprep.mubr.bf16.mxu1 %v7738_v21 }
 0x8b7   : > { %v4709_v27 = vpop.f32.mrf.mxu0 }
 0x8b9   : > { %v3397_v54 = vpop.f32.mrf.mxu0 }
 0x8bb   : > { %v4712_v60 = vpop.f32.mrf.mxu0 }
 0x8bd   : > { %v3407_v15 = vpop.f32.mrf.mxu0 }
 0x8bf   : > { %v4715_v57 = vpop.f32.mrf.mxu0 }
 0x8c1   : > { %v3417_v8 = vpop.f32.mrf.mxu0 }
 0x8d5   : > { %v4729_v20 = vpop.f32.mrf.mxu1 }
 0x8d7   : > { %v3502_v26 = vpop.f32.mrf.mxu1 }
 0x8d9   : > { %v4732_v2 = vpop.f32.mrf.mxu1 }
 0x8db   : > { %v3512_v14 = vpop.f32.mrf.mxu1 }
 0x8dd   : > { %v4735_v35 = vpop.f32.mrf.mxu1 }
 0x8df   : > { %v3522_v0 = vpop.f32.mrf.mxu1 }
 0x8e1   : > { %v4738_v13 = vpop.f32.mrf.mxu1 }
 0x8e2   : > { %3563 = vrot.lane.b32.xlu1 %v4738_v13, %s4828_s27 }
 0x8e3   : > { %v3532_v34 = vpop.f32.mrf.mxu1 }
 0x8e4   : > { %3561 = vrot.lane.b32.xlu0 %v3532_v34, %s4828_s27 }
 0x8e6   : > { %3557 = vrot.lane.b32.xlu1 %v3522_v0, %s4828_s27 }
 0x8e8   : > { %3559 = vrot.lane.b32.xlu0 %v4735_v35, %s4828_s27 }
 0x8ea   : > { %3553 = vrot.lane.b32.xlu1 %v3512_v14, %s4828_s27 }
 0x8ec   : > { %3555 = vrot.lane.b32.xlu0 %v4732_v2, %s4828_s27 }
 0x8ee   : > { %3549 = vrot.lane.b32.xlu1 %v3502_v26, %s4828_s27 }
 0x8f0   : > { %3551 = vrot.lane.b32.xlu0 %v4729_v20, %s4828_s27  ;;  %v4718_v20 = vpop.f32.mrf.mxu0  ;;  %s4474_s27 = sshll.u32 %s7802_s22, 5 }
 0x8f1   : > { %s413_s26 = scalar_lea.vmem %s7367_s12, %s4474_s27 }
 0x8f2   : > { %v3427_v14 = vpop.f32.mrf.mxu0 }
 0x954   : > { %v3564_v45 = vpop.permute.xlu1 %3563 }
 0x955   : > { %v3580_v17 = vmul.f32 %v6931_v43, %v3564_v45 }
 0x956   : > { %v3562_v38 = vpop.permute.xlu0 %3561 }
 0x957   : > { %v3579_v6 = vmul.f32 %v6937_v63, %v3562_v38  ;;  %3603 = vrot.lane.b32.xlu0 %v3580_v17, %s4829_s14 }
 0x958   : > { %v3558_v42 = vpop.permute.xlu1 %3557 }
 0x959   : > { %3601 = vrot.lane.b32.xlu1 %v3579_v6, %s4829_s14  ;;  %v3577_v62 = vmul.f32 %v6945_v39, %v3558_v42 }
 0x95a   : > { %v3560_v19 = vpop.permute.xlu0 %3559 }
 0x95b   : > { %v3578_v23 = vmul.f32 %v6951_v3, %v3560_v19 }
 0x95c   : > { %v3554_v22 = vpop.permute.xlu1 %3553 }
 0x95d   : > { %3597 = vrot.lane.b32.xlu1 %v3577_v62, %s4829_s14  ;;  %3599 = vrot.lane.b32.xlu0 %v3578_v23, %s4829_s14  ;;  %v3575_v61 = vmul.f32 %v4815_v49, %v3554_v22 }
 0x95e   : > { %v3556_v47 = vpop.permute.xlu0 %3555 }
 0x95f   : > { %v3576_v55 = vmul.f32 %v6962_v9, %v3556_v47 }
 0x960   : > { %v3550_v56 = vpop.permute.xlu1 %3549 }
 0x961   : > { %3593 = vrot.lane.b32.xlu1 %v3575_v61, %s4829_s14  ;;  %3595 = vrot.lane.b32.xlu0 %v3576_v55, %s4829_s14  ;;  %v3573_v32 = vmul.f32 %v6970_v46, %v3550_v56 }
 0x962   : > { %v3552_v16 = vpop.permute.xlu0 %3551 }
 0x963   : > { %v6979_v58 = vmul.f32 %v6976_v12, %v3552_v16 }
 0x965   : > { %3589 = vrot.lane.b32.xlu1 %v3573_v32, %s4829_s14  ;;  %3591 = vrot.lane.b32.xlu0 %v6979_v58, %s4829_s14 }
 0x9c9   : > { %v3604_v26 = vpop.permute.xlu0 %3603 }
 0x9ca   : > { %v3620_v2 = vmul.f32 %v4718_v20, %v3604_v26 }
 0x9cb   : > { %v3602_v35 = vpop.permute.xlu1 %3601 }
 0x9cc   : > { %v3619_v0 = vmul.f32 %v3602_v35, %v3427_v14  ;;  %3643 = vrot.lane.b32.xlu0 %v3620_v2, %s4831_s30 }
 0x9ce   : > { %3641 = vrot.lane.b32.xlu1 %v3619_v0, %s4831_s30  ;;  %v7741_v0 = vld [vmem:[#allocation48_spill] sm:$0xff] }
 0x9cf   : > { %v3598_v13 = vpop.permute.xlu1 %3597  ;;  %v3600_v34 = vpop.permute.xlu0 %3599 }
 0x9d0   : > { %v3617_v45 = vmul.f32 %v3598_v13, %v3417_v8  ;;  %v3618_v38 = vmul.f32 %v4715_v57, %v3600_v34 }
 0x9d2   : > { %3637 = vrot.lane.b32.xlu1 %v3617_v45, %s4831_s30  ;;  %3639 = vrot.lane.b32.xlu0 %v3618_v38, %s4831_s30  ;;  %v7744_v38 = vld [vmem:[#allocation7_spill] sm:$0xff] }
 0x9d3   : > { %v3594_v42 = vpop.permute.xlu1 %3593  ;;  %v3596_v19 = vpop.permute.xlu0 %3595 }
 0x9d4   : > { %v3615_v22 = vmul.f32 %v3594_v42, %v3407_v15  ;;  %v3616_v47 = vmul.f32 %v4712_v60, %v3596_v19  ;;  %v7739_v15 = vmov 2   ;;  %v7745_v19 = vld [vmem:[#allocation59_spill] sm:$0xff] }
 0x9d6   : > { %3633 = vrot.lane.b32.xlu1 %v3615_v22, %s4831_s30  ;;  %3635 = vrot.lane.b32.xlu0 %v3616_v47, %s4831_s30  ;;  %v7746_v47 = vld [vmem:[#allocation47_spill] sm:$0xff] }
 0x9d7   : > { %v3590_v56 = vpop.permute.xlu1 %3589  ;;  %v3592_v16 = vpop.permute.xlu0 %3591 }
 0x9d8   : > { %v3613_v20 = vmul.f32 %v3590_v56, %v3397_v54  ;;  %v3614_v26 = vmul.f32 %v4709_v27, %v3592_v16  ;;  %v7747_v16 = vld [vmem:[#allocation62_spill] sm:$0xff] }
 0x9da   : > { %3629 = vrot.lane.b32.xlu1 %v3613_v20, %s4831_s30  ;;  %3631 = vrot.lane.b32.xlu0 %v3614_v26, %s4831_s30  ;;  %v7748_v26 = vld [vmem:[#allocation64_spill] sm:$0xff] }
 0x9de   : > { %3686 = vperm.xlu1 %4765, %v3579_v6   ;;  %3690 = vperm.xlu0 %4766, %v3580_v17   ;;  %v7740_v6 = vmov 1  }
 0x9e2   : > { %3682 = vperm.xlu1 %4765, %v3578_v23   ;;  %3678 = vperm.xlu0 %4766, %v3577_v62  }
 0x9e6   : > { %3670 = vperm.xlu1 %4765, %v3575_v61   ;;  %3674 = vperm.xlu0 %4766, %v3576_v55  }
 0x9ea   : > { %4768 = vset.pattern.permute.xlu0 %v7739_v15  ;;  %4767 = vset.pattern.permute.xlu1 %v7739_v15 }
 0xa3e   : > { %v3644_v54 = vpop.permute.xlu0 %3643 }
 0xa3f   : > { %v3660_v61 = vsub.f32 %v6931_v43, %v3644_v54  ;;  %v4086_v43 = vld [vmem:[%s7366_s11] sm:$0x7] }
 0xa40   : > { %v3642_v60 = vpop.permute.xlu1 %3641 }
 0xa44   : > { %v3638_v57 = vpop.permute.xlu1 %3637  ;;  %v3640_v14 = vpop.permute.xlu0 %3639 }
 0xa45   : > { %v3657_v8 = vsub.f32 %v6945_v39, %v3638_v57  ;;  %v3658_v62 = vsub.f32 %v6951_v3, %v3640_v14  ;;  %v3659_v39 = vsub.f32 %v6937_v63, %v3642_v60 }
 0xa47   : > { %3779 = vperm.xlu0 %4768, %v3657_v8  }
 0xa48   : > { %v3634_v27 = vpop.permute.xlu1 %3633 }
 0xa49   : > { %v3655_v2 = vsub.f32 %v4815_v49, %v3634_v27  ;;  %v3636_v49 = vpop.permute.xlu0 %3635 }
 0xa4a   : > { %v3656_v55 = vsub.f32 %v6962_v9, %v3636_v49 }
 0xa4b   : > { %3769 = vperm.xlu1 %4767, %v3655_v2   ;;  %4769 = vset.pattern.permute.xlu0 %v7740_v6 }
 0xa4c   : > { %v3630_v17 = vpop.permute.xlu1 %3629  ;;  %3662 = vperm.xlu0 %4769, %v3573_v32  }
 0xa4d   : > { %v3653_v23 = vsub.f32 %v6970_v46, %v3630_v17  ;;  %v3632_v3 = vpop.permute.xlu0 %3631  ;;  %v7750_v17 = vld [vmem:[#allocation4_spill] sm:$0xff] }
 0xa4e   : > { %v3654_v46 = vsub.f32 %v6976_v12, %v3632_v3  ;;  %v7743_v12 = vld [vmem:[#allocation60_spill] sm:$0xff]  ;;  %v7755_v3 = vld [vmem:[#allocation45_spill] sm:$0xff] }
 0xa4f   : > { %3784 = vperm.xlu1 %4767, %v3658_v62   ;;  %v7751_v62 = vld [vmem:[#allocation50_spill] sm:$0xff] }
 0xa50   : > { %4771 = vset.pattern.permute.xlu0 %v7739_v15 }
 0xa51   : > { %3759 = vperm.xlu0 %4771, %v3653_v23   ;;  %v7752_v23 = vld [vmem:[#allocation61_spill] sm:$0xff] }
 0xa53   : > { %3794 = vperm.xlu1 %4767, %v3660_v61  }
 0xa55   : > { %4774 = vset.pattern.permute.xlu0 %v7738_v21 }
 0xa57   : > { %3789 = vperm.xlu1 %4767, %v3659_v39  }
 0xa59   : > { %v3687_v63 = vpop.permute.xlu1 %3686  ;;  %v3691_v9 = vpop.permute.xlu0 %3690 }
 0xa5a   : > { %v7012_v13 = vmul.f32 %v3687_v63, %v7741_v0  ;;  %v7018_v45 = vmul.f32 %v3687_v63, %v7743_v12  ;;  %v7021_v42 = vmul.f32 %v3691_v9, %v7744_v38  ;;  %v7024_v22 = vmul.f32 %v3687_v63, %v7745_v19  ;;  %v7758_v0 = vld [vmem:[#allocation12_spill] sm:$0xff] }
 0xa5b   : > { %3774 = vperm.xlu1 %4767, %v3656_v55   ;;  %v7027_v56 = vmul.f32 %v3691_v9, %v7746_v47  ;;  %v7030_v20 = vmul.f32 %v3687_v63, %v7747_v16  ;;  %v7036_v60 = vmul.f32 %v3687_v63, %v6728_v50  ;;  %v7039_v57 = vmul.f32 %v3691_v9, %v6740_v28  ;;  %v7749_v28 = vld [vmem:[#allocation3_spill] sm:$0xff]  ;;  %v7754_v55 = vld [vmem:[#allocation5_spill] sm:$0xff]  ;;  %v7759_v12 = vld [vmem:[#allocation28_spill] sm:$0xff] }
 0xa5c   : > { %v7042_v8 = vmul.f32 %v3687_v63, %v6796_v48  ;;  %v7045_v54 = vmul.f32 %v3691_v9, %v6771_v4  ;;  %v7048_v27 = vmul.f32 %v3687_v63, %v6706_v53  ;;  %v7051_v2 = vmul.f32 %v3691_v9, %v6735_v24  ;;  %v7753_v24 = vld [vmem:[#allocation52_spill] sm:$0xff]  ;;  %v7760_v47 = vld [vmem:[#allocation34_spill] sm:$0xff] }
 0xa5d   : > { %v3683_v32 = vpop.permute.xlu1 %3682  ;;  %v3679_v35 = vpop.permute.xlu0 %3678  ;;  %v7054_v14 = vmul.f32 %v3687_v63, %v6767_v31  ;;  %v7057_v50 = vmul.f32 %v3691_v9, %v6752_v18  ;;  %v7757_v63 = vld [vmem:[#allocation42_spill] sm:$0xff] }
 0xa5e   : > { %v7061_v48 = vmul.f32 %v3683_v32, %v7750_v17  ;;  %v3728_v4 = vmul.f32 %v3679_v35, %v7751_v62  ;;  %v7065_v61 = vmul.f32 %v3683_v32, %v7752_v23  ;;  %v3725_v49 = vmul.f32 %v3679_v35, %v7753_v24  ;;  %v7762_v17 = vld [vmem:[#allocation43_spill] sm:$0xff]  ;;  %v7763_v24 = vld [vmem:[#allocation22_spill] sm:$0xff] }
 0xa5f   : > { %4770 = vset.pattern.permute.xlu1 %v7740_v6  ;;  %v3726_v6 = vmul.f32 %v3679_v35, %v7749_v28  ;;  %v7069_v31 = vmul.f32 %v3683_v32, %v7754_v55  ;;  %v3727_v18 = vmul.f32 %v3679_v35, %v7755_v3  ;;  %v3732_v38 = vmul.f32 %v3679_v35, %v7759_v12  ;;  %v7764_v3 = vld [vmem:[#allocation15_spill] sm:$0xff]  ;;  %v7766_v12 = vld [vmem:[#allocation2_spill] sm:$0xff] }
 0xa60   : > { %3666 = vperm.xlu1 %4770, %v6979_v58   ;;  %v7742_v58 = vld [vmem:[#allocation63_spill] sm:$0xff]  ;;  %v7081_v19 = vmul.f32 %v3683_v32, %v6721_v37  ;;  %v3729_v16 = vmul.f32 %v3679_v35, %v7760_v47  ;;  %v3731_v62 = vmul.f32 %v3679_v35, %v7762_v17  ;;  %v7089_v23 = vmul.f32 %v3683_v32, %v6703_v52  ;;  %v7770_v17 = vld [vmem:[#allocation6_spill] sm:$0xff] }
 0xa61   : > { %v7015_v34 = vmul.f32 %v3691_v9, %v7742_v58  ;;  %v3671_v53 = vpop.permute.xlu1 %3670  ;;  %v3675_v39 = vpop.permute.xlu0 %3674  ;;  %v7077_v58 = vmul.f32 %v3683_v32, %v7758_v0 }
 0xa62   : > { %v3710_v55 = vmul.f32 %v3671_v53, %v7763_v24  ;;  %v7097_v37 = vmul.f32 %v3675_v39, %v7766_v12  ;;  %v3709_v47 = vmul.f32 %v3671_v53, %v7767_v10  ;;  %v7105_v52 = vmul.f32 %v3675_v39, %v7770_v17 }
 0xa63   : > { %v7111_v24 = vmul.f32 %v3675_v39, %v6620_v59  ;;  %v7126_v12 = vmul.f32 %v3671_v53, %v6762_v36 }
 0xa64   : > { %4772 = vset.pattern.permute.xlu1 %v7739_v15  ;;  %v7033_v15 = vmul.f32 %v3691_v9, %v7748_v26  ;;  %v3730_v9 = vmul.f32 %v3679_v35, %v7757_v63  ;;  %v7761_v26 = vld [vmem:[#allocation40_spill] sm:$0xff]  ;;  %v7765_v63 = vld [vmem:[#allocation19_spill] sm:$0xff]  ;;  %v3711_v35 = vmul.f32 %v3671_v53, %v7769_v30  ;;  %v7123_v30 = vmul.f32 %v3675_v39, %v6612_v40 }
 0xa65   : > { %3764 = vperm.xlu1 %4772, %v3654_v46   ;;  %v7756_v46 = vld [vmem:[#allocation58_spill] sm:$0xff]  ;;  %v7085_v28 = vmul.f32 %v3683_v32, %v7761_v26  ;;  %v3712_v0 = vmul.f32 %v3671_v53, %v7765_v63  ;;  %v7101_v26 = vmul.f32 %v3675_v39, %v7768_v25  ;;  %7771 = vst [vmem:[#allocation35_spill] sm:$0xff] %v7111_v24  ;;  %7776 = vst [vmem:[#allocation51_spill] sm:$0xff] %v7126_v12 }
 0xa66   : > { %v7117_v63 = vmul.f32 %v3675_v39, %v7737_v33  ;;  %v7120_v25 = vmul.f32 %v3671_v53, %v6657_v41  ;;  %7775 = vst [vmem:[#allocation55_spill] sm:$0xff] %v7123_v30 }
 0xa68   : > { %7773 = vst [vmem:[#allocation21_spill] sm:$0xff] %v7117_v63  ;;  %7774 = vst [vmem:[#allocation44_spill] sm:$0xff] %v7120_v25 }
 0xa69   : > { %4773 = vset.pattern.permute.xlu1 %v7738_v21 }
 0xa6a   : > { %4089 = vperm.xlu1 %4773, %v4086_v43   ;;  %v7073_v43 = vmul.f32 %v3683_v32, %v7756_v46  ;;  %v7093_v46 = vmul.f32 %v3675_v39, %v7764_v3  ;;  %v7108_v32 = vmul.f32 %v3671_v53, %v6700_v51  ;;  %v7114_v3 = vmul.f32 %v3671_v53, %v6791_v7 }
 0xa6b   : > { %v7129_v51 = vmul.f32 %v3675_v39, %v6647_v44 }
 0xa6c   : > { %7772 = vst [vmem:[#allocation20_spill] sm:$0xff] %v7114_v3 }
 0xa6d   : > { %7777 = vst [vmem:[#allocation53_spill] sm:$0xff] %v7129_v51 }
 0xac2   : > { %v3780_v10 = vpop.permute.xlu0 %3779 }
 0xac3   : > { %v3830_v59 = vadd.f32 %v3780_v10, %v3726_v6  ;;  %v3832_v17 = vadd.f32 %v3780_v10, %v3728_v4  ;;  %v3829_v7 = vadd.f32 %v3780_v10, %v3725_v49  ;;  %v3831_v11 = vadd.f32 %v3780_v10, %v3727_v18 }
 0xac4   : > { %v7131_v5 = vadd.f32 %v3780_v10, %v3730_v9  ;;  %v7133_v33 = vadd.f32 %v3780_v10, %v3732_v38  ;;  %v7135_v29 = vadd.f32 %v3780_v10, %v3729_v16  ;;  %v7137_v41 = vadd.f32 %v3780_v10, %v3731_v62 }
 0xac5   : > { %vm3894_vm0 = vcmp.gt.f32.partialorder %v3830_v59, 0.0  ;;  %v3958_v40 = vmul.f32 0.01, %v3830_v59  ;;  %vm3896_vm10 = vcmp.gt.f32.partialorder %v3832_v17, 0.0  ;;  %v3960_v36 = vmul.f32 0.01, %v3832_v17 }
 0xac6   : > { %v7139_v53 = vpop.permute.xlu1 %3769  ;;  %vm3893_vm11 = vcmp.gt.f32.partialorder %v3829_v7, 0.0  ;;  %v3957_v44 = vmul.f32 0.01, %v3829_v7  ;;  %vm3895_vm12 = vcmp.gt.f32.partialorder %v3831_v11, 0.0  ;;  %v3959_v6 = vmul.f32 0.01, %v3831_v11 }
 0xac7   : > { %v7141_v4 = vsel %vm3894_vm0, %v3830_v59, %v3958_v40  ;;  %v7143_v39 = vsel %vm3896_vm10, %v3832_v17, %v3960_v36  ;;  %v3814_v49 = vadd.f32 %v7139_v53, %v3710_v55  ;;  %v3816_v18 = vadd.f32 %v7139_v53, %v3712_v0 }
 0xac8   : > { %v7147_v9 = vsel %vm3893_vm11, %v3829_v7, %v3957_v44  ;;  %v7149_v38 = vsel %vm3895_vm12, %v3831_v11, %v3959_v6  ;;  %v3813_v16 = vadd.f32 %v7139_v53, %v3709_v47  ;;  %v3815_v62 = vadd.f32 %v7139_v53, %v3711_v35 }
 0xac9   : > { %vm3878_vm13 = vcmp.gt.f32.partialorder %v3814_v49, 0.0  ;;  %v3942_v10 = vmul.f32 0.01, %v3814_v49  ;;  %vm3880_vm14 = vcmp.gt.f32.partialorder %v3816_v18, 0.0  ;;  %v3944_v1 = vmul.f32 0.01, %v3816_v18 }
 0xaca   : > { %v7153_v59 = vpop.permute.xlu1 %3784  ;;  %vm3877_vm15 = vcmp.gt.f32.partialorder %v3813_v16, 0.0  ;;  %v3941_v17 = vmul.f32 0.01, %v3813_v16  ;;  %vm3879_vm2 = vcmp.gt.f32.partialorder %v3815_v62, 0.0  ;;  %v3943_v55 = vmul.f32 0.01, %v3815_v62 }
 0xacb   : > { %v3838_v0 = vadd.f32 %v7153_v59, %v7061_v48  ;;  %v3840_v11 = vadd.f32 %v7153_v59, %v7065_v61  ;;  %v3837_v47 = vadd.f32 %v7153_v59, %v7069_v31  ;;  %v3839_v35 = vadd.f32 %v7153_v59, %v7073_v43 }
 0xacc   : > { %v7163_v7 = vsel %vm3878_vm13, %v3814_v49, %v3942_v10  ;;  %v7165_v40 = vsel %vm3880_vm14, %v3816_v18, %v3944_v1  ;;  %v7167_v36 = vsel %vm3877_vm15, %v3813_v16, %v3941_v17  ;;  %v7169_v44 = vsel %vm3879_vm2, %v3815_v62, %v3943_v55 }
 0xacd   : > { %vm3902_vm3 = vcmp.gt.f32.partialorder %v3838_v0, 0.0  ;;  %v3966_v6 = vmul.f32 0.01, %v3838_v0  ;;  %vm3904_vm4 = vcmp.gt.f32.partialorder %v3840_v11, 0.0  ;;  %v3968_v48 = vmul.f32 0.01, %v3840_v11 }
 0xace   : > { %v7171_v51 = vpop.permute.xlu1 %3794  ;;  %vm3901_vm5 = vcmp.gt.f32.partialorder %v3837_v47, 0.0  ;;  %v3965_v61 = vmul.f32 0.01, %v3837_v47  ;;  %vm3903_vm6 = vcmp.gt.f32.partialorder %v3839_v35, 0.0  ;;  %v3967_v31 = vmul.f32 0.01, %v3839_v35 }
 0xacf   : > { %v3854_v43 = vadd.f32 %v7171_v51, %v7015_v34  ;;  %v3856_v1 = vadd.f32 %v7171_v51, %v7021_v42  ;;  %v3853_v49 = vadd.f32 %v7171_v51, %v7027_v56  ;;  %v3855_v18 = vadd.f32 %v7171_v51, %v7033_v15 }
 0xad0   : > { %v4030_v16 = vsel %vm3902_vm3, %v3838_v0, %v3966_v6  ;;  %v4032_v62 = vsel %vm3904_vm4, %v3840_v11, %v3968_v48  ;;  %v7181_v10 = vsel %vm3901_vm5, %v3837_v47, %v3965_v61  ;;  %v7183_v17 = vsel %vm3903_vm6, %v3839_v35, %v3967_v31  ;;  %v7195_v61 = vpop.permute.xlu0 %3662 }
 0xad1   : > { %vm3918_vm7 = vcmp.gt.f32.partialorder %v3854_v43, 0.0  ;;  %v3982_v55 = vmul.f32 0.01, %v3854_v43  ;;  %vm3920_vm8 = vcmp.gt.f32.partialorder %v3856_v1, 0.0  ;;  %v3984_v12 = vmul.f32 0.01, %v3856_v1 }
 0xad2   : > { %v7185_v34 = vpop.permute.xlu1 %3789  ;;  %vm3917_vm9 = vcmp.gt.f32.partialorder %v3853_v49, 0.0  ;;  %v3981_v42 = vmul.f32 0.01, %v3853_v49  ;;  %vm3919_vm0 = vcmp.gt.f32.partialorder %v3855_v18, 0.0  ;;  %v3983_v30 = vmul.f32 0.01, %v3855_v18 }
 0xad3   : > { %v3846_v56 = vadd.f32 %v7185_v34, %v7012_v13  ;;  %v4046_v15 = vsel %vm3918_vm7, %v3854_v43, %v3982_v55  ;;  %v3848_v0 = vadd.f32 %v7185_v34, %v7018_v45  ;;  %v4048_v11 = vsel %vm3920_vm8, %v3856_v1, %v3984_v12 }
 0xad4   : > { %v3845_v47 = vadd.f32 %v7185_v34, %v7024_v22  ;;  %v4045_v35 = vsel %vm3917_vm9, %v3853_v49, %v3981_v42  ;;  %v3847_v6 = vadd.f32 %v7185_v34, %v7030_v20  ;;  %v4047_v48 = vsel %vm3919_vm0, %v3855_v18, %v3983_v30 }
 0xad5   : > { %vm3910_vm10 = vcmp.gt.f32.partialorder %v3846_v56, 0.0  ;;  %v3974_v31 = vmul.f32 0.01, %v3846_v56  ;;  %vm3912_vm11 = vcmp.gt.f32.partialorder %v3848_v0, 0.0  ;;  %v3976_v25 = vmul.f32 0.01, %v3848_v0 }
 0xad6   : > { %v7197_v13 = vpop.permute.xlu1 %3774  ;;  %vm3909_vm12 = vcmp.gt.f32.partialorder %v3845_v47, 0.0  ;;  %v3973_v43 = vmul.f32 0.01, %v3845_v47  ;;  %vm3911_vm13 = vcmp.gt.f32.partialorder %v3847_v6, 0.0  ;;  %v3975_v45 = vmul.f32 0.01, %v3847_v6 }
 0xad7   : > { %v4038_v12 = vsel %vm3910_vm10, %v3846_v56, %v3974_v31  ;;  %v4040_v1 = vsel %vm3912_vm11, %v3848_v0, %v3976_v25  ;;  %v4071_v22 = vpack.c.bf16 %v4030_v16, %v7141_v4  ;;  %v4073_v49 = vpack.c.bf16 %v4032_v62, %v7143_v39  ;;  %v7211_v16 = vpop.permute.xlu0 %3759 }
 0xad8   : > { %v4079_v20 = vpack.c.bf16 %v4046_v15, %v4038_v12  ;;  %v4081_v30 = vpack.c.bf16 %v4048_v11, %v4040_v1  ;;  %v4037_v18 = vsel %vm3909_vm12, %v3845_v47, %v3973_v43  ;;  %v4039_v55 = vsel %vm3911_vm13, %v3847_v6, %v3975_v45  ;;  %v7780_v11 = vld [vmem:[#allocation26_spill] sm:$0xff] }
 0xad9   : > { %v4078_v42 = vpack.c.bf16 %v4045_v35, %v4037_v18  ;;  %v4080_v63 = vpack.c.bf16 %v4047_v48, %v4039_v55  ;;  %v4070_v3 = vpack.c.bf16 %v7181_v10, %v7147_v9  ;;  %v4072_v24 = vpack.c.bf16 %v7183_v17, %v7149_v38  ;;  %v7778_v38 = vld [vmem:[#allocation54_spill] sm:$0xff]  ;;  %v7783_v18 = vld [vmem:[#allocation27_spill] sm:$0xff] }
 0xada   : > { %4103 = vmatprep.subr.bf16.mxu0 %v4079_v20  ;;  %4144 = vmatprep.subr.bf16.mxu1 %v4081_v30  ;;  %v3822_v25 = vadd.f32 %v7197_v13, %v7093_v46  ;;  %v3824_v4 = vadd.f32 %v7197_v13, %v7097_v37  ;;  %v3821_v39 = vadd.f32 %v7197_v13, %v7101_v26  ;;  %v7779_v17 = vld [vmem:[#allocation14_spill] sm:$0xff]  ;;  %v7227_v31 = vmul.f32 0.01, %v7131_v5  ;;  %v7782_v30 = vld [vmem:[#allocation24_spill] sm:$0xff] }
 0xadb   : > { %v7213_v62 = vpop.permute.xlu1 %3666  ;;  %4104 = vmatpush1.bf16.msra.mxu0 %v4078_v42  ;;  %4145 = vmatpush1.bf16.msra.mxu1 %v4080_v63  ;;  %v3823_v9 = vadd.f32 %v7197_v13, %v7105_v52  ;;  %v3694_v10 = vmul.f32 %v7195_v61, %v7778_v38  ;;  %v3696_v46 = vmul.f32 %v7195_v61, %v7779_v17  ;;  %vm3898_vm0 = vcmp.gt.f32.partialorder %v7131_v5, 0.0 }
 0xadc   : > { %4105 = vmatprep.subr.bf16.mxu0 %v4071_v22  ;;  %4146 = vmatprep.subr.bf16.mxu1 %v4073_v49  ;;  %vm3886_vm14 = vcmp.gt.f32.partialorder %v3822_v25, 0.0  ;;  %v3950_v37 = vmul.f32 0.01, %v3822_v25  ;;  %vm3888_vm15 = vcmp.gt.f32.partialorder %v3824_v4, 0.0  ;;  %v3952_v26 = vmul.f32 0.01, %v3824_v4 }
 0xadd   : > { %vm3885_vm2 = vcmp.gt.f32.partialorder %v3821_v39, 0.0  ;;  %v3949_v56 = vmul.f32 0.01, %v3821_v39  ;;  %vm3887_vm3 = vcmp.gt.f32.partialorder %v3823_v9, 0.0  ;;  %v3951_v15 = vmul.f32 0.01, %v3823_v9 }
 0xade   : > { %v4014_v63 = vsel %vm3886_vm14, %v3822_v25, %v3950_v37  ;;  %v4016_v0 = vsel %vm3888_vm15, %v3824_v4, %v3952_v26  ;;  %v3702_v52 = vmul.f32 %v7213_v62, %v7780_v11  ;;  %v3798_v47 = vadd.f32 %v7211_v16, %v3694_v10  ;;  %v7784_v25 = vld [vmem:[#allocation29_spill] sm:$0xff] }
 0xadf   : > { %4106 = vmatpush1.bf16.msra.mxu0 %v4070_v3  ;;  %4147 = vmatpush1.bf16.msra.mxu1 %v4072_v24  ;;  %v4063_v35 = vpack.c.bf16 %v4014_v63, %v7163_v7  ;;  %v4065_v6 = vpack.c.bf16 %v4016_v0, %v7165_v40  ;;  %v4013_v48 = vsel %vm3885_vm2, %v3821_v39, %v3949_v56  ;;  %v7781_v7 = vld [vmem:[#allocation23_spill] sm:$0xff]  ;;  %v7237_v22 = vmul.f32 0.01, %v7133_v33 }
 0xae0   : > { %v7229_v43 = vpop.permute.xlu1 %3764  ;;  %v4062_v45 = vpack.c.bf16 %v4013_v48, %v7167_v36  ;;  %v4015_v12 = vsel %vm3887_vm3, %v3823_v9, %v3951_v15  ;;  %vm3862_vm4 = vcmp.gt.f32.partialorder %v3798_v47, 0.0  ;;  %v3926_v1 = vmul.f32 0.01, %v3798_v47 }
 0xae1   : > { %4107 = vmatprep.subr.bf16.mxu0 %v4063_v35  ;;  %4148 = vmatprep.subr.bf16.mxu1 %v4065_v6  ;;  %v4064_v3 = vpack.c.bf16 %v4015_v12, %v7169_v44  ;;  %v3806_v24 = vadd.f32 %v7229_v43, %v3702_v52  ;;  %v3704_v40 = vmul.f32 %v7213_v62, %v7781_v7  ;;  %vm3900_vm11 = vcmp.gt.f32.partialorder %v7133_v33, 0.0 }
 0xae2   : > { %v3990_v49 = vsel %vm3862_vm4, %v3798_v47, %v3926_v1  ;;  %v3800_v20 = vadd.f32 %v7211_v16, %v3696_v46  ;;  %v3693_v36 = vmul.f32 %v7195_v61, %v7782_v30  ;;  %v3701_v55 = vmul.f32 %v7213_v62, %v7783_v18  ;;  %v7785_v46 = vld [vmem:[#allocation13_spill] sm:$0xff] }
 0xae3   : > { %4108 = vmatpush1.bf16.msra.mxu0 %v4062_v45  ;;  %4149 = vmatpush1.bf16.msra.mxu1 %v4064_v3  ;;  %vm3870_vm5 = vcmp.gt.f32.partialorder %v3806_v24, 0.0  ;;  %v3934_v44 = vmul.f32 0.01, %v3806_v24  ;;  %v3808_v42 = vadd.f32 %v7229_v43, %v3704_v40  ;;  %v3695_v4 = vmul.f32 %v7195_v61, %v7784_v25 }
 0xae4   : > { %vm3864_vm6 = vcmp.gt.f32.partialorder %v3800_v20, 0.0  ;;  %v3928_v39 = vmul.f32 0.01, %v3800_v20  ;;  %v3797_v9 = vadd.f32 %v7211_v16, %v3693_v36  ;;  %v3805_v38 = vadd.f32 %v7229_v43, %v3701_v55 }
 0xae5   : > { %v3998_v10 = vsel %vm3870_vm5, %v3806_v24, %v3934_v44  ;;  %vm3872_vm7 = vcmp.gt.f32.partialorder %v3808_v42, 0.0  ;;  %v3936_v17 = vmul.f32 0.01, %v3808_v42  ;;  %v3703_v37 = vmul.f32 %v7213_v62, %v7785_v46 }
 0xae6   : > { %v4055_v26 = vpack.c.bf16 %v3998_v10, %v3990_v49  ;;  %v3992_v56 = vsel %vm3864_vm6, %v3800_v20, %v3928_v39  ;;  %vm3861_vm8 = vcmp.gt.f32.partialorder %v3797_v9, 0.0  ;;  %vm3869_vm9 = vcmp.gt.f32.partialorder %v3805_v38, 0.0  ;;  %v7266_v20 = vld [vmem:[%s7365_s10] sm:$0x3] }
 0xae7   : > { %v4000_v15 = vsel %vm3872_vm7, %v3808_v42, %v3936_v17  ;;  %v3925_v63 = vmul.f32 0.01, %v3797_v9  ;;  %v3933_v0 = vmul.f32 0.01, %v3805_v38  ;;  %v3799_v11 = vadd.f32 %v7211_v16, %v3695_v4 }
 0xae8   : > { %4109 = vmatprep.subr.bf16.mxu0 %v4055_v26  ;;  %v4057_v52 = vpack.c.bf16 %v4000_v15, %v3992_v56  ;;  %v3807_v47 = vadd.f32 %v7229_v43, %v3703_v37  ;;  %v3850_v35 = vadd.f32 %v7185_v34, %v7036_v60  ;;  %v3858_v6 = vadd.f32 %v7171_v51, %v7039_v57 }
 0xae9   : > { %v3989_v48 = vsel %vm3861_vm8, %v3797_v9, %v3925_v63  ;;  %v3997_v45 = vsel %vm3869_vm9, %v3805_v38, %v3933_v0  ;;  %vm3863_vm10 = vcmp.gt.f32.partialorder %v3799_v11, 0.0  ;;  %v3927_v12 = vmul.f32 0.01, %v3799_v11 }
 0xaea   : > { %4150 = vmatprep.subr.bf16.mxu1 %v4057_v52  ;;  %v4054_v1 = vpack.c.bf16 %v3997_v45, %v3989_v48  ;;  %vm3871_vm12 = vcmp.gt.f32.partialorder %v3807_v47, 0.0  ;;  %v3935_v3 = vmul.f32 0.01, %v3807_v47  ;;  %vm3914_vm13 = vcmp.gt.f32.partialorder %v3850_v35, 0.0  ;;  %v7786_v48 = vld [vmem:[#allocation35_spill] sm:$0xff] }
 0xaeb   : > { %v3991_v24 = vsel %vm3863_vm10, %v3799_v11, %v3927_v12  ;;  %vm3922_vm14 = vcmp.gt.f32.partialorder %v3858_v6, 0.0  ;;  %v3978_v7 = vmul.f32 0.01, %v3850_v35  ;;  %v3986_v40 = vmul.f32 0.01, %v3858_v6 }
 0xaec   : > { %4110 = vmatpush1.bf16.msra.mxu0 %v4054_v1  ;;  %v3999_v60 = vsel %vm3871_vm12, %v3807_v47, %v3935_v3  ;;  %v3852_v57 = vadd.f32 %v7185_v34, %v7042_v8  ;;  %v3860_v49 = vadd.f32 %v7171_v51, %v7045_v54  ;;  %v3849_v30 = vadd.f32 %v7185_v34, %v7048_v27 }
 0xaed   : > { %v4056_v36 = vpack.c.bf16 %v3999_v60, %v3991_v24  ;;  %v4042_v18 = vsel %vm3914_vm13, %v3850_v35, %v3978_v7  ;;  %v4050_v55 = vsel %vm3922_vm14, %v3858_v6, %v3986_v40  ;;  %v3857_v44 = vadd.f32 %v7171_v51, %v7051_v2  ;;  %v7787_v24 = vld [vmem:[#allocation20_spill] sm:$0xff]  ;;  %v7788_v40 = vld [vmem:[#allocation21_spill] sm:$0xff] }
 0xaee   : > { %v4083_v42 = vpack.c.bf16 %v4050_v55, %v4042_v18  ;;  %vm3916_vm15 = vcmp.gt.f32.partialorder %v3852_v57, 0.0  ;;  %vm3924_vm2 = vcmp.gt.f32.partialorder %v3860_v49, 0.0  ;;  %v3980_v8 = vmul.f32 0.01, %v3852_v57  ;;  %v7789_v60 = vld [vmem:[#allocation44_spill] sm:$0xff] }
 0xaef   : > { %4151 = vmatpush1.bf16.msra.mxu1 %v4056_v36  ;;  %v3988_v54 = vmul.f32 0.01, %v3860_v49  ;;  %4467 = vmatmul.mubr.msk.bf16.vlgmr.msra.gmra.mxu0 %vm1112_vm1, %v7266_v20  ;;  %vm3913_vm3 = vcmp.gt.f32.partialorder %v3849_v30, 0.0  ;;  %vm3921_vm4 = vcmp.gt.f32.partialorder %v3857_v44, 0.0  ;;  %v3977_v25 = vmul.f32 0.01, %v3849_v30 }
 0xaf0   : > { %4185 = vmatprep.subr.bf16.mxu0 %v4083_v42  ;;  %v4044_v27 = vsel %vm3916_vm15, %v3852_v57, %v3980_v8  ;;  %v3985_v4 = vmul.f32 0.01, %v3857_v44  ;;  %v3851_v39 = vadd.f32 %v7185_v34, %v7054_v14  ;;  %v3859_v2 = vadd.f32 %v7171_v51, %v7057_v50  ;;  %4209 = vmatprep.mubr.bf16.mxu0 %v7738_v21 }
 0xaf1   : > { %v4052_v9 = vsel %vm3924_vm2, %v3860_v49, %v3988_v54  ;;  %v4041_v38 = vsel %vm3913_vm3, %v3849_v30, %v3977_v25  ;;  %v3842_v10 = vadd.f32 %v7153_v59, %v7077_v58  ;;  %v4026_v17 = vsel %vm3898_vm0, %v7131_v5, %v7227_v31 }
 0xaf2   : > { %v4085_v46 = vpack.c.bf16 %v4052_v9, %v4044_v27  ;;  %4468 = vmatmul.mubr.msk.bf16.vlgmr.msra.gmra.mxu1 %vm1112_vm1, %v7266_v20  ;;  %v4049_v14 = vsel %vm3921_vm4, %v3857_v44, %v3985_v4  ;;  %vm3915_vm5 = vcmp.gt.f32.partialorder %v3851_v39, 0.0  ;;  %vm3923_vm6 = vcmp.gt.f32.partialorder %v3859_v2, 0.0  ;;  %v7791_v27 = vld [vmem:[#allocation51_spill] sm:$0xff] }
 0xaf3   : > { %v4082_v50 = vpack.c.bf16 %v4049_v14, %v4041_v38  ;;  %v3979_v51 = vmul.f32 0.01, %v3851_v39  ;;  %v3987_v34 = vmul.f32 0.01, %v3859_v2  ;;  %vm3906_vm7 = vcmp.gt.f32.partialorder %v3842_v10, 0.0  ;;  %4250 = vmatprep.mubr.bf16.mxu1 %v7738_v21 }
 0xaf4   : > { %4226 = vmatprep.subr.bf16.mxu1 %v4085_v46  ;;  %v3970_v58 = vmul.f32 0.01, %v3842_v10  ;;  %v3844_v37 = vadd.f32 %v7153_v59, %v7081_v19  ;;  %v4028_v5 = vsel %vm3900_vm11, %v7133_v33, %v7237_v22  ;;  %v3841_v31 = vadd.f32 %v7153_v59, %v7085_v28  ;;  %v7794_v46 = vld [vmem:[#allocation8_spill] sm:$0xff] }
 0xaf5   : > { %4186 = vmatpush1.bf16.msra.mxu0 %v4082_v50  ;;  %v4043_v26 = vsel %vm3915_vm5, %v3851_v39, %v3979_v51  ;;  %v4051_v56 = vsel %vm3923_vm6, %v3859_v2, %v3987_v34  ;;  %vm3897_vm8 = vcmp.gt.f32.partialorder %v7135_v29, 0.0  ;;  %v3961_v21 = vmul.f32 0.01, %v7135_v29  ;;  %v7792_v39 = vld [vmem:[#allocation53_spill] sm:$0xff] }
 0xaf6   : > { %v4084_v15 = vpack.c.bf16 %v4051_v56, %v4043_v26  ;;  %v4034_v63 = vsel %vm3906_vm7, %v3842_v10, %v3970_v58  ;;  %vm3908_vm9 = vcmp.gt.f32.partialorder %v3844_v37, 0.0  ;;  %v3972_v0 = vmul.f32 0.01, %v3844_v37  ;;  %v7793_v10 = vld [vmem:[#allocation11_spill] sm:$0xff]  ;;  %v7796_v26 = vld [vmem:[#allocation17_spill] sm:$0xff] }
 0xaf7   : > { %v4075_v19 = vpack.c.bf16 %v4034_v63, %v4026_v17  ;;  %vm3905_vm0 = vcmp.gt.f32.partialorder %v3841_v31, 0.0  ;;  %v3969_v11 = vmul.f32 0.01, %v3841_v31  ;;  %v4025_v52 = vsel %vm3897_vm8, %v7135_v29, %v3961_v21  ;;  %v7797_v21 = vld [vmem:[#allocation9_spill] sm:$0xff] }
 0xaf8   : > { %4227 = vmatpush1.bf16.msra.mxu1 %v4084_v15  ;;  %v4036_v33 = vsel %vm3908_vm9, %v3844_v37, %v3972_v0  ;;  %v3843_v28 = vadd.f32 %v7153_v59, %v7089_v23  ;;  %vm3899_vm10 = vcmp.gt.f32.partialorder %v7137_v41, 0.0  ;;  %v3963_v22 = vmul.f32 0.01, %v7137_v41 }
 0xaf9   : > { %4187 = vmatprep.subr.bf16.mxu0 %v4075_v19  ;;  %v4077_v47 = vpack.c.bf16 %v4036_v33, %v4028_v5  ;;  %v4033_v35 = vsel %vm3905_vm0, %v3841_v31, %v3969_v11  ;;  %v3818_v6 = vadd.f32 %v7139_v53, %v7108_v32  ;;  %v3826_v45 = vadd.f32 %v7197_v13, %v7786_v48  ;;  %v7795_v5 = vld [vmem:[#allocation25_spill] sm:$0xff] }
 0xafa   : > { %v4074_v12 = vpack.c.bf16 %v4033_v35, %v4025_v52  ;;  %vm3907_vm11 = vcmp.gt.f32.partialorder %v3843_v28, 0.0  ;;  %v3971_v29 = vmul.f32 0.01, %v3843_v28  ;;  %v4027_v1 = vsel %vm3899_vm10, %v7137_v41, %v3963_v22  ;;  %v7790_v41 = vld [vmem:[#allocation55_spill] sm:$0xff] }
 0xafb   : > { %4228 = vmatprep.subr.bf16.mxu1 %v4077_v47  ;;  %vm3882_vm12 = vcmp.gt.f32.partialorder %v3818_v6, 0.0  ;;  %vm3890_vm13 = vcmp.gt.f32.partialorder %v3826_v45, 0.0  ;;  %v3946_v23 = vmul.f32 0.01, %v3818_v6  ;;  %v3954_v59 = vmul.f32 0.01, %v3826_v45 }
 0xafc   : > { %4188 = vmatpush1.bf16.msra.mxu0 %v4074_v12  ;;  %v4035_v3 = vsel %vm3907_vm11, %v3843_v28, %v3971_v29  ;;  %v3820_v7 = vadd.f32 %v7139_v53, %v7787_v24  ;;  %v3828_v32 = vadd.f32 %v7197_v13, %v7788_v40  ;;  %v3817_v57 = vadd.f32 %v7139_v53, %v7789_v60  ;;  %v7798_v47 = vld [vmem:[#allocation38_spill] sm:$0xff]  ;;  %v7799_v12 = vld [vmem:[#allocation32_spill] sm:$0xff] }
 0xafd   : > { %v4076_v49 = vpack.c.bf16 %v4035_v3, %v4027_v1  ;;  %v4010_v30 = vsel %vm3882_vm12, %v3818_v6, %v3946_v23  ;;  %v4018_v36 = vsel %vm3890_vm13, %v3826_v45, %v3954_v59  ;;  %v3825_v18 = vadd.f32 %v7197_v13, %v7790_v41 }
 0xafe   : > { %v4067_v55 = vpack.c.bf16 %v4018_v36, %v4010_v30  ;;  %vm3884_vm14 = vcmp.gt.f32.partialorder %v3820_v7, 0.0  ;;  %vm3892_vm15 = vcmp.gt.f32.partialorder %v3828_v32, 0.0  ;;  %v3948_v44 = vmul.f32 0.01, %v3820_v7 }
 0xaff   : > { %4229 = vmatpush1.bf16.msra.mxu1 %v4076_v49  ;;  %v3956_v42 = vmul.f32 0.01, %v3828_v32  ;;  %vm3881_vm2 = vcmp.gt.f32.partialorder %v3817_v57, 0.0  ;;  %vm3889_vm3 = vcmp.gt.f32.partialorder %v3825_v18, 0.0  ;;  %v3945_v8 = vmul.f32 0.01, %v3817_v57 }
 0xb00   : > { %4189 = vmatprep.subr.bf16.mxu0 %v4067_v55  ;;  %v4012_v54 = vsel %vm3884_vm14, %v3820_v7, %v3948_v44  ;;  %v3953_v25 = vmul.f32 0.01, %v3825_v18  ;;  %v3819_v4 = vadd.f32 %v7139_v53, %v7791_v27  ;;  %v3827_v2 = vadd.f32 %v7197_v13, %v7792_v39  ;;  %v7800_v7 = vld [vmem:[#allocation30_spill] sm:$0xff] }
 0xb01   : > { %v4020_v9 = vsel %vm3892_vm15, %v3828_v32, %v3956_v42  ;;  %v4009_v38 = vsel %vm3881_vm2, %v3817_v57, %v3945_v8  ;;  %v3698_v17 = vmul.f32 %v7195_v61, %v7793_v10  ;;  %v3706_v14 = vmul.f32 %v7213_v62, %v7794_v46 }
 0xb02   : > { %v4069_v50 = vpack.c.bf16 %v4020_v9, %v4012_v54  ;;  %v4017_v51 = vsel %vm3889_vm3, %v3825_v18, %v3953_v25  ;;  %vm3883_vm4 = vcmp.gt.f32.partialorder %v3819_v4, 0.0  ;;  %vm3891_vm5 = vcmp.gt.f32.partialorder %v3827_v2, 0.0 }
 0xb03   : > { %v4066_v34 = vpack.c.bf16 %v4017_v51, %v4009_v38  ;;  %v3947_v58 = vmul.f32 0.01, %v3819_v4  ;;  %v3955_v37 = vmul.f32 0.01, %v3827_v2  ;;  %v3802_v53 = vadd.f32 %v7211_v16, %v3698_v17 }
 0xb04   : > { %4230 = vmatprep.subr.bf16.mxu1 %v4069_v50  ;;  %v3810_v13 = vadd.f32 %v7229_v43, %v3706_v14  ;;  %v3700_v31 = vmul.f32 %v7195_v61, %v7795_v5  ;;  %v3708_v56 = vmul.f32 %v7213_v62, %v7796_v26  ;;  %v3697_v15 = vmul.f32 %v7195_v61, %v7797_v21 }
 0xb05   : > { %4190 = vmatpush1.bf16.msra.mxu0 %v4066_v34  ;;  %v4011_v63 = vsel %vm3883_vm4, %v3819_v4, %v3947_v58  ;;  %v4019_v0 = vsel %vm3891_vm5, %v3827_v2, %v3955_v37  ;;  %vm3866_vm6 = vcmp.gt.f32.partialorder %v3802_v53, 0.0  ;;  %v3930_v19 = vmul.f32 0.01, %v3802_v53 }
 0xb06   : > { %v4068_v11 = vpack.c.bf16 %v4019_v0, %v4011_v63  ;;  %vm3874_vm7 = vcmp.gt.f32.partialorder %v3810_v13, 0.0  ;;  %v3938_v52 = vmul.f32 0.01, %v3810_v13  ;;  %v3804_v33 = vadd.f32 %v7211_v16, %v3700_v31 }
 0xb07   : > { %v3994_v28 = vsel %vm3866_vm6, %v3802_v53, %v3930_v19  ;;  %v3812_v22 = vadd.f32 %v7229_v43, %v3708_v56  ;;  %v3705_v35 = vmul.f32 %v7213_v62, %v7798_v47  ;;  %v3801_v6 = vadd.f32 %v7211_v16, %v3697_v15 }
 0xb08   : > { %4231 = vmatpush1.bf16.msra.mxu1 %v4068_v11  ;;  %v4002_v48 = vsel %vm3874_vm7, %v3810_v13, %v3938_v52  ;;  %vm3868_vm8 = vcmp.gt.f32.partialorder %v3804_v33, 0.0  ;;  %v3932_v45 = vmul.f32 0.01, %v3804_v33  ;;  %v3699_v29 = vmul.f32 %v7195_v61, %v7799_v12 }
 0xb09   : > { %v4059_v1 = vpack.c.bf16 %v4002_v48, %v3994_v28  ;;  %vm3876_vm9 = vcmp.gt.f32.partialorder %v3812_v22, 0.0  ;;  %v3940_v23 = vmul.f32 0.01, %v3812_v22  ;;  %v3809_v59 = vadd.f32 %v7229_v43, %v3705_v35 }
 0xb0a   : > { %v3996_v3 = vsel %vm3868_vm8, %v3804_v33, %v3932_v45  ;;  %vm3865_vm0 = vcmp.gt.f32.partialorder %v3801_v6, 0.0  ;;  %v3929_v24 = vmul.f32 0.01, %v3801_v6  ;;  %v3707_v40 = vmul.f32 %v7213_v62, %v7800_v7 }
 0xb0b   : > { %4191 = vmatprep.subr.bf16.mxu0 %v4059_v1  ;;  %v4004_v32 = vsel %vm3876_vm9, %v3812_v22, %v3940_v23  ;;  %vm3873_vm10 = vcmp.gt.f32.partialorder %v3809_v59, 0.0  ;;  %v3937_v60 = vmul.f32 0.01, %v3809_v59  ;;  %v3803_v57 = vadd.f32 %v7211_v16, %v3699_v29  ;;  %v4090_v16 = vpop.permute.xlu1 %4089 }
 0xb0c   : > { %v4061_v49 = vpack.c.bf16 %v4004_v32, %v3996_v3  ;;  %v3811_v61 = vadd.f32 %v7229_v43, %v3707_v40  ;;  %v3993_v30 = vsel %vm3865_vm0, %v3801_v6, %v3929_v24 }
 0xb0d   : > { %v4001_v36 = vsel %vm3873_vm10, %v3809_v59, %v3937_v60  ;;  %vm3867_vm11 = vcmp.gt.f32.partialorder %v3803_v57, 0.0  ;;  %v3931_v41 = vmul.f32 0.01, %v3803_v57 }
 0xb0e   : > { %4232 = vmatprep.subr.bf16.mxu1 %v4061_v49  ;;  %v4058_v18 = vpack.c.bf16 %v4001_v36, %v3993_v30  ;;  %vm3875_vm12 = vcmp.gt.f32.partialorder %v3811_v61, 0.0  ;;  %v3939_v55 = vmul.f32 0.01, %v3811_v61 }
 0xb0f   : > { %v3995_v62 = vsel %vm3867_vm11, %v3803_v57, %v3931_v41 }
 0xb10   : > { %4192 = vmatpush1.bf16.msra.mxu0 %v4058_v18  ;;  %v4003_v44 = vsel %vm3875_vm12, %v3811_v61, %v3939_v55 }
 0xb11   : > { %v4060_v42 = vpack.c.bf16 %v4003_v44, %v3995_v62 }
 0xb13   : > { %4233 = vmatpush1.bf16.msra.mxu1 %v4060_v42  ;;  %4469 = vmatmul.mubr.msk.bf16.vlgmr.msra.gmra.mxu0 %vm1112_vm1, %v7266_v20 }
 0xb16   : > { %4470 = vmatmul.mubr.msk.bf16.vlgmr.msra.gmra.mxu1 %vm1112_vm1, %v7266_v20 }
 0xbaf   : > { %v4129_v43 = vpop.f32.mrf.mxu0 }
 0xbb0   : > { %v4130_v8 = vadd.f32 %v4129_v43, %v4090_v16 }
 0xbb1   : > { %v4131_v54 = vpop.f32.mrf.mxu0 }
 0xbb2   : > { %v4170_v25 = vpop.f32.mrf.mxu1  ;;  %v4132_v27 = vadd.f32 %v4131_v54, %v4090_v16 }
 0xbb3   : > { %v4133_v4 = vpop.f32.mrf.mxu0  ;;  %v4171_v39 = vadd.f32 %v4170_v25, %v4090_v16 }
 0xbb4   : > { %v4172_v2 = vpop.f32.mrf.mxu1  ;;  %v4267_v9 = vcombine.low %v4130_v8, %v4132_v27 }
 0xbb5   : > { %v4173_v38 = vadd.f32 %v4172_v2, %v4090_v16  ;;  %v4134_v10 = vpop.f32.mrf.mxu0 }
 0xbb6   : > { %v4174_v17 = vpop.f32.mrf.mxu1  ;;  %4275 = vst [vmem:[%s413_s26] sm:$0x77] %v4267_v9 }
 0xbb7   : > { %v4268_v20 = vcombine.low %v4171_v39, %v4173_v38 }
 0xbb8   : > { %v4175_v46 = vpop.f32.mrf.mxu1 }
 0xbb9   : > { %4276 = vst [vmem:[%s413_s26 + $0x8] sm:$0x77] %v4268_v20 }
 0xbd3   : > { %v4211_v14 = vpop.f32.mrf.mxu0 }
 0xbd4   : > { %v4212_v51 = vadd.f32 %v4211_v14, %v4090_v16 }
 0xbd5   : > { %v4213_v50 = vpop.f32.mrf.mxu0 }
 0xbd6   : > { %v4252_v34 = vpop.f32.mrf.mxu1  ;;  %v4214_v58 = vadd.f32 %v4213_v50, %v4090_v16 }
 0xbd7   : > { %v4215_v37 = vpop.f32.mrf.mxu0  ;;  %v4253_v5 = vadd.f32 %v4252_v34, %v4090_v16 }
 0xbd8   : > { %v4269_v53 = vcombine.low %v4212_v51, %v4214_v58  ;;  %v4254_v13 = vpop.f32.mrf.mxu1 }
 0xbd9   : > { %v4255_v31 = vadd.f32 %v4254_v13, %v4090_v16  ;;  %v4216_v26 = vpop.f32.mrf.mxu0 }
 0xbda   : > { %4277 = vst [vmem:[%s413_s26 + $0x10] sm:$0x77] %v4269_v53  ;;  %v4256_v56 = vpop.f32.mrf.mxu1 }
 0xbdb   : > { %v4270_v21 = vcombine.low %v4253_v5, %v4255_v31 }
 0xbdc   : > { %v4257_v15 = vpop.f32.mrf.mxu1 }
 0xbdd   : > { %4278 = vst [vmem:[%s413_s26 + $0x18] sm:$0x77] %v4270_v21 }
 0xbde PF: > { %s22_s21 = sadd.s32 1, %s4825_s21  }
 0xbdf   : > { %p19_p4 = scmp.ge.s32.totalorder %s22_s21, 4  }
 0xbe1   :  { %21 = sbr.rel (!%p19_p4) target bundleno = 1 (0x1), region = 98 }

</bundles_post_ra>
